<compile_context>
chip_gen: v6e
topology: v6e:2x2x1
jax: 0.10.0
libtpu: 0.0.40
codegen_flags: <defaults>
</compile_context>

<pallas_src>
import jax
import jax.numpy as jnp
from jax import lax
from jax.experimental import pallas as pl
from jax.experimental.pallas import tpu as pltpu


N_IN, H1, H2, N_OUT = 784, 512, 256, 1


def _round_up(x, m):
    return (x + m - 1) // m * m


def discriminator_kernel(x_ref, w1_ref, b1_ref, w2_ref, b2_ref,
                         w3_ref, b3_ref, o_ref):
    # Layer 1: Linear(784 -> 512) + LeakyReLU(0.2)
    # x arrives in its natural dtype; cast to bf16 on the VPU so the MXU runs
    # its fast path. Accumulate in f32.
    x = x_ref[...].astype(jnp.bfloat16)
    h = jnp.dot(x, w1_ref[...], preferred_element_type=jnp.float32)
    h = h + b1_ref[...]                       # f32 VPU
    h = jnp.where(h >= 0, h, 0.2 * h)         # LeakyReLU(0.2) in f32

    # Layer 2: Linear(512 -> 256) + LeakyReLU(0.2)
    h = jnp.dot(h.astype(jnp.bfloat16), w2_ref[...],
                preferred_element_type=jnp.float32)
    h = h + b2_ref[...]
    h = jnp.where(h >= 0, h, 0.2 * h)

    # Output layer: Linear(256 -> 1) + Sigmoid.
    # Contract (1, 256) against (tile, 256) on the shared 256 axis (q @ k^T
    # pattern) so the logits land as a lane-dense (1, tile) row; stays in f32.
    logits = lax.dot_general(
        w3_ref[...], h,
        dimension_numbers=(((1,), (1,)), ((), ())),
        preferred_element_type=jnp.float32)
    logits = logits + b3_ref[...]             # (1, 1) broadcasts over lanes

    # Sigmoid via exp + EUP reciprocal (keeps the VPU out of the epilogue).
    sig = pl.reciprocal(1.0 + jnp.exp(-logits), approx=True)
    o_ref[...] = sig.astype(o_ref.dtype)


def prepare_params(params):
    """One-time packing of the discriminator weights for the kernel.

    Call this once (e.g. after each optimizer step or once for inference), NOT
    inside the per-batch forward path: it re-materializes ~1.2 MiB of weights.
    """
    w1, b1, w2, b2, w3, b3 = params
    return (
        w1.astype(jnp.bfloat16),                     # (784, 512) MXU operand
        b1.reshape(1, H1).astype(jnp.float32),       # (1, 512)
        w2.astype(jnp.bfloat16),                     # (512, 256) MXU operand
        b2.reshape(1, H2).astype(jnp.float32),       # (1, 256)
        w3.reshape(1, H2).astype(jnp.float32),       # (1, 256) head row (f32)
        b3.reshape(1, 1).astype(jnp.float32),        # (1, 1)
    )


def discriminator_forward(x, prepared_params, *, batch_tile=None,
                          vmem_limit_bytes=None):
    """Forward pass. `prepared_params` must come from prepare_params()."""
    w1, b1, w2, b2, w3_row, b3 = prepared_params
    B = x.shape[0]

    # Batch tile: up to 1024 rows, multiple of 128 (lane-aligned output block,
    # bf16-sublane aligned x block). 1024 is VMEM-safe on v7x (32 MiB scoped
    # default / 64 MiB physical) and gives >=2 grid steps for B >= 2048 so the
    # "parallel" axis can shard across both v7x TensorCores. On v5e/v6e, pass
    # batch_tile=2048..4096 and raise vmem_limit_bytes for even fewer steps.
    if batch_tile is None:
        batch_tile = min(1024, _round_up(B, 128))
    batch_tile = max(128, _round_up(batch_tile, 128))
    B_pad = _round_up(B, batch_tile)
    n_tiles = B_pad // batch_tile

    # Only touch x in the wrapper if the batch needs padding to a tile
    # multiple; otherwise it is streamed straight from HBM by the kernel.
    x_in = x
    if B_pad != B:
        x_in = jnp.zeros((B_pad, N_IN), x.dtype).at[:B].set(x)

    # x block spec; deepen the pipeline to 3 buffers when there are enough
    # grid steps for it to matter (v6e sits closest to the HBM/MXU ridge).
    spec_kwargs = {}
    if hasattr(pl, "Buffered") and n_tiles >= 3:
        spec_kwargs["pipeline_mode"] = pl.Buffered(3)
    try:
        x_spec = pl.BlockSpec((batch_tile, N_IN), lambda i: (i, 0),
                              **spec_kwargs)
    except TypeError:  # pipeline_mode not supported -> default double buffer
        x_spec = pl.BlockSpec((batch_tile, N_IN), lambda i: (i, 0))

    # Constant index_maps -> weights stay resident in VMEM across grid steps.
    const = lambda shape: pl.BlockSpec(shape, lambda i: (0, 0))

    out = pl.pallas_call(
        discriminator_kernel,
        out_shape=jax.ShapeDtypeStruct((1, B_pad), jnp.float32),
        grid_spec=pltpu.PrefetchScalarGridSpec(
            num_scalar_prefetch=0,
            grid=(n_tiles,),
            in_specs=[
                x_spec,                 # x tile (batch_tile, 784)
                const((N_IN, H1)),      # w1 (bf16)
                const((1, H1)),         # b1 (f32)
                const((H1, H2)),        # w2 (bf16)
                const((1, H2)),         # b2 (f32)
                const((1, H2)),         # w3 row (f32)
                const((1, 1)),          # b3 (f32)
            ],
            # Lane-dense output: (1, B_pad) slab, batch on the lane axis.
            out_specs=pl.BlockSpec((1, batch_tile), lambda i: (0, i)),
        ),
        compiler_params=pltpu.CompilerParams(
            dimension_semantics=("parallel",),
            vmem_limit_bytes=vmem_limit_bytes),
    )(x_in, w1, b1, w2, b2, w3_row, b3)

    # Layout plumbing only: slice off batch padding, present as (B, 1).
    return out[0, :B].reshape(B, 1)


def init_params(key):
    """Deterministic init mimicking PyTorch nn.Linear default (U(-1/sqrt(fan_in), +))."""
    ks = jax.random.split(key, 6)

    def linear(kw, kb, fan_in, fan_out):
        bound = 1.0 / jnp.sqrt(fan_in)
        w = jax.random.uniform(kw, (fan_in, fan_out), jnp.float32, -bound, bound)
        b = jax.random.uniform(kb, (1, fan_out), jnp.float32, -bound, bound)
        return w, b

    w1, b1 = linear(ks[0], ks[1], N_IN, H1)
    w2, b2 = linear(ks[2], ks[3], H1, H2)
    w3, b3 = linear(ks[4], ks[5], H2, N_OUT)
    return (w1, b1, w2, b2, w3, b3)


def reference_forward(x, params):
    """Pure f32 JAX reference (matches PyTorch module semantics)."""
    w1, b1, w2, b2, w3, b3 = params
    h = x @ w1 + b1
    h = jnp.where(h >= 0, h, 0.2 * h)
    h = h @ w2 + b2
    h = jnp.where(h >= 0, h, 0.2 * h)
    h = h @ w3 + b3
    return jax.nn.sigmoid(h)


if __name__ == "__main__":
    key = jax.random.PRNGKey(0)
    k_params, k_x1, k_x2 = jax.random.split(key, 3)

    params = init_params(k_params)
    prepared = prepare_params(params)   # done once, not per forward call

    # Case 1: tiny batch (pads 8 -> 128 rows, single grid step).
    x1 = jax.random.normal(k_x1, (8, N_IN), dtype=jnp.float32)
    out1 = jax.block_until_ready(discriminator_forward(x1, prepared))
    ref1 = reference_forward(x1, params)
    assert out1.shape == (8, 1)
    # bf16 MXU operands -> loosen tolerance vs the f32 reference.
    assert jnp.allclose(out1, ref1, atol=2e-2, rtol=2e-2), "mismatch (small batch)"

    # Case 2: multi-tile grid (3 steps of 128 rows), exercises the pipelined
    # x path (Buffered(3)) and the tiled lane-dense output writeback.
    x2 = jax.random.normal(k_x2, (384, N_IN), dtype=jnp.float32)
    out2 = jax.block_until_ready(
        discriminator_forward(x2, prepared, batch_tile=128))
    ref2 = reference_forward(x2, params)
    assert out2.shape == (384, 1)
    assert jnp.allclose(out2, ref2, atol=2e-2, rtol=2e-2), "mismatch (multi tile)"

    print("KERNEL_OK")
</pallas_src>

<mosaic_0001>
module attributes {stable_mosaic.version = 11 : i64} {
  func.func @discriminator_kernel(%arg0: i32, %arg1: memref<128x784xf32, #tpu.memory_space<vmem>>, %arg2: memref<784x512xbf16, #tpu.memory_space<vmem>>, %arg3: memref<1x512xf32, #tpu.memory_space<vmem>>, %arg4: memref<512x256xbf16, #tpu.memory_space<vmem>>, %arg5: memref<1x256xf32, #tpu.memory_space<vmem>>, %arg6: memref<1x256xf32, #tpu.memory_space<vmem>>, %arg7: memref<1x1xf32, #tpu.memory_space<vmem>>, %arg8: memref<1x128xf32, #tpu.memory_space<vmem>>) attributes {dimension_semantics = [#tpu.dimension_semantics<parallel>], iteration_bounds = array<i64: 1>, scalar_prefetch = 0 : i64, scratch_operands = 0 : i64, tpu.core_type = #tpu.core_type<tc>, window_params = [{transform_indices = @transform_0, window_bounds = array<i64: 128, 784>}, {pipeline_mode = #tpu.pipeline_mode<synchronous>, transform_indices = @transform_1, window_bounds = array<i64: 784, 512>}, {pipeline_mode = #tpu.pipeline_mode<synchronous>, transform_indices = @transform_2, window_bounds = array<i64: 1, 512>}, {pipeline_mode = #tpu.pipeline_mode<synchronous>, transform_indices = @transform_3, window_bounds = array<i64: 512, 256>}, {pipeline_mode = #tpu.pipeline_mode<synchronous>, transform_indices = @transform_4, window_bounds = array<i64: 1, 256>}, {pipeline_mode = #tpu.pipeline_mode<synchronous>, transform_indices = @transform_5, window_bounds = array<i64: 1, 256>}, {pipeline_mode = #tpu.pipeline_mode<synchronous>, transform_indices = @transform_6, window_bounds = array<i64: 1, 1>}, {transform_indices = @transform_7, window_bounds = array<i64: 1, 128>}]} {
    %c0 = arith.constant 0 : index
    %c0_0 = arith.constant 0 : index
    %0 = vector.load %arg1[%c0, %c0_0] : memref<128x784xf32, #tpu.memory_space<vmem>>, vector<128x784xf32>
    %1 = arith.truncf %0 : vector<128x784xf32> to vector<128x784xbf16>
    %c0_1 = arith.constant 0 : index
    %c0_2 = arith.constant 0 : index
    %2 = vector.load %arg2[%c0_1, %c0_2] : memref<784x512xbf16, #tpu.memory_space<vmem>>, vector<784x512xbf16>
    %cst = arith.constant dense<0.000000e+00> : vector<128x512xf32>
    %3 = tpu.matmul %1, %2, %cst {dimension_numbers = #tpu.dot_dimension_numbers<[1], [0], [0], [1], [0, 0, 1, 1], [], []>} : vector<128x784xbf16>, vector<784x512xbf16>, vector<128x512xf32> -> vector<128x512xf32>
    %c0_3 = arith.constant 0 : index
    %c0_4 = arith.constant 0 : index
    %4 = vector.load %arg3[%c0_3, %c0_4] : memref<1x512xf32, #tpu.memory_space<vmem>>, vector<1x512xf32>
    %5 = vector.broadcast %4 : vector<1x512xf32> to vector<128x512xf32>
    %6 = arith.addf %3, %5 : vector<128x512xf32>
    %cst_5 = arith.constant 0.000000e+00 : f32
    %7 = vector.broadcast %cst_5 : f32 to vector<128x512xf32>
    %8 = arith.cmpf oge, %6, %7 : vector<128x512xf32>
    %cst_6 = arith.constant 2.000000e-01 : f32
    %9 = vector.broadcast %cst_6 : f32 to vector<128x512xf32>
    %10 = arith.mulf %9, %6 : vector<128x512xf32>
    %11 = arith.select %8, %6, %10 : vector<128x512xi1>, vector<128x512xf32>
    %12 = arith.truncf %11 : vector<128x512xf32> to vector<128x512xbf16>
    %c0_7 = arith.constant 0 : index
    %c0_8 = arith.constant 0 : index
    %13 = vector.load %arg4[%c0_7, %c0_8] : memref<512x256xbf16, #tpu.memory_space<vmem>>, vector<512x256xbf16>
    %cst_9 = arith.constant dense<0.000000e+00> : vector<128x256xf32>
    %14 = tpu.matmul %12, %13, %cst_9 {dimension_numbers = #tpu.dot_dimension_numbers<[1], [0], [0], [1], [0, 0, 1, 1], [], []>} : vector<128x512xbf16>, vector<512x256xbf16>, vector<128x256xf32> -> vector<128x256xf32>
    %c0_10 = arith.constant 0 : index
    %c0_11 = arith.constant 0 : index
    %15 = vector.load %arg5[%c0_10, %c0_11] : memref<1x256xf32, #tpu.memory_space<vmem>>, vector<1x256xf32>
    %16 = vector.broadcast %15 : vector<1x256xf32> to vector<128x256xf32>
    %17 = arith.addf %14, %16 : vector<128x256xf32>
    %cst_12 = arith.constant 0.000000e+00 : f32
    %18 = vector.broadcast %cst_12 : f32 to vector<128x256xf32>
    %19 = arith.cmpf oge, %17, %18 : vector<128x256xf32>
    %cst_13 = arith.constant 2.000000e-01 : f32
    %20 = vector.broadcast %cst_13 : f32 to vector<128x256xf32>
    %21 = arith.mulf %20, %17 : vector<128x256xf32>
    %22 = arith.select %19, %17, %21 : vector<128x256xi1>, vector<128x256xf32>
    %c0_14 = arith.constant 0 : index
    %c0_15 = arith.constant 0 : index
    %23 = vector.load %arg6[%c0_14, %c0_15] : memref<1x256xf32, #tpu.memory_space<vmem>>, vector<1x256xf32>
    %cst_16 = arith.constant dense<0.000000e+00> : vector<1x128xf32>
    %24 = tpu.matmul %23, %22, %cst_16 {dimension_numbers = #tpu.dot_dimension_numbers<[1], [1], [0], [0], [0, 0, 1, 0], [], []>} : vector<1x256xf32>, vector<128x256xf32>, vector<1x128xf32> -> vector<1x128xf32>
    %c0_17 = arith.constant 0 : index
    %c0_18 = arith.constant 0 : index
    %25 = vector.load %arg7[%c0_17, %c0_18] : memref<1x1xf32, #tpu.memory_space<vmem>>, vector<1x1xf32>
    %26 = vector.broadcast %25 : vector<1x1xf32> to vector<1x128xf32>
    %27 = arith.addf %24, %26 : vector<1x128xf32>
    %cst_19 = arith.constant 0.000000e+00 : f32
    %28 = vector.broadcast %cst_19 : f32 to vector<1x128xf32>
    %29 = arith.subf %28, %27 : vector<1x128xf32>
    %30 = math.exp %29 : vector<1x128xf32>
    %cst_20 = arith.constant 1.000000e+00 : f32
    %31 = vector.broadcast %cst_20 : f32 to vector<1x128xf32>
    %32 = arith.addf %31, %30 : vector<1x128xf32>
    %33 = tpu.reciprocal %32 {approx = true} : vector<1x128xf32> -> vector<1x128xf32>
    %c0_21 = arith.constant 0 : index
    %c0_22 = arith.constant 0 : index
    %34 = vector.load %arg8[%c0_21, %c0_22] : memref<1x128xf32, #tpu.memory_space<vmem>>, vector<1x128xf32>
    tpu.vector_store %arg8[%c0_21, %c0_22], %33 {strides = array<i32>} : memref<1x128xf32, #tpu.memory_space<vmem>>, vector<1x128xf32>,
    return
  }
  func.func @transform_0(%arg0: i32) -> (i32, i32) {
    %c0_i32 = arith.constant 0 : i32
    %c0_i32_0 = arith.constant 0 : i32
    return %arg0, %c0_i32 : i32, i32
  }
  func.func @transform_1(%arg0: i32) -> (i32, i32) {
    %c0_i32 = arith.constant 0 : i32
    %c0_i32_0 = arith.constant 0 : i32
    %c0_i32_1 = arith.constant 0 : i32
    return %c0_i32, %c0_i32_0 : i32, i32
  }
  func.func @transform_2(%arg0: i32) -> (i32, i32) {
    %c0_i32 = arith.constant 0 : i32
    %c0_i32_0 = arith.constant 0 : i32
    %c0_i32_1 = arith.constant 0 : i32
    return %c0_i32, %c0_i32_0 : i32, i32
  }
  func.func @transform_3(%arg0: i32) -> (i32, i32) {
    %c0_i32 = arith.constant 0 : i32
    %c0_i32_0 = arith.constant 0 : i32
    %c0_i32_1 = arith.constant 0 : i32
    return %c0_i32, %c0_i32_0 : i32, i32
  }
  func.func @transform_4(%arg0: i32) -> (i32, i32) {
    %c0_i32 = arith.constant 0 : i32
    %c0_i32_0 = arith.constant 0 : i32
    %c0_i32_1 = arith.constant 0 : i32
    return %c0_i32, %c0_i32_0 : i32, i32
  }
  func.func @transform_5(%arg0: i32) -> (i32, i32) {
    %c0_i32 = arith.constant 0 : i32
    %c0_i32_0 = arith.constant 0 : i32
    %c0_i32_1 = arith.constant 0 : i32
    return %c0_i32, %c0_i32_0 : i32, i32
  }
  func.func @transform_6(%arg0: i32) -> (i32, i32) {
    %c0_i32 = arith.constant 0 : i32
    %c0_i32_0 = arith.constant 0 : i32
    %c0_i32_1 = arith.constant 0 : i32
    return %c0_i32, %c0_i32_0 : i32, i32
  }
  func.func @transform_7(%arg0: i32) -> (i32, i32) {
    %c0_i32 = arith.constant 0 : i32
    %c0_i32_0 = arith.constant 0 : i32
    return %c0_i32, %arg0 : i32, i32
  }
}

</mosaic_0001>

<bundles_post_ra>
// kernel: tpu_custom_call.1
= control target key start
LH: loop header
LB: loop body
LE: loop exit
PB: predicated region body
PF: predicated region fallthrough
CT: control target
= control target key end

     0   :  { %s5853_s0 = inlined_call_operand.vmem [shape: f32[128,784], index: 0, kind: input, shape index: {}]   ;;  %s5854_s1 = inlined_call_operand.vmem [shape: bf16[784,512], index: 1, kind: input, shape index: {}]   ;;  %s5855_s2 = inlined_call_operand.vmem [shape: f32[1,512], index: 2, kind: input, shape index: {}]   ;;  %s5856_s3 = inlined_call_operand.hbm [shape: bf16[512,256], index: 3, kind: input, shape index: {}]   ;;  %s5857_s4 = inlined_call_operand.vmem [shape: f32[1,256], index: 4, kind: input, shape index: {}]   ;;  %s5858_s5 = inlined_call_operand.vmem [shape: f32[1,256], index: 5, kind: input, shape index: {}]   ;;  %s5859_s6 = inlined_call_operand.<no memory space> [shape: f32[1,1], index: 6, kind: input, shape index: {}]   ;;  %s5860_s7 = inlined_call_operand.hbm [shape: f32[1,128], index: 7, kind: output, shape index: {}]  }
   0x1   :  { %v12_v0 = vstv %s5859_s6 }
   0x2   :  { %13 = vst [vmem:[#allocation2] sm:$0x1] %v12_v0 }
   0x3   :  { %14 = vsyncpa [#allocation4], 0 }
   0x4   :  { %15 = vsyncpa [#allocation5], 0  ;;  %s4115_s26 = smov [#allocation3]  }
   0x5   :  { %s27_s27 = sshll.u32 %s4115_s26, 4  ;;  %s28_s27 = int_to_ptr.vmem [resolvable:$true] %s27_s27 }
   0x6   :  { %s4079_s28 = scalar_lea.vmem %s28_s27, 8192  ;;  %p4084_p1 = scmp.lt.s32.totalorder %s28_s27, %s28_s27 }
   0x7   :  { %p4080_p0 = scmp.ne.s32.totalorder %s28_s27, %s4079_s28  ;;  %p4085_p2 = scmp.lt.s32.totalorder %s4079_s28, %s4079_s28 }
   0x9   :  { %p4086_p3 = por %p4085_p2, %p4084_p1 }
   0xb   :  { %p4087_p4 = pnand %p4086_p3, %p4080_p0 }
   0xd   :  { %4090 = shalt.err (!%p4087_p4)
}
   0xe   :  { %s4116_s29 = smov 128   ;;  %s4117_s30 = smov 8  }
   0xf   :  { %33 = dma.hbm_to_vmem [thread:$0]  %s5856_s3, 8192, %s28_s27, [#allocation4], %s4116_s29, %s4116_s29, %s4117_s30  }
  0x10   :  { %4111 = dma.done.wait [#allocation4], 8192  }
  0x11   :  { %4112 = vsyncadd [#allocation4], 4294959104  ;;  %v3676_v1 = vld [vmem:[%s5854_s1 + $0xe4] ss:$16 sps:$4 sm:$0xff]   ;;  %v5862_v3 = vmov 0   ;;  %v45_v48 = vld [vmem:[%s5853_s0 + $0x8] sm:$0xff] }
  0x12   :  { %v3678_v2 = vld [vmem:[%s5854_s1 + $0x2e4] ss:$16 sps:$4 sm:$0xff]   ;;  %3675 = vset.pattern.permute.xlu0 %v5862_v3  ;;  %1435 = vmatprep.subr.bf16.mxu0 %v3676_v1  ;;  %v3680_v4 = vld [vmem:[%s5854_s1 + $0xe0] ss:$16 sps:$4 sm:$0xff]   ;;  %v47_v50 = vld [vmem:[%s5853_s0 + $0x18] sm:$0xff]  ;;  %vm1410_vm0 = vcmask 130048  }
  0x13   :  { %v3681_v5 = vld [vmem:[%s5854_s1 + $0x2e0] ss:$16 sps:$4 sm:$0xff]   ;;  %1548 = vmatprep.subr.bf16.mxu1 %v3678_v2  ;;  %v3682_v6 = vld [vmem:[%s5854_s1 + $0xc4] ss:$16 sps:$4 sm:$0xff]   ;;  %1436 = vmatpush1.bf16.msra.mxu0 %v3680_v4 }
  0x14   :  { %1549 = vmatpush1.bf16.msra.mxu1 %v3681_v5  ;;  %v3684_v7 = vld [vmem:[%s5854_s1 + $0x2c4] ss:$16 sps:$4 sm:$0xff]   ;;  %v3686_v8 = vld [vmem:[%s5854_s1 + $0xc0] ss:$16 sps:$4 sm:$0xff]   ;;  %1437 = vmatprep.subr.bf16.mxu0 %v3682_v6 }
  0x15   :  { %v3687_v9 = vld [vmem:[%s5854_s1 + $0x2c0] ss:$16 sps:$4 sm:$0xff]   ;;  %1550 = vmatprep.subr.bf16.mxu1 %v3684_v7  ;;  %v3688_v10 = vld [vmem:[%s5854_s1 + $0xa4] ss:$16 sps:$4 sm:$0xff]  }
  0x16   :  { %v3690_v11 = vld [vmem:[%s5854_s1 + $0x2a4] ss:$16 sps:$4 sm:$0xff]   ;;  %v3692_v12 = vld [vmem:[%s5854_s1 + $0xa0] ss:$16 sps:$4 sm:$0xff]  }
  0x17   :  { %v3693_v13 = vld [vmem:[%s5854_s1 + $0x2a0] ss:$16 sps:$4 sm:$0xff]   ;;  %1438 = vmatpush1.bf16.msra.mxu0 %v3686_v8  ;;  %v3694_v14 = vld [vmem:[%s5854_s1 + $0x84] ss:$16 sps:$4 sm:$0xff]  }
  0x18   :  { %1551 = vmatpush1.bf16.msra.mxu1 %v3687_v9  ;;  %1439 = vmatprep.subr.bf16.mxu0 %v3688_v10  ;;  %v3696_v15 = vld [vmem:[%s5854_s1 + $0x284] ss:$16 sps:$4 sm:$0xff]   ;;  %v3698_v16 = vld [vmem:[%s5854_s1 + $0x80] ss:$16 sps:$4 sm:$0xff]   ;;  %v51_v10 = vld [vmem:[%s5853_s0 + $0x38] sm:$0xff] }
  0x19   :  { %1552 = vmatprep.subr.bf16.mxu1 %v3690_v11  ;;  %v3699_v17 = vld [vmem:[%s5854_s1 + $0x280] ss:$16 sps:$4 sm:$0xff]   ;;  %v3700_v18 = vld [vmem:[%s5854_s1 + $0x64] ss:$16 sps:$4 sm:$0xff]  }
  0x1a   :  { %v3702_v19 = vld [vmem:[%s5854_s1 + $0x264] ss:$16 sps:$4 sm:$0xff]   ;;  %v3704_v20 = vld [vmem:[%s5854_s1 + $0x60] ss:$16 sps:$4 sm:$0xff]  }
  0x1b   :  { %1440 = vmatpush1.bf16.msra.mxu0 %v3692_v12  ;;  %v3705_v21 = vld [vmem:[%s5854_s1 + $0x260] ss:$16 sps:$4 sm:$0xff]   ;;  %v3706_v22 = vld [vmem:[%s5854_s1 + $0x44] ss:$16 sps:$4 sm:$0xff]   ;;  %v53_v12 = vld [vmem:[%s5853_s0 + $0x48] sm:$0xff] }
  0x1c   :  { %1553 = vmatpush1.bf16.msra.mxu1 %v3693_v13  ;;  %1441 = vmatprep.subr.bf16.mxu0 %v3694_v14  ;;  %v3708_v23 = vld [vmem:[%s5854_s1 + $0x244] ss:$16 sps:$4 sm:$0xff]   ;;  %v3710_v24 = vld [vmem:[%s5854_s1 + $0x40] ss:$16 sps:$4 sm:$0xff]  }
  0x1d   :  { %1554 = vmatprep.subr.bf16.mxu1 %v3696_v15  ;;  %v3711_v25 = vld [vmem:[%s5854_s1 + $0x240] ss:$16 sps:$4 sm:$0xff]   ;;  %v3712_v26 = vld [vmem:[%s5854_s1 + $0x24] ss:$16 sps:$4 sm:$0xff]  }
  0x1e   :  { %v3714_v27 = vld [vmem:[%s5854_s1 + $0x224] ss:$16 sps:$4 sm:$0xff]   ;;  %v3716_v28 = vld [vmem:[%s5854_s1 + $0x20] ss:$16 sps:$4 sm:$0xff]  }
  0x1f   :  { %1442 = vmatpush1.bf16.msra.mxu0 %v3698_v16  ;;  %v3717_v29 = vld [vmem:[%s5854_s1 + $0x220] ss:$16 sps:$4 sm:$0xff]   ;;  %v3718_v30 = vld [vmem:[%s5854_s1 + $0x4] ss:$16 sps:$4 sm:$0xff]   ;;  %v59_v16 = vld [vmem:[%s5853_s0 + $0x78] sm:$0xff] }
  0x20   :  { %1555 = vmatpush1.bf16.msra.mxu1 %v3699_v17  ;;  %1443 = vmatprep.subr.bf16.mxu0 %v3700_v18  ;;  %v3720_v31 = vld [vmem:[%s5854_s1 + $0x204] ss:$16 sps:$4 sm:$0xff]   ;;  %v3722_v32 = vld [vmem:[%s5854_s1] ss:$16 sps:$4 sm:$0xff]  }
  0x21   :  { %1556 = vmatprep.subr.bf16.mxu1 %v3702_v19  ;;  %v3723_v33 = vld [vmem:[%s5854_s1 + $0x200] ss:$16 sps:$4 sm:$0xff]   ;;  %v3724_v34 = vld [vmem:[%s5854_s1 + $0x1e4] ss:$16 sps:$4 sm:$0xff]  }
  0x22   :  { %v3726_v35 = vld [vmem:[%s5854_s1 + $0x3e4] ss:$16 sps:$4 sm:$0xff]   ;;  %v3728_v36 = vld [vmem:[%s5854_s1 + $0x1e0] ss:$16 sps:$4 sm:$0xff]  }
  0x23   :  { %1444 = vmatpush1.bf16.msra.mxu0 %v3704_v20  ;;  %v3729_v37 = vld [vmem:[%s5854_s1 + $0x3e0] ss:$16 sps:$4 sm:$0xff]   ;;  %v3730_v38 = vld [vmem:[%s5854_s1 + $0x1c4] ss:$16 sps:$4 sm:$0xff]   ;;  %v61_v20 = vld [vmem:[%s5853_s0 + $0x88] sm:$0xff] }
  0x24   :  { %1557 = vmatpush1.bf16.msra.mxu1 %v3705_v21  ;;  %1445 = vmatprep.subr.bf16.mxu0 %v3706_v22  ;;  %v3732_v39 = vld [vmem:[%s5854_s1 + $0x3c4] ss:$16 sps:$4 sm:$0xff]   ;;  %v3734_v40 = vld [vmem:[%s5854_s1 + $0x1c0] ss:$16 sps:$4 sm:$0xff]  }
  0x25   :  { %1558 = vmatprep.subr.bf16.mxu1 %v3708_v23  ;;  %v3735_v41 = vld [vmem:[%s5854_s1 + $0x3c0] ss:$16 sps:$4 sm:$0xff]   ;;  %v3736_v42 = vld [vmem:[%s5854_s1 + $0x1a4] ss:$16 sps:$4 sm:$0xff]  }
  0x26   :  { %v3738_v43 = vld [vmem:[%s5854_s1 + $0x3a4] ss:$16 sps:$4 sm:$0xff]   ;;  %v3740_v44 = vld [vmem:[%s5854_s1 + $0x1a0] ss:$16 sps:$4 sm:$0xff]  }
  0x27   :  { %1446 = vmatpush1.bf16.msra.mxu0 %v3710_v24  ;;  %v3741_v45 = vld [vmem:[%s5854_s1 + $0x3a0] ss:$16 sps:$4 sm:$0xff]   ;;  %v3742_v46 = vld [vmem:[%s5854_s1 + $0x184] ss:$16 sps:$4 sm:$0xff]  }
  0x28   :  { %1559 = vmatpush1.bf16.msra.mxu1 %v3711_v25  ;;  %1447 = vmatprep.subr.bf16.mxu0 %v3712_v26  ;;  %v3744_v47 = vld [vmem:[%s5854_s1 + $0x384] ss:$16 sps:$4 sm:$0xff]   ;;  %v3746_v52 = vld [vmem:[%s5854_s1 + $0x180] ss:$16 sps:$4 sm:$0xff]  }
  0x29   :  { %1560 = vmatprep.subr.bf16.mxu1 %v3714_v27  ;;  %v52_v49 = vld [vmem:[%s5853_s0 + $0x40] sm:$0xff]  ;;  %v54_v51 = vld [vmem:[%s5853_s0 + $0x50] sm:$0xff] }
  0x2a   :  { %v3747_v53 = vld [vmem:[%s5854_s1 + $0x380] ss:$16 sps:$4 sm:$0xff]   ;;  %v3748_v54 = vld [vmem:[%s5854_s1 + $0x164] ss:$16 sps:$4 sm:$0xff]   ;;  %v4326_v55 = vpack.c.bf16 %v52_v49, %v45_v48  ;;  %v4328_v56 = vpack.c.bf16 %v54_v51, %v47_v50  ;;  %v87_v48 = vld [vmem:[%s5853_s0 + $0x158] sm:$0xff] }
  0x2b   :  { %1448 = vmatpush1.bf16.msra.mxu0 %v3716_v28  ;;  %v3750_v57 = vld [vmem:[%s5854_s1 + $0x364] ss:$16 sps:$4 sm:$0xff]   ;;  %v3752_v58 = vld [vmem:[%s5854_s1 + $0x160] ss:$16 sps:$4 sm:$0xff]   ;;  %v65_v28 = vld [vmem:[%s5853_s0 + $0xa8] sm:$0xff] }
  0x2c   :  { %1561 = vmatpush1.bf16.msra.mxu1 %v3717_v29  ;;  %1449 = vmatprep.subr.bf16.mxu0 %v3718_v30  ;;  %v3753_v59 = vld [vmem:[%s5854_s1 + $0x360] ss:$16 sps:$4 sm:$0xff]   ;;  %v3754_v60 = vld [vmem:[%s5854_s1 + $0x144] ss:$16 sps:$4 sm:$0xff]   ;;  %v67_v30 = vld [vmem:[%s5853_s0 + $0xb8] sm:$0xff] }
  0x2d   :  { %1562 = vmatprep.subr.bf16.mxu1 %v3720_v31  ;;  %1467 = vmatprep.mubr.bf16.mxu0 %v4326_v55  ;;  %v3756_v61 = vld [vmem:[%s5854_s1 + $0x344] ss:$16 sps:$4 sm:$0xff]   ;;  %v3758_v62 = vld [vmem:[%s5854_s1 + $0x140] ss:$16 sps:$4 sm:$0xff]   ;;  %v89_v50 = vld [vmem:[%s5853_s0 + $0x168] sm:$0xff] }
  0x2e   :  { %1580 = vmatprep.mubr.bf16.mxu1 %v4328_v56  ;;  %v3759_v63 = vld [vmem:[%s5854_s1 + $0x340] ss:$16 sps:$4 sm:$0xff]   ;;  %v3760_v0 = vld [vmem:[%s5854_s1 + $0x124] ss:$16 sps:$4 sm:$0xff]  }
  0x2f   :  { %1450 = vmatpush1.bf16.msra.mxu0 %v3722_v32  ;;  %v3762_v1 = vld [vmem:[%s5854_s1 + $0x324] ss:$16 sps:$4 sm:$0xff]   ;;  %v3764_v2 = vld [vmem:[%s5854_s1 + $0x120] ss:$16 sps:$4 sm:$0xff]   ;;  %v73_v32 = vld [vmem:[%s5853_s0 + $0xe8] sm:$0xff] }
  0x30   :  { %1563 = vmatpush1.bf16.msra.mxu1 %v3723_v33  ;;  %1451 = vmatprep.subr.bf16.mxu0 %v3724_v34  ;;  %v3765_v4 = vld [vmem:[%s5854_s1 + $0x320] ss:$16 sps:$4 sm:$0xff]   ;;  %v3766_v5 = vld [vmem:[%s5854_s1 + $0x104] ss:$16 sps:$4 sm:$0xff]   ;;  %v75_v34 = vld [vmem:[%s5853_s0 + $0xf8] sm:$0xff] }
  0x31   :  { %1564 = vmatprep.subr.bf16.mxu1 %v3726_v35  ;;  %v3768_v6 = vld [vmem:[%s5854_s1 + $0x304] ss:$16 sps:$4 sm:$0xff]   ;;  %v3770_v7 = vld [vmem:[%s5854_s1 + $0x100] ss:$16 sps:$4 sm:$0xff]  }
  0x32   :  { %v3771_v8 = vld [vmem:[%s5854_s1 + $0x300] ss:$16 sps:$4 sm:$0xff]   ;;  %v3774_v13 = vld [vmem:[%s5854_s1 + $0x4e4] ss:$16 sps:$4 sm:$0xff]  }
  0x33   :  { %1452 = vmatpush2.bf16.msra.mxu0 %v3728_v36  ;;  %v44_v9 = vld [vmem:[%s5853_s0] sm:$0xff]  ;;  %v46_v11 = vld [vmem:[%s5853_s0 + $0x10] sm:$0xff] }
  0x34   :  { %1565 = vmatpush2.bf16.msra.mxu1 %v3729_v37  ;;  %1453 = vmatprep.subr.bf16.mxu0 %v3730_v38  ;;  %v3777_v14 = vld [vmem:[%s5854_s1 + $0x604] ss:$16 sps:$4 sm:$0xff]   ;;  %v3772_v15 = vld [vmem:[%s5854_s1 + $0x4e0] ss:$16 sps:$4 sm:$0xff]   ;;  %v4404_v18 = vpack.c.bf16 %v51_v10, %v44_v9  ;;  %v4406_v19 = vpack.c.bf16 %v53_v12, %v46_v11 }
  0x35   :  { %1566 = vmatprep.subr.bf16.mxu1 %v3732_v39  ;;  %v66_v17 = vld [vmem:[%s5853_s0 + $0xb0] sm:$0xff]  ;;  %v68_v21 = vld [vmem:[%s5853_s0 + $0xc0] sm:$0xff] }
  0x36   :  { %v3775_v22 = vld [vmem:[%s5854_s1 + $0x600] ss:$16 sps:$4 sm:$0xff]   ;;  %v3780_v23 = vld [vmem:[%s5854_s1 + $0x4c4] ss:$16 sps:$4 sm:$0xff]   ;;  %v4420_v24 = vpack.c.bf16 %v66_v17, %v59_v16  ;;  %v4425_v26 = vpack.c.bf16 %v68_v21, %v61_v20  ;;  %v3828_v17 = vld [vmem:[%s5854_s1 + $0x2ec] ss:$16 sps:$4 sm:$0xff]  }
  0x37   :  { %1454 = vmatpush2.bf16.msra.mxu0 %v3734_v40  ;;  %v3778_v25 = vld [vmem:[%s5854_s1 + $0x4c0] ss:$16 sps:$4 sm:$0xff]   ;;  %v3783_v31 = vld [vmem:[%s5854_s1 + $0x4a4] ss:$16 sps:$4 sm:$0xff]   ;;  %v109_v20 = vld [vmem:[%s5853_s0 + $0x208] sm:$0xff] }
  0x38   :  { %1567 = vmatpush2.bf16.msra.mxu1 %v3735_v41  ;;  %1455 = vmatprep.subr.bf16.mxu0 %v3736_v42  ;;  %v58_v27 = vld [vmem:[%s5853_s0 + $0x70] sm:$0xff]  ;;  %v60_v29 = vld [vmem:[%s5853_s0 + $0x80] sm:$0xff] }
  0x39   :  { %1568 = vmatprep.subr.bf16.mxu1 %v3738_v43  ;;  %v80_v33 = vld [vmem:[%s5853_s0 + $0x120] sm:$0xff]  ;;  %v82_v35 = vld [vmem:[%s5853_s0 + $0x130] sm:$0xff]  ;;  %v4458_v36 = vpack.c.bf16 %v65_v28, %v58_v27  ;;  %v4460_v37 = vpack.c.bf16 %v67_v30, %v60_v29 }
  0x3a   :  { %v3781_v38 = vld [vmem:[%s5854_s1 + $0x4a0] ss:$16 sps:$4 sm:$0xff]   ;;  %v4465_v39 = vpack.c.bf16 %v80_v33, %v73_v32  ;;  %v3786_v40 = vld [vmem:[%s5854_s1 + $0x484] ss:$16 sps:$4 sm:$0xff]   ;;  %v4470_v41 = vpack.c.bf16 %v82_v35, %v75_v34 }
  0x3b   :  { %1456 = vmatpush2.bf16.msra.mxu0 %v3740_v44  ;;  %v3784_v42 = vld [vmem:[%s5854_s1 + $0x480] ss:$16 sps:$4 sm:$0xff]   ;;  %v79_v44 = vld [vmem:[%s5853_s0 + $0x118] sm:$0xff]  ;;  %v3798_v11 = vld [vmem:[%s5854_s1 + $0x404] ss:$16 sps:$4 sm:$0xff]  }
  0x3c   :  { %1569 = vmatpush2.bf16.msra.mxu1 %v3741_v45  ;;  %1457 = vmatprep.subr.bf16.mxu0 %v3742_v46  ;;  %v72_v43 = vld [vmem:[%s5853_s0 + $0xe0] sm:$0xff]  ;;  %v74_v45 = vld [vmem:[%s5853_s0 + $0xf0] sm:$0xff]  ;;  %v81_v46 = vld [vmem:[%s5853_s0 + $0x128] sm:$0xff] }
  0x3d   :  { %1570 = vmatprep.subr.bf16.mxu1 %v3744_v47  ;;  %v3789_v47 = vld [vmem:[%s5854_s1 + $0x464] ss:$16 sps:$4 sm:$0xff]   ;;  %v3793_v9 = vld [vmem:[%s5854_s1 + $0x420] ss:$16 sps:$4 sm:$0xff]  }
  0x3e   :  { %v94_v49 = vld [vmem:[%s5853_s0 + $0x190] sm:$0xff]  ;;  %v96_v51 = vld [vmem:[%s5853_s0 + $0x1a0] sm:$0xff] }
  0x3f   :  { %1458 = vmatpush2.bf16.msra.mxu0 %v3746_v52  ;;  %v4506_v52 = vpack.c.bf16 %v79_v44, %v72_v43  ;;  %v102_v16 = vld [vmem:[%s5853_s0 + $0x1d0] sm:$0xff]  ;;  %v124_v27 = vld [vmem:[%s5853_s0 + $0x280] sm:$0xff]  ;;  %v129_v44 = vld [vmem:[%s5853_s0 + $0x2a8] sm:$0xff] }
  0x40   :  { %1571 = vmatpush2.bf16.msra.mxu1 %v3747_v53  ;;  %1459 = vmatprep.subr.bf16.mxu0 %v3748_v54  ;;  %v4508_v53 = vpack.c.bf16 %v81_v46, %v74_v45  ;;  %v3787_v54 = vld [vmem:[%s5854_s1 + $0x460] ss:$16 sps:$4 sm:$0xff]   ;;  %v3801_v21 = vld [vmem:[%s5854_s1 + $0x5e4] ss:$16 sps:$4 sm:$0xff]   ;;  %v4607_v29 = vpack.c.bf16 %v109_v20, %v102_v16  ;;  %v131_v46 = vld [vmem:[%s5853_s0 + $0x2b8] sm:$0xff] }
  0x41   :  { %1572 = vmatprep.subr.bf16.mxu1 %v3750_v57  ;;  %v4513_v57 = vpack.c.bf16 %v94_v49, %v87_v48  ;;  %v3799_v30 = vld [vmem:[%s5854_s1 + $0x5e0] ss:$16 sps:$4 sm:$0xff]   ;;  %v3804_v32 = vld [vmem:[%s5854_s1 + $0x5c4] ss:$16 sps:$4 sm:$0xff]  }
  0x42   :  { %v3802_v34 = vld [vmem:[%s5854_s1 + $0x5c0] ss:$16 sps:$4 sm:$0xff]   ;;  %v3807_v43 = vld [vmem:[%s5854_s1 + $0x5a4] ss:$16 sps:$4 sm:$0xff]  }
  0x43   :  { %1460 = vmatpush2.bf16.msra.mxu0 %v3752_v58  ;;  %v3792_v58 = vld [vmem:[%s5854_s1 + $0x444] ss:$16 sps:$4 sm:$0xff]  }
  0x44   :  { %1573 = vmatpush2.bf16.msra.mxu1 %v3753_v59  ;;  %1461 = vmatprep.subr.bf16.mxu0 %v3754_v60  ;;  %v4518_v59 = vpack.c.bf16 %v96_v51, %v89_v50  ;;  %v3790_v60 = vld [vmem:[%s5854_s1 + $0x440] ss:$16 sps:$4 sm:$0xff]  }
  0x45   :  { %1574 = vmatprep.subr.bf16.mxu1 %v3756_v61  ;;  %v86_v61 = vld [vmem:[%s5853_s0 + $0x150] sm:$0xff]  ;;  %v136_v45 = vld [vmem:[%s5853_s0 + $0x2e0] sm:$0xff] }
  0x46   :  { %v114_v35 = vld [vmem:[%s5853_s0 + $0x230] sm:$0xff]  ;;  %v4660_v51 = vpack.c.bf16 %v136_v45, %v129_v44  ;;  %v55_v44 = vld [vmem:[%s5853_s0 + $0x58] sm:$0xff] }
  0x47   :  { %1462 = vmatpush2.bf16.msra.mxu0 %v3758_v62  ;;  %v93_v62 = vld [vmem:[%s5853_s0 + $0x188] sm:$0xff]  ;;  %v3805_v50 = vld [vmem:[%s5854_s1 + $0x5a0] ss:$16 sps:$4 sm:$0xff]  }
  0x48   :  { %1575 = vmatpush2.bf16.msra.mxu1 %v3759_v63  ;;  %1463 = vmatprep.subr.bf16.mxu0 %v3760_v0  ;;  %v88_v63 = vld [vmem:[%s5853_s0 + $0x160] sm:$0xff]  ;;  %v95_v0 = vld [vmem:[%s5853_s0 + $0x198] sm:$0xff]  ;;  %v142_v20 = vld [vmem:[%s5853_s0 + $0x310] sm:$0xff] }
  0x49   :  { %1576 = vmatprep.subr.bf16.mxu1 %v3762_v1  ;;  %v3795_v1 = vld [vmem:[%s5854_s1 + $0x424] ss:$16 sps:$4 sm:$0xff]  }
  0x4a   :  { %v50_v45 = vld [vmem:[%s5853_s0 + $0x30] sm:$0xff] }
  0x4b   :  { %1464 = vmatpush2.bf16.msra.mxu0 %v3764_v2  ;;  %v101_v2 = vld [vmem:[%s5853_s0 + $0x1c8] sm:$0xff] }
  0x4c   :  { %1577 = vmatpush2.bf16.msra.mxu1 %v3765_v4  ;;  %1465 = vmatprep.subr.bf16.mxu0 %v3766_v5  ;;  %v108_v4 = vld [vmem:[%s5853_s0 + $0x200] sm:$0xff]  ;;  %v103_v5 = vld [vmem:[%s5853_s0 + $0x1d8] sm:$0xff] }
  0x4d   :  { %1578 = vmatprep.subr.bf16.mxu1 %v3768_v6  ;;  %v110_v6 = vld [vmem:[%s5853_s0 + $0x210] sm:$0xff]  ;;  %v4561_v10 = vpack.c.bf16 %v108_v4, %v101_v2  ;;  %v143_v2 = vld [vmem:[%s5853_s0 + $0x318] sm:$0xff] }
  0x4e   :  { %v4566_v12 = vpack.c.bf16 %v110_v6, %v103_v5  ;;  %v150_v4 = vld [vmem:[%s5853_s0 + $0x350] sm:$0xff]  ;;  %v145_v5 = vld [vmem:[%s5853_s0 + $0x328] sm:$0xff]  ;;  %v152_v6 = vld [vmem:[%s5853_s0 + $0x360] sm:$0xff] }
  0x4f   :  { %1466 = vmatpush2.bf16.msra.mxu0 %v3770_v7  ;;  %v4554_v7 = vpack.c.bf16 %v93_v62, %v86_v61  ;;  %v128_v61 = vld [vmem:[%s5853_s0 + $0x2a0] sm:$0xff]  ;;  %v135_v62 = vld [vmem:[%s5853_s0 + $0x2d8] sm:$0xff]  ;;  %v4713_v16 = vpack.c.bf16 %v152_v6, %v145_v5  ;;  %v62_v6 = vld [vmem:[%s5853_s0 + $0x90] sm:$0xff] }
  0x50   :  { %1579 = vmatpush2.bf16.msra.mxu1 %v3771_v8  ;;  %1661 = vmatprep.subr.bf16.mxu0 %v3774_v13  ;;  %v4556_v8 = vpack.c.bf16 %v95_v0, %v88_v63  ;;  %v3796_v13 = vld [vmem:[%s5854_s1 + $0x400] ss:$16 sps:$4 sm:$0xff]   ;;  %v137_v0 = vld [vmem:[%s5853_s0 + $0x2e8] sm:$0xff] }
  0x51   :  { %1788 = vmatprep.subr.bf16.mxu1 %v3777_v14  ;;  %v100_v14 = vld [vmem:[%s5853_s0 + $0x1c0] sm:$0xff]  ;;  %v130_v63 = vld [vmem:[%s5853_s0 + $0x2b0] sm:$0xff]  ;;  %v3832_v5 = vld [vmem:[%s5854_s1 + $0x2c8] ss:$16 sps:$4 sm:$0xff]  }
  0x52   :  { %1468 = vmatmul.mubr.bf16.vlgmr.msra.gmra.mxu0 %v4404_v18 }
  0x53   :  { %1581 = vmatmul.mubr.bf16.vlgmr.msra.gmra.mxu1 %v4406_v19  ;;  %1662 = vmatpush1.bf16.msra.mxu0 %v3772_v15  ;;  %v107_v15 = vld [vmem:[%s5853_s0 + $0x1f8] sm:$0xff] }
  0x54   :  { %1789 = vmatpush1.bf16.msra.mxu1 %v3775_v22  ;;  %1663 = vmatprep.subr.bf16.mxu0 %v3780_v23  ;;  %v115_v22 = vld [vmem:[%s5853_s0 + $0x238] sm:$0xff]  ;;  %v122_v23 = vld [vmem:[%s5853_s0 + $0x270] sm:$0xff]  ;;  %v4605_v28 = vpack.c.bf16 %v107_v15, %v100_v14  ;;  %v4708_v14 = vpack.c.bf16 %v150_v4, %v143_v2 }
  0x55   :  { %1477 = vmatprep.mubr.bf16.mxu0 %v4420_v24  ;;  %1590 = vmatprep.mubr.bf16.mxu1 %v4425_v26  ;;  %v3816_v15 = vld [vmem:[%s5854_s1 + $0x544] ss:$16 sps:$4 sm:$0xff]   ;;  %v3829_v2 = vld [vmem:[%s5854_s1 + $0xc8] ss:$16 sps:$4 sm:$0xff]  }
  0x56   :  { %2000 = vmatprep.subr.bf16.mxu1 %v3828_v17  ;;  %v3814_v17 = vld [vmem:[%s5854_s1 + $0x540] ss:$16 sps:$4 sm:$0xff]  }
  0x57   :  { %1664 = vmatpush1.bf16.msra.mxu0 %v3778_v25  ;;  %v117_v25 = vld [vmem:[%s5853_s0 + $0x248] sm:$0xff] }
  0x58   :  { %1665 = vmatprep.subr.bf16.mxu0 %v3783_v31  ;;  %v4612_v31 = vpack.c.bf16 %v122_v23, %v115_v22  ;;  %v4617_v33 = vpack.c.bf16 %v124_v27, %v117_v25  ;;  %v144_v22 = vld [vmem:[%s5853_s0 + $0x320] sm:$0xff]  ;;  %v151_v23 = vld [vmem:[%s5853_s0 + $0x358] sm:$0xff]  ;;  %v49_v27 = vld [vmem:[%s5853_s0 + $0x28] sm:$0xff] }
  0x59   :  { %v3819_v25 = vld [vmem:[%s5854_s1 + $0x524] ss:$16 sps:$4 sm:$0xff]  }
  0x5a   :  { %1478 = vmatmul.mubr.bf16.gmra.mxu0 %v4458_v36 }
  0x5b   :  { %1591 = vmatmul.mubr.bf16.gmra.mxu1 %v4460_v37  ;;  %1666 = vmatpush1.bf16.msra.mxu0 %v3781_v38  ;;  %v121_v38 = vld [vmem:[%s5853_s0 + $0x268] sm:$0xff] }
  0x5c   :  { %1487 = vmatprep.mubr.bf16.mxu0 %v4465_v39  ;;  %1667 = vmatprep.subr.bf16.mxu0 %v3786_v40  ;;  %v116_v40 = vld [vmem:[%s5853_s0 + $0x240] sm:$0xff]  ;;  %v4653_v48 = vpack.c.bf16 %v121_v38, %v114_v35 }
  0x5d   :  { %1600 = vmatprep.mubr.bf16.mxu1 %v4470_v41  ;;  %v3817_v35 = vld [vmem:[%s5854_s1 + $0x520] ss:$16 sps:$4 sm:$0xff]  }
  0x5f   :  { %1668 = vmatpush1.bf16.msra.mxu0 %v3784_v42  ;;  %v123_v42 = vld [vmem:[%s5853_s0 + $0x278] sm:$0xff] }
  0x60   :  { %1669 = vmatprep.subr.bf16.mxu0 %v3789_v47  ;;  %v138_v47 = vld [vmem:[%s5853_s0 + $0x2f0] sm:$0xff]  ;;  %v4655_v49 = vpack.c.bf16 %v123_v42, %v116_v40 }
  0x61   :  { %v3822_v40 = vld [vmem:[%s5854_s1 + $0x504] ss:$16 sps:$4 sm:$0xff]   ;;  %v3820_v42 = vld [vmem:[%s5854_s1 + $0x500] ss:$16 sps:$4 sm:$0xff]  }
  0x62   :  { %1488 = vmatmul.mubr.bf16.gmra.mxu0 %v4506_v52 }
  0x63   :  { %1601 = vmatmul.mubr.bf16.gmra.mxu1 %v4508_v53  ;;  %1670 = vmatpush1.bf16.msra.mxu0 %v3787_v54  ;;  %v3810_v54 = vld [vmem:[%s5854_s1 + $0x584] ss:$16 sps:$4 sm:$0xff]  }
  0x64   :  { %1497 = vmatprep.mubr.bf16.mxu0 %v4513_v57  ;;  %1671 = vmatprep.subr.bf16.mxu0 %v3792_v58  ;;  %v4665_v58 = vpack.c.bf16 %v138_v47, %v131_v46  ;;  %v57_v46 = vld [vmem:[%s5853_s0 + $0x68] sm:$0xff] }
  0x65   :  { %1610 = vmatprep.mubr.bf16.mxu1 %v4518_v59  ;;  %v3825_v47 = vld [vmem:[%s5854_s1 + $0xec] ss:$16 sps:$4 sm:$0xff]  }
  0x67   :  { %1672 = vmatpush1.bf16.msra.mxu0 %v3790_v60  ;;  %v3808_v60 = vld [vmem:[%s5854_s1 + $0x580] ss:$16 sps:$4 sm:$0xff]  }
  0x68   :  { %1673 = vmatprep.subr.bf16.mxu0 %v3795_v1  ;;  %v3813_v1 = vld [vmem:[%s5854_s1 + $0x564] ss:$16 sps:$4 sm:$0xff]  }
  0x6a   :  { %1498 = vmatmul.mubr.bf16.gmra.mxu0 %v4554_v7 }
  0x6b   :  { %1611 = vmatmul.mubr.bf16.gmra.mxu1 %v4556_v8  ;;  %1674 = vmatpush1.bf16.msra.mxu0 %v3793_v9  ;;  %v4701_v9 = vpack.c.bf16 %v135_v62, %v128_v61  ;;  %v4785_v61 = vpack.c.bf16 %v57_v46, %v50_v45  ;;  %v63_v62 = vld [vmem:[%s5853_s0 + $0x98] sm:$0xff]  ;;  %v76_v46 = vld [vmem:[%s5853_s0 + $0x100] sm:$0xff] }
  0x6c   :  { %1507 = vmatprep.mubr.bf16.mxu0 %v4561_v10  ;;  %1675 = vmatprep.subr.bf16.mxu0 %v3798_v11  ;;  %v4703_v11 = vpack.c.bf16 %v137_v0, %v130_v63  ;;  %v70_v63 = vld [vmem:[%s5853_s0 + $0xd0] sm:$0xff]  ;;  %v3831_v0 = vld [vmem:[%s5854_s1 + $0xcc] ss:$16 sps:$4 sm:$0xff]  }
  0x6d   :  { %1620 = vmatprep.mubr.bf16.mxu1 %v4566_v12  ;;  %v4802_v4 = vpack.c.bf16 %v70_v63, %v63_v62  ;;  %v3849_v62 = vld [vmem:[%s5854_s1 + $0x6c] ss:$16 sps:$4 sm:$0xff]  }
  0x6e   :  { %v3852_v63 = vld [vmem:[%s5854_s1 + $0x26c] ss:$16 sps:$4 sm:$0xff]  }
  0x6f   :  { %1676 = vmatpush1.bf16.msra.mxu0 %v3796_v13  ;;  %v3811_v13 = vld [vmem:[%s5854_s1 + $0x560] ss:$16 sps:$4 sm:$0xff]  }
  0x70   :  { %1677 = vmatprep.subr.bf16.mxu0 %v3801_v21  ;;  %v149_v21 = vld [vmem:[%s5853_s0 + $0x348] sm:$0xff] }
  0x72   :  { %1508 = vmatmul.mubr.bf16.gmra.mxu0 %v4605_v28 }
  0x73   :  { %1621 = vmatmul.mubr.bf16.gmra.mxu1 %v4607_v29  ;;  %1678 = vmatpush2.bf16.msra.mxu0 %v3799_v30  ;;  %v56_v30 = vld [vmem:[%s5853_s0 + $0x60] sm:$0xff] }
  0x74   :  { %1517 = vmatprep.mubr.bf16.mxu0 %v4612_v31  ;;  %1679 = vmatprep.subr.bf16.mxu0 %v3804_v32  ;;  %v4743_v32 = vpack.c.bf16 %v149_v21, %v142_v20  ;;  %v4750_v38 = vpack.c.bf16 %v56_v30, %v49_v27  ;;  %v3837_v20 = vld [vmem:[%s5854_s1 + $0xac] ss:$16 sps:$4 sm:$0xff]   ;;  %v84_v27 = vld [vmem:[%s5853_s0 + $0x140] sm:$0xff]  ;;  %v3835_v30 = vld [vmem:[%s5854_s1 + $0xa8] ss:$16 sps:$4 sm:$0xff]  }
  0x75   :  { %1630 = vmatprep.mubr.bf16.mxu1 %v4617_v33  ;;  %v3840_v21 = vld [vmem:[%s5854_s1 + $0x2ac] ss:$16 sps:$4 sm:$0xff]  }
  0x77   :  { %1680 = vmatpush2.bf16.msra.mxu0 %v3802_v34  ;;  %v4745_v34 = vpack.c.bf16 %v151_v23, %v144_v22  ;;  %v77_v22 = vld [vmem:[%s5853_s0 + $0x108] sm:$0xff] }
  0x78   :  { %1681 = vmatprep.subr.bf16.mxu0 %v3807_v43  ;;  %v48_v43 = vld [vmem:[%s5853_s0 + $0x20] sm:$0xff]  ;;  %v4858_v45 = vpack.c.bf16 %v84_v27, %v77_v22  ;;  %v90_v27 = vld [vmem:[%s5853_s0 + $0x170] sm:$0xff] }
  0x7a   :  { %1518 = vmatmul.mubr.bf16.gmra.mxu0 %v4653_v48 }
  0x7b   :  { %1631 = vmatmul.mubr.bf16.gmra.mxu1 %v4655_v49  ;;  %1682 = vmatpush2.bf16.msra.mxu0 %v3805_v50  ;;  %v3823_v50 = vld [vmem:[%s5854_s1 + $0xe8] ss:$16 sps:$4 sm:$0xff]  }
  0x7c   :  { %1527 = vmatprep.mubr.bf16.mxu0 %v4660_v51  ;;  %1683 = vmatprep.subr.bf16.mxu0 %v3810_v54  ;;  %v3826_v54 = vld [vmem:[%s5854_s1 + $0x2e8] ss:$16 sps:$4 sm:$0xff]  }
  0x7d   :  { %1640 = vmatprep.mubr.bf16.mxu1 %v4665_v58 }
  0x7f   :  { %1684 = vmatpush2.bf16.msra.mxu0 %v3808_v60  ;;  %v4783_v60 = vpack.c.bf16 %v55_v44, %v48_v43  ;;  %v3841_v43 = vld [vmem:[%s5854_s1 + $0x88] ss:$16 sps:$4 sm:$0xff]  }
  0x80   :  { %1685 = vmatprep.subr.bf16.mxu0 %v3813_v1  ;;  %v3834_v1 = vld [vmem:[%s5854_s1 + $0x2cc] ss:$16 sps:$4 sm:$0xff]   ;;  %v3844_v44 = vld [vmem:[%s5854_s1 + $0x288] ss:$16 sps:$4 sm:$0xff]  }
  0x82   :  { %1528 = vmatmul.mubr.bf16.gmra.mxu0 %v4701_v9 }
  0x83   :  { %1641 = vmatmul.mubr.bf16.gmra.mxu1 %v4703_v11  ;;  %1686 = vmatpush2.bf16.msra.mxu0 %v3811_v13  ;;  %v69_v13 = vld [vmem:[%s5853_s0 + $0xc8] sm:$0xff] }
  0x84   :  { %1537 = vmatprep.mubr.bf16.mxu0 %v4708_v14  ;;  %1687 = vmatprep.subr.bf16.mxu0 %v3816_v15  ;;  %v64_v15 = vld [vmem:[%s5853_s0 + $0xa0] sm:$0xff]  ;;  %v4833_v23 = vpack.c.bf16 %v69_v13, %v62_v6  ;;  %v91_v6 = vld [vmem:[%s5853_s0 + $0x178] sm:$0xff]  ;;  %v98_v13 = vld [vmem:[%s5853_s0 + $0x1b0] sm:$0xff] }
  0x85   :  { %1650 = vmatprep.mubr.bf16.mxu1 %v4713_v16  ;;  %v4911_v22 = vpack.c.bf16 %v98_v13, %v91_v6  ;;  %v3868_v6 = vld [vmem:[%s5854_s1 + $0x208] ss:$16 sps:$4 sm:$0xff]  }
  0x87   :  { %1688 = vmatpush2.bf16.msra.mxu0 %v3814_v17  ;;  %v71_v17 = vld [vmem:[%s5853_s0 + $0xd8] sm:$0xff] }
  0x88   :  { %1689 = vmatprep.subr.bf16.mxu0 %v3819_v25  ;;  %v4835_v25 = vpack.c.bf16 %v71_v17, %v64_v15  ;;  %v3855_v15 = vld [vmem:[%s5854_s1 + $0x4c] ss:$16 sps:$4 sm:$0xff]  }
  0x89   :  { %v3858_v17 = vld [vmem:[%s5854_s1 + $0x24c] ss:$16 sps:$4 sm:$0xff]  }
  0x8a   :  { %1538 = vmatmul.mubr.bf16.gmra.mxu0 %v4743_v32 }
  0x8b   :  { %1651 = vmatmul.mubr.bf16.gmra.mxu1 %v4745_v34  ;;  %1690 = vmatpush2.bf16.msra.mxu0 %v3817_v35  ;;  %v3838_v35 = vld [vmem:[%s5854_s1 + $0x2a8] ss:$16 sps:$4 sm:$0xff]  }
  0x8c   :  { %1693 = vmatprep.mubr.bf16.mxu0 %v4750_v38  ;;  %1691 = vmatprep.subr.bf16.mxu0 %v3822_v40  ;;  %v3843_v40 = vld [vmem:[%s5854_s1 + $0x8c] ss:$16 sps:$4 sm:$0xff]  }
  0x8d   :  { %1806 = vmatprep.mubr.bf16.mxu1 %v5862_v3 }
  0x8f   :  { %1692 = vmatpush2.bf16.msra.mxu0 %v3820_v42  ;;  %v3846_v42 = vld [vmem:[%s5854_s1 + $0x28c] ss:$16 sps:$4 sm:$0xff]  }
  0x90   :  { %1887 = vmatprep.subr.bf16.mxu0 %v3825_v47  ;;  %v83_v47 = vld [vmem:[%s5853_s0 + $0x138] sm:$0xff] }
  0x92   :  { %1694 = vmatmul.mubr.bf16.vlgmr.msra.gmra.mxu0 %v4783_v60 }
  0x93   :  { %3590 = vmatmul.mubr.msk.bf16.vlgmr.msra.gmra.mxu1 %vm1410_vm0, %v4785_v61  ;;  %1888 = vmatpush1.bf16.msra.mxu0 %v3823_v50  ;;  %v78_v50 = vld [vmem:[%s5853_s0 + $0x110] sm:$0xff] }
  0x94   :  { %2001 = vmatpush1.bf16.msra.mxu1 %v3826_v54  ;;  %1889 = vmatprep.subr.bf16.mxu0 %v3831_v0  ;;  %v85_v54 = vld [vmem:[%s5853_s0 + $0x148] sm:$0xff] }
  0x95   :  { %2002 = vmatprep.subr.bf16.mxu1 %v3834_v1  ;;  %1703 = vmatprep.mubr.bf16.mxu0 %v4802_v4  ;;  %v3847_v0 = vld [vmem:[%s5854_s1 + $0x68] ss:$16 sps:$4 sm:$0xff]  }
  0x96   :  { %1816 = vmatprep.mubr.bf16.mxu1 %v5862_v3  ;;  %v3850_v1 = vld [vmem:[%s5854_s1 + $0x268] ss:$16 sps:$4 sm:$0xff]  }
  0x97   :  { %1890 = vmatpush1.bf16.msra.mxu0 %v3829_v2  ;;  %v4889_v2 = vpack.c.bf16 %v83_v47, %v76_v46  ;;  %v3862_v46 = vld [vmem:[%s5854_s1 + $0x228] ss:$16 sps:$4 sm:$0xff]  }
  0x98   :  { %2003 = vmatpush1.bf16.msra.mxu1 %v3832_v5  ;;  %1891 = vmatprep.subr.bf16.mxu0 %v3837_v20  ;;  %v4891_v5 = vpack.c.bf16 %v85_v54, %v78_v50  ;;  %v3853_v20 = vld [vmem:[%s5854_s1 + $0x48] ss:$16 sps:$4 sm:$0xff]  }
  0x99   :  { %2004 = vmatprep.subr.bf16.mxu1 %v3840_v21  ;;  %v3856_v21 = vld [vmem:[%s5854_s1 + $0x248] ss:$16 sps:$4 sm:$0xff]  }
  0x9a   :  { %1704 = vmatmul.mubr.bf16.gmra.mxu0 %v4833_v23  ;;  %v105_v54 = vld [vmem:[%s5853_s0 + $0x1e8] sm:$0xff] }
  0x9b   :  { %3591 = vmatmul.mubr.msk.bf16.gmra.mxu1 %vm1410_vm0, %v4835_v25  ;;  %1892 = vmatpush1.bf16.msra.mxu0 %v3835_v30  ;;  %v97_v30 = vld [vmem:[%s5853_s0 + $0x1a8] sm:$0xff] }
  0x9c   :  { %2005 = vmatpush1.bf16.msra.mxu1 %v3838_v35  ;;  %1893 = vmatprep.subr.bf16.mxu0 %v3843_v40  ;;  %v92_v35 = vld [vmem:[%s5853_s0 + $0x180] sm:$0xff]  ;;  %v99_v40 = vld [vmem:[%s5853_s0 + $0x1b8] sm:$0xff]  ;;  %v4942_v47 = vpack.c.bf16 %v97_v30, %v90_v27 }
  0x9d   :  { %2006 = vmatprep.subr.bf16.mxu1 %v3846_v42  ;;  %1713 = vmatprep.mubr.bf16.mxu0 %v4858_v45  ;;  %v3861_v42 = vld [vmem:[%s5854_s1 + $0x2c] ss:$16 sps:$4 sm:$0xff]   ;;  %v4944_v50 = vpack.c.bf16 %v99_v40, %v92_v35  ;;  %v3871_v35 = vld [vmem:[%s5854_s1 + $0x1e8] ss:$16 sps:$4 sm:$0xff]  }
  0x9e   :  { %1826 = vmatprep.mubr.bf16.mxu1 %v5862_v3  ;;  %v3873_v27 = vld [vmem:[%s5854_s1 + $0x1ec] ss:$16 sps:$4 sm:$0xff]   ;;  %v3874_v40 = vld [vmem:[%s5854_s1 + $0x3e8] ss:$16 sps:$4 sm:$0xff]  }
  0x9f   :  { %1894 = vmatpush1.bf16.msra.mxu0 %v3841_v43  ;;  %v3864_v43 = vld [vmem:[%s5854_s1 + $0x22c] ss:$16 sps:$4 sm:$0xff]  }
  0xa0   :  { %2007 = vmatpush1.bf16.msra.mxu1 %v3844_v44  ;;  %1895 = vmatprep.subr.bf16.mxu0 %v3849_v62  ;;  %v3859_v44 = vld [vmem:[%s5854_s1 + $0x28] ss:$16 sps:$4 sm:$0xff]   ;;  %v112_v62 = vld [vmem:[%s5853_s0 + $0x220] sm:$0xff]  ;;  %v3876_v30 = vld [vmem:[%s5854_s1 + $0x3ec] ss:$16 sps:$4 sm:$0xff]  }
  0xa1   :  { %2008 = vmatprep.subr.bf16.mxu1 %v3852_v63  ;;  %v3867_v63 = vld [vmem:[%s5854_s1 + $0xc] ss:$16 sps:$4 sm:$0xff]   ;;  %v4964_v13 = vpack.c.bf16 %v112_v62, %v105_v54 }
  0xa2   :  { %1714 = vmatmul.mubr.bf16.gmra.mxu0 %v4889_v2  ;;  %v3879_v54 = vld [vmem:[%s5854_s1 + $0x1cc] ss:$16 sps:$4 sm:$0xff]  }
  0xa3   :  { %3592 = vmatmul.mubr.msk.bf16.gmra.mxu1 %vm1410_vm0, %v4891_v5  ;;  %1896 = vmatpush1.bf16.msra.mxu0 %v3847_v0  ;;  %v3870_v0 = vld [vmem:[%s5854_s1 + $0x20c] ss:$16 sps:$4 sm:$0xff]  }
  0xa4   :  { %2009 = vmatpush1.bf16.msra.mxu1 %v3850_v1  ;;  %1897 = vmatprep.subr.bf16.mxu0 %v3855_v15  ;;  %v3865_v1 = vld [vmem:[%s5854_s1 + $0x8] ss:$16 sps:$4 sm:$0xff]   ;;  %v104_v15 = vld [vmem:[%s5853_s0 + $0x1e0] sm:$0xff]  ;;  %v3882_v62 = vld [vmem:[%s5854_s1 + $0x3cc] ss:$16 sps:$4 sm:$0xff]  }
  0xa5   :  { %2010 = vmatprep.subr.bf16.mxu1 %v3858_v17  ;;  %1723 = vmatprep.mubr.bf16.mxu0 %v4911_v22  ;;  %v111_v17 = vld [vmem:[%s5853_s0 + $0x218] sm:$0xff] }
  0xa6   :  { %1836 = vmatprep.mubr.bf16.mxu1 %v5862_v3 }
  0xa7   :  { %1898 = vmatpush1.bf16.msra.mxu0 %v3853_v20  ;;  %v106_v20 = vld [vmem:[%s5853_s0 + $0x1f0] sm:$0xff] }
  0xa8   :  { %2011 = vmatpush1.bf16.msra.mxu1 %v3856_v21  ;;  %1899 = vmatprep.subr.bf16.mxu0 %v3861_v42  ;;  %v113_v21 = vld [vmem:[%s5853_s0 + $0x228] sm:$0xff]  ;;  %v4995_v42 = vpack.c.bf16 %v111_v17, %v104_v15  ;;  %v120_v17 = vld [vmem:[%s5853_s0 + $0x260] sm:$0xff] }
  0xa9   :  { %2012 = vmatprep.subr.bf16.mxu1 %v3864_v43  ;;  %v4997_v43 = vpack.c.bf16 %v113_v21, %v106_v20  ;;  %v125_v15 = vld [vmem:[%s5853_s0 + $0x288] sm:$0xff]  ;;  %v127_v20 = vld [vmem:[%s5853_s0 + $0x298] sm:$0xff] }
  0xaa   :  { %1724 = vmatmul.mubr.bf16.gmra.mxu0 %v4942_v47  ;;  %v3885_v21 = vld [vmem:[%s5854_s1 + $0x1ac] ss:$16 sps:$4 sm:$0xff]  }
  0xab   :  { %3593 = vmatmul.mubr.msk.bf16.gmra.mxu1 %vm1410_vm0, %v4944_v50  ;;  %1900 = vmatpush1.bf16.msra.mxu0 %v3859_v44  ;;  %v119_v44 = vld [vmem:[%s5853_s0 + $0x258] sm:$0xff] }
  0xac   :  { %2013 = vmatpush1.bf16.msra.mxu1 %v3862_v46  ;;  %1901 = vmatprep.subr.bf16.mxu0 %v3867_v63  ;;  %v126_v46 = vld [vmem:[%s5853_s0 + $0x290] sm:$0xff]  ;;  %v3877_v63 = vld [vmem:[%s5854_s1 + $0x1c8] ss:$16 sps:$4 sm:$0xff]  }
  0xad   :  { %2014 = vmatprep.subr.bf16.mxu1 %v3870_v0  ;;  %1733 = vmatprep.mubr.bf16.mxu0 %v4964_v13  ;;  %v3880_v0 = vld [vmem:[%s5854_s1 + $0x3c8] ss:$16 sps:$4 sm:$0xff]  }
  0xae   :  { %1846 = vmatprep.mubr.bf16.mxu1 %v5862_v3 }
  0xaf   :  { %1902 = vmatpush1.bf16.msra.mxu0 %v3865_v1  ;;  %v5017_v1 = vpack.c.bf16 %v126_v46, %v119_v44  ;;  %v133_v44 = vld [vmem:[%s5853_s0 + $0x2c8] sm:$0xff]  ;;  %v140_v46 = vld [vmem:[%s5853_s0 + $0x300] sm:$0xff] }
  0xb0   :  { %2015 = vmatpush1.bf16.msra.mxu1 %v3868_v6  ;;  %1903 = vmatprep.subr.bf16.mxu0 %v3873_v27  ;;  %v118_v6 = vld [vmem:[%s5853_s0 + $0x250] sm:$0xff]  ;;  %v3888_v27 = vld [vmem:[%s5854_s1 + $0x3ac] ss:$16 sps:$4 sm:$0xff]  }
  0xb1   :  { %2016 = vmatprep.subr.bf16.mxu1 %v3876_v30  ;;  %v3883_v30 = vld [vmem:[%s5854_s1 + $0x1a8] ss:$16 sps:$4 sm:$0xff]  }
  0xb2   :  { %1734 = vmatmul.mubr.bf16.gmra.mxu0 %v4995_v42 }
  0xb3   :  { %3594 = vmatmul.mubr.msk.bf16.gmra.mxu1 %vm1410_vm0, %v4997_v43  ;;  %1904 = vmatpush2.bf16.msra.mxu0 %v3871_v35  ;;  %v5045_v35 = vpack.c.bf16 %v125_v15, %v118_v6  ;;  %v3894_v6 = vld [vmem:[%s5854_s1 + $0x38c] ss:$16 sps:$4 sm:$0xff]   ;;  %v3889_v15 = vld [vmem:[%s5854_s1 + $0x188] ss:$16 sps:$4 sm:$0xff]  }
  0xb4   :  { %2017 = vmatpush2.bf16.msra.mxu1 %v3874_v40  ;;  %1905 = vmatprep.subr.bf16.mxu0 %v3879_v54  ;;  %v5047_v40 = vpack.c.bf16 %v127_v20, %v120_v17  ;;  %v3886_v54 = vld [vmem:[%s5854_s1 + $0x3a8] ss:$16 sps:$4 sm:$0xff]   ;;  %v132_v17 = vld [vmem:[%s5853_s0 + $0x2c0] sm:$0xff] }
  0xb5   :  { %2018 = vmatprep.subr.bf16.mxu1 %v3882_v62  ;;  %1743 = vmatprep.mubr.bf16.mxu0 %v5017_v1  ;;  %5872 = vst [vmem:[#allocation9_spill] sm:$0xff] %v5045_v35  ;;  %v3891_v62 = vld [vmem:[%s5854_s1 + $0x18c] ss:$16 sps:$4 sm:$0xff]  }
  0xb6   :  { %1856 = vmatprep.mubr.bf16.mxu1 %v5862_v3  ;;  %5873 = vst [vmem:[#allocation10_spill] sm:$0xff] %v5047_v40  ;;  %v139_v20 = vld [vmem:[%s5853_s0 + $0x2f8] sm:$0xff] }
  0xb7   :  { %1906 = vmatpush2.bf16.msra.mxu0 %v3877_v63  ;;  %v3892_v63 = vld [vmem:[%s5854_s1 + $0x388] ss:$16 sps:$4 sm:$0xff]  }
  0xb8   :  { %2019 = vmatpush2.bf16.msra.mxu1 %v3880_v0  ;;  %1907 = vmatprep.subr.bf16.mxu0 %v3885_v21  ;;  %v5070_v0 = vpack.c.bf16 %v140_v46, %v133_v44  ;;  %v134_v21 = vld [vmem:[%s5853_s0 + $0x2d0] sm:$0xff]  ;;  %v3897_v44 = vld [vmem:[%s5854_s1 + $0x16c] ss:$16 sps:$4 sm:$0xff]  }
  0xb9   :  { %2020 = vmatprep.subr.bf16.mxu1 %v3888_v27  ;;  %v141_v27 = vld [vmem:[%s5853_s0 + $0x308] sm:$0xff] }
  0xba   :  { %5874 = vst [vmem:[#allocation11_spill] sm:$0xff] %v5070_v0  ;;  %1744 = vmatmul.mubr.bf16.gmra.mxu0 %v5045_v35  ;;  %v3900_v46 = vld [vmem:[%s5854_s1 + $0x36c] ss:$16 sps:$4 sm:$0xff]   ;;  %v5878_v35 = vmov 0  }
  0xbb   :  { %3595 = vmatmul.mubr.msk.bf16.gmra.mxu1 %vm1410_vm0, %v5047_v40  ;;  %1908 = vmatpush2.bf16.msra.mxu0 %v3883_v30  ;;  %v3895_v30 = vld [vmem:[%s5854_s1 + $0x168] ss:$16 sps:$4 sm:$0xff]   ;;  %v154_v40 = vld [vmem:[%s5853_s0 + $0x370] sm:$0xff] }
  0xbc   :  { %2021 = vmatpush2.bf16.msra.mxu1 %v3886_v54  ;;  %1909 = vmatprep.subr.bf16.mxu0 %v3891_v62  ;;  %v147_v54 = vld [vmem:[%s5853_s0 + $0x338] sm:$0xff]  ;;  %v5101_v62 = vpack.c.bf16 %v139_v20, %v132_v17 }
  0xbd   :  { %2022 = vmatprep.subr.bf16.mxu1 %v3894_v6  ;;  %1753 = vmatprep.mubr.bf16.mxu0 %v5070_v0  ;;  %v5103_v6 = vpack.c.bf16 %v141_v27, %v134_v21  ;;  %v3903_v0 = vld [vmem:[%s5854_s1 + $0x14c] ss:$16 sps:$4 sm:$0xff]   ;;  %v3901_v20 = vld [vmem:[%s5854_s1 + $0x148] ss:$16 sps:$4 sm:$0xff]   ;;  %v146_v21 = vld [vmem:[%s5853_s0 + $0x330] sm:$0xff] }
  0xbe   :  { %1866 = vmatprep.mubr.bf16.mxu1 %v5862_v3  ;;  %5875 = vst [vmem:[#allocation12_spill] sm:$0xff] %v5101_v62  ;;  %v3898_v3 = vld [vmem:[%s5854_s1 + $0x368] ss:$16 sps:$4 sm:$0xff]   ;;  %v3906_v17 = vld [vmem:[%s5854_s1 + $0x34c] ss:$16 sps:$4 sm:$0xff]  }
  0xbf   :  { %5876 = vst [vmem:[#allocation13_spill] sm:$0xff] %v5103_v6  ;;  %1910 = vmatpush2.bf16.msra.mxu0 %v3889_v15  ;;  %v3904_v15 = vld [vmem:[%s5854_s1 + $0x348] ss:$16 sps:$4 sm:$0xff]  }
  0xc0   :  { %2023 = vmatpush2.bf16.msra.mxu1 %v3892_v63  ;;  %1911 = vmatprep.subr.bf16.mxu0 %v3897_v44  ;;  %v5123_v63 = vpack.c.bf16 %v154_v40, %v147_v54  ;;  %v153_v27 = vld [vmem:[%s5853_s0 + $0x368] sm:$0xff]  ;;  %v148_v44 = vld [vmem:[%s5853_s0 + $0x340] sm:$0xff] }
  0xc1   :  { %2024 = vmatprep.subr.bf16.mxu1 %v3900_v46  ;;  %v155_v46 = vld [vmem:[%s5853_s0 + $0x378] sm:$0xff] }
  0xc2   :  { %5877 = vst [vmem:[#allocation14_spill] sm:$0xff] %v5123_v63  ;;  %1754 = vmatmul.mubr.bf16.gmra.mxu0 %v5101_v62  ;;  %v3909_v40 = vld [vmem:[%s5854_s1 + $0x12c] ss:$16 sps:$4 sm:$0xff]   ;;  %v3910_v62 = vld [vmem:[%s5854_s1 + $0x328] ss:$16 sps:$4 sm:$0xff]  }
  0xc3   :  { %3596 = vmatmul.mubr.msk.bf16.gmra.mxu1 %vm1410_vm0, %v5103_v6  ;;  %1912 = vmatpush2.bf16.msra.mxu0 %v3895_v30  ;;  %v3912_v54 = vld [vmem:[%s5854_s1 + $0x32c] ss:$16 sps:$4 sm:$0xff]   ;;  %v3907_v6 = vld [vmem:[%s5854_s1 + $0x128] ss:$16 sps:$4 sm:$0xff]   ;;  %v5154_v30 = vpack.c.bf16 %v153_v27, %v146_v21 }
  0xc4   :  { %2025 = vmatpush2.bf16.msra.mxu1 %v3898_v3  ;;  %1913 = vmatprep.subr.bf16.mxu0 %v3903_v0  ;;  %v5156_v3 = vpack.c.bf16 %v155_v46, %v148_v44  ;;  %v3915_v0 = vld [vmem:[%s5854_s1 + $0x10c] ss:$16 sps:$4 sm:$0xff]   ;;  %v3916_v21 = vld [vmem:[%s5854_s1 + $0x308] ss:$16 sps:$4 sm:$0xff]  }
  0xc5   :  { %2026 = vmatprep.subr.bf16.mxu1 %v3906_v17  ;;  %1763 = vmatprep.mubr.bf16.mxu0 %v5123_v63  ;;  %v3918_v17 = vld [vmem:[%s5854_s1 + $0x30c] ss:$16 sps:$4 sm:$0xff]   ;;  %v3913_v63 = vld [vmem:[%s5854_s1 + $0x108] ss:$16 sps:$4 sm:$0xff]  }
  0xc6   :  { %1876 = vmatprep.mubr.bf16.mxu1 %v5878_v35  ;;  %v3919_v27 = vld [vmem:[%s5854_s1 + $0x4e8] ss:$16 sps:$4 sm:$0xff]   ;;  %v3927_v46 = vld [vmem:[%s5854_s1 + $0x4cc] ss:$16 sps:$4 sm:$0xff]  }
  0xc7   :  { %1914 = vmatpush2.bf16.msra.mxu0 %v3901_v20  ;;  %v3921_v20 = vld [vmem:[%s5854_s1 + $0x4ec] ss:$16 sps:$4 sm:$0xff]   ;;  %v3922_v44 = vld [vmem:[%s5854_s1 + $0x608] ss:$16 sps:$4 sm:$0xff]  }
  0xc8   :  { %2027 = vmatpush2.bf16.msra.mxu1 %v3904_v15  ;;  %1915 = vmatprep.subr.bf16.mxu0 %v3909_v40  ;;  %v3924_v15 = vld [vmem:[%s5854_s1 + $0x60c] ss:$16 sps:$4 sm:$0xff]  }
  0xc9   :  { %2028 = vmatprep.subr.bf16.mxu1 %v3912_v54  ;;  %v3970_v54 = vld [vmem:[#allocation3 + $0x70] ss:$8 sps:$4 sm:$0xff]  }
  0xca   :  { %1764 = vmatmul.mubr.bf16.gmra.mxu0 %v5154_v30 }
  0xcb   :  { %3597 = vmatmul.mubr.msk.bf16.gmra.mxu1 %vm1410_vm0, %v5156_v3  ;;  %1916 = vmatpush2.bf16.msra.mxu0 %v3907_v6 }
  0xcc   :  { %2029 = vmatpush2.bf16.msra.mxu1 %v3910_v62  ;;  %1917 = vmatprep.subr.bf16.mxu0 %v3915_v0  ;;  %v3928_v62 = vld [vmem:[%s5854_s1 + $0x4a8] ss:$16 sps:$4 sm:$0xff]  }
  0xcd   :  { %2030 = vmatprep.subr.bf16.mxu1 %v3918_v17  ;;  %1919 = vmatprep.mubr.bf16.mxu0 %v4326_v55  ;;  %v3925_v55 = vld [vmem:[%s5854_s1 + $0x4c8] ss:$16 sps:$4 sm:$0xff]  }
  0xce   :  { %2032 = vmatprep.mubr.bf16.mxu1 %v4328_v56  ;;  %v3930_v56 = vld [vmem:[%s5854_s1 + $0x4ac] ss:$16 sps:$4 sm:$0xff]  }
  0xcf   :  { %1918 = vmatpush2.bf16.msra.mxu0 %v3913_v63  ;;  %v408_v63 = vld [vmem:[%s5855_s2] sm:$0xf]  ;;  %v3975_v0 = vld [vmem:[#allocation3 + $0x64] ss:$8 sps:$4 sm:$0xff]  }
  0xd0   :  { %2031 = vmatpush2.bf16.msra.mxu1 %v3916_v21  ;;  %2113 = vmatprep.subr.bf16.mxu0 %v3921_v20 }
  0xd1   :  { %2240 = vmatprep.subr.bf16.mxu1 %v3924_v15 }
  0xd2   :  { %1920 = vmatmul.mubr.bf16.vlgmr.msra.gmra.mxu0 %v4404_v18  ;;  %v3933_v18 = vld [vmem:[%s5854_s1 + $0x48c] ss:$16 sps:$4 sm:$0xff]  }
  0xd3   :  { %2033 = vmatmul.mubr.bf16.vlgmr.msra.gmra.mxu1 %v4406_v19  ;;  %2114 = vmatpush1.bf16.msra.mxu0 %v3919_v27  ;;  %v3931_v19 = vld [vmem:[%s5854_s1 + $0x488] ss:$16 sps:$4 sm:$0xff]  }
  0xd4   :  { %2241 = vmatpush1.bf16.msra.mxu1 %v3922_v44  ;;  %2115 = vmatprep.subr.bf16.mxu0 %v3927_v46  ;;  %v3973_v44 = vld [vmem:[#allocation3 + $0x60] ss:$8 sps:$4 sm:$0xff]  }
  0xd5   :  { %1929 = vmatprep.mubr.bf16.mxu0 %v4420_v24  ;;  %2042 = vmatprep.mubr.bf16.mxu1 %v4425_v26  ;;  %v3936_v24 = vld [vmem:[%s5854_s1 + $0x46c] ss:$16 sps:$4 sm:$0xff]   ;;  %v3934_v26 = vld [vmem:[%s5854_s1 + $0x468] ss:$16 sps:$4 sm:$0xff]  }
  0xd7   :  { %2116 = vmatpush1.bf16.msra.mxu0 %v3925_v55 }
  0xd8   :  { %2117 = vmatprep.subr.bf16.mxu0 %v3930_v56  ;;  %v3978_v56 = vld [vmem:[#allocation3 + $0x54] ss:$8 sps:$4 sm:$0xff]  }
  0xda   :  { %1930 = vmatmul.mubr.bf16.gmra.mxu0 %v4458_v36  ;;  %v3939_v36 = vld [vmem:[%s5854_s1 + $0x44c] ss:$16 sps:$4 sm:$0xff]  }
  0xdb   :  { %2043 = vmatmul.mubr.bf16.gmra.mxu1 %v4460_v37  ;;  %2118 = vmatpush1.bf16.msra.mxu0 %v3928_v62  ;;  %v3937_v37 = vld [vmem:[%s5854_s1 + $0x448] ss:$16 sps:$4 sm:$0xff]  }
  0xdc   :  { %1939 = vmatprep.mubr.bf16.mxu0 %v4465_v39  ;;  %2119 = vmatprep.subr.bf16.mxu0 %v3933_v18  ;;  %v3942_v39 = vld [vmem:[%s5854_s1 + $0x42c] ss:$16 sps:$4 sm:$0xff]  }
  0xdd   :  { %2052 = vmatprep.mubr.bf16.mxu1 %v4470_v41  ;;  %v3940_v41 = vld [vmem:[%s5854_s1 + $0x428] ss:$16 sps:$4 sm:$0xff]  }
  0xdf   :  { %2120 = vmatpush1.bf16.msra.mxu0 %v3931_v19 }
  0xe0   :  { %2121 = vmatprep.subr.bf16.mxu0 %v3936_v24  ;;  %v3976_v24 = vld [vmem:[#allocation3 + $0x50] ss:$8 sps:$4 sm:$0xff]  }
  0xe2   :  { %1940 = vmatmul.mubr.bf16.gmra.mxu0 %v4506_v52  ;;  %v3945_v52 = vld [vmem:[%s5854_s1 + $0x40c] ss:$16 sps:$4 sm:$0xff]  }
  0xe3   :  { %2053 = vmatmul.mubr.bf16.gmra.mxu1 %v4508_v53  ;;  %2122 = vmatpush1.bf16.msra.mxu0 %v3934_v26  ;;  %v3943_v53 = vld [vmem:[%s5854_s1 + $0x408] ss:$16 sps:$4 sm:$0xff]  }
  0xe4   :  { %1949 = vmatprep.mubr.bf16.mxu0 %v4513_v57  ;;  %2123 = vmatprep.subr.bf16.mxu0 %v3939_v36  ;;  %v3948_v57 = vld [vmem:[%s5854_s1 + $0x5ec] ss:$16 sps:$4 sm:$0xff]  }
  0xe5   :  { %2062 = vmatprep.mubr.bf16.mxu1 %v4518_v59  ;;  %v3946_v59 = vld [vmem:[%s5854_s1 + $0x5e8] ss:$16 sps:$4 sm:$0xff]  }
  0xe6   :  { %v3981_v36 = vld [vmem:[#allocation3 + $0x44] ss:$8 sps:$4 sm:$0xff]  }
  0xe7   :  { %2124 = vmatpush1.bf16.msra.mxu0 %v3937_v37 }
  0xe8   :  { %2125 = vmatprep.subr.bf16.mxu0 %v3942_v39 }
  0xea   :  { %1950 = vmatmul.mubr.bf16.gmra.mxu0 %v4554_v7  ;;  %v3951_v7 = vld [vmem:[%s5854_s1 + $0x5cc] ss:$16 sps:$4 sm:$0xff]  }
  0xeb   :  { %2063 = vmatmul.mubr.bf16.gmra.mxu1 %v4556_v8  ;;  %2126 = vmatpush1.bf16.msra.mxu0 %v3940_v41  ;;  %v3949_v8 = vld [vmem:[%s5854_s1 + $0x5c8] ss:$16 sps:$4 sm:$0xff]  }
  0xec   :  { %1959 = vmatprep.mubr.bf16.mxu0 %v4561_v10  ;;  %2127 = vmatprep.subr.bf16.mxu0 %v3945_v52  ;;  %v3954_v10 = vld [vmem:[%s5854_s1 + $0x5ac] ss:$16 sps:$4 sm:$0xff]  }
  0xed   :  { %2072 = vmatprep.mubr.bf16.mxu1 %v4566_v12  ;;  %v3952_v12 = vld [vmem:[%s5854_s1 + $0x5a8] ss:$16 sps:$4 sm:$0xff]  }
  0xef   :  { %2128 = vmatpush1.bf16.msra.mxu0 %v3943_v53 }
  0xf0   :  { %2129 = vmatprep.subr.bf16.mxu0 %v3948_v57  ;;  %v3979_v57 = vld [vmem:[#allocation3 + $0x40] ss:$8 sps:$4 sm:$0xff]  }
  0xf2   :  { %1960 = vmatmul.mubr.bf16.gmra.mxu0 %v4605_v28  ;;  %v3957_v28 = vld [vmem:[%s5854_s1 + $0x58c] ss:$16 sps:$4 sm:$0xff]  }
  0xf3   :  { %2073 = vmatmul.mubr.bf16.gmra.mxu1 %v4607_v29  ;;  %2130 = vmatpush2.bf16.msra.mxu0 %v3946_v59  ;;  %v3955_v29 = vld [vmem:[%s5854_s1 + $0x588] ss:$16 sps:$4 sm:$0xff]  }
  0xf4   :  { %1969 = vmatprep.mubr.bf16.mxu0 %v4612_v31  ;;  %2131 = vmatprep.subr.bf16.mxu0 %v3951_v7  ;;  %v3960_v31 = vld [vmem:[%s5854_s1 + $0x56c] ss:$16 sps:$4 sm:$0xff]  }
  0xf5   :  { %2082 = vmatprep.mubr.bf16.mxu1 %v4617_v33  ;;  %v3958_v33 = vld [vmem:[%s5854_s1 + $0x568] ss:$16 sps:$4 sm:$0xff]  }
  0xf7   :  { %2132 = vmatpush2.bf16.msra.mxu0 %v3949_v8  ;;  %v3984_v8 = vld [vmem:[#allocation3 + $0x34] ss:$8 sps:$4 sm:$0xff]  }
  0xf8   :  { %2133 = vmatprep.subr.bf16.mxu0 %v3954_v10 }
  0xfa   :  { %1970 = vmatmul.mubr.bf16.gmra.mxu0 %v4653_v48  ;;  %v3963_v48 = vld [vmem:[%s5854_s1 + $0x54c] ss:$16 sps:$4 sm:$0xff]  }
  0xfb   :  { %2083 = vmatmul.mubr.bf16.gmra.mxu1 %v4655_v49  ;;  %2134 = vmatpush2.bf16.msra.mxu0 %v3952_v12  ;;  %v3961_v49 = vld [vmem:[%s5854_s1 + $0x548] ss:$16 sps:$4 sm:$0xff]  }
  0xfc   :  { %1979 = vmatprep.mubr.bf16.mxu0 %v4660_v51  ;;  %2135 = vmatprep.subr.bf16.mxu0 %v3957_v28  ;;  %v410_v51 = vlaneseq }
  0xfd   :  { %2092 = vmatprep.mubr.bf16.mxu1 %v4665_v58  ;;  %v3966_v58 = vld [vmem:[%s5854_s1 + $0x52c] ss:$16 sps:$4 sm:$0xff]  }
  0xff   :  { %2136 = vmatpush2.bf16.msra.mxu0 %v3955_v29  ;;  %v3982_v29 = vld [vmem:[#allocation3 + $0x30] ss:$8 sps:$4 sm:$0xff]  }
 0x100   :  { %2137 = vmatprep.subr.bf16.mxu0 %v3960_v31 }
 0x102   :  { %1980 = vmatmul.mubr.bf16.gmra.mxu0 %v4701_v9  ;;  %v3964_v9 = vld [vmem:[%s5854_s1 + $0x528] ss:$16 sps:$4 sm:$0xff]  }
 0x103   :  { %2093 = vmatmul.mubr.bf16.gmra.mxu1 %v4703_v11  ;;  %2138 = vmatpush2.bf16.msra.mxu0 %v3958_v33  ;;  %v5299_v11 = vshrl.u32 %v410_v51, 7  ;;  %v3987_v33 = vld [vmem:[#allocation3 + $0x24] ss:$8 sps:$4 sm:$0xff]  }
 0x104   :  { %1989 = vmatprep.mubr.bf16.mxu0 %v4708_v14  ;;  %2139 = vmatprep.subr.bf16.mxu0 %v3963_v48  ;;  %v3969_v14 = vld [vmem:[%s5854_s1 + $0x50c] ss:$16 sps:$4 sm:$0xff]  }
 0x105   :  { %2102 = vmatprep.mubr.bf16.mxu1 %v4713_v16  ;;  %v3967_v16 = vld [vmem:[%s5854_s1 + $0x508] ss:$16 sps:$4 sm:$0xff]   ;;  %v5311_v6 = vsub.s32 0, %v5299_v11 }
 0x107   :  { %2140 = vmatpush2.bf16.msra.mxu0 %v3961_v49  ;;  %5879 = vst [vmem:[#allocation15_spill] sm:$0xff] %v5311_v6  ;;  %v5321_v40 = vrot.slane %v408_v63, %v5311_v6 }
 0x108   :  { %2141 = vmatprep.subr.bf16.mxu0 %v3966_v58  ;;  %v4020_v58 = vld [vmem:[#allocation3 + $0x174] ss:$8 sps:$4 sm:$0xff]  }
 0x109   :  { %3072 = vmatprep.subr.bf16.mxu1 %v4020_v58 }
 0x10a   :  { %1990 = vmatmul.mubr.bf16.gmra.mxu0 %v4743_v32  ;;  %v3972_v32 = vld [vmem:[#allocation3 + $0x74] ss:$8 sps:$4 sm:$0xff]  }
 0x10b   :  { %2103 = vmatmul.mubr.bf16.gmra.mxu1 %v4745_v34  ;;  %2142 = vmatpush2.bf16.msra.mxu0 %v3964_v9  ;;  %v5318_v34 = vsub.s32 1, %v5299_v11 }
 0x10c   :  { %2145 = vmatprep.mubr.bf16.mxu0 %v4750_v38  ;;  %2143 = vmatprep.subr.bf16.mxu0 %v3969_v14 }
 0x10d   :  { %2258 = vmatprep.mubr.bf16.mxu1 %v5878_v35  ;;  %v5324_v38 = vrot.slane %v408_v63, %v5318_v34  ;;  %v4018_v63 = vld [vmem:[#allocation3 + $0x170] ss:$8 sps:$4 sm:$0xff]  }
 0x10f   :  { %2144 = vmatpush2.bf16.msra.mxu0 %v3967_v16  ;;  %v3985_v16 = vld [vmem:[#allocation3 + $0x20] ss:$8 sps:$4 sm:$0xff]  }
 0x110   :  { %2959 = vmatprep.subr.bf16.mxu0 %v3972_v32 }
 0x112   :  { %v1469_v17 = vpop.f32.mrf.mxu0  ;;  %2146 = vmatmul.mubr.bf16.vlgmr.msra.gmra.mxu0 %v4783_v60 }
 0x113   :  { %v1582_v21 = vpop.f32.mrf.mxu1  ;;  %3598 = vmatmul.mubr.msk.bf16.vlgmr.msra.gmra.mxu1 %vm1410_vm0, %v4785_v61  ;;  %v1470_v20 = vadd.f32 %v1469_v17, %v5321_v40  ;;  %2155 = vmatprep.mubr.bf16.mxu0 %v4802_v4 }
 0x114   :  { %2268 = vmatprep.mubr.bf16.mxu1 %v5878_v35  ;;  %v1471_v15 = vpop.f32.mrf.mxu0  ;;  %2960 = vmatpush1.bf16.msra.mxu0 %v3970_v54 }
 0x115   :  { %v1584_v27 = vpop.f32.mrf.mxu1  ;;  %v5332_v46 = vadd.f32 %v1582_v21, %v1470_v20  ;;  %v1472_v55 = vadd.f32 %v1471_v15, %v5324_v38  ;;  %2961 = vmatprep.subr.bf16.mxu0 %v3975_v0  ;;  %3073 = vmatpush1.bf16.msra.mxu1 %v4018_v63  ;;  %v4023_v21 = vld [vmem:[#allocation3 + $0x164] ss:$8 sps:$4 sm:$0xff]   ;;  %v3997_v63 = vld [vmem:[#allocation3 + $0xe0] ss:$8 sps:$4 sm:$0xff]  }
 0x116   :  { %v1473_v60 = vpop.f32.mrf.mxu0  ;;  %3074 = vmatprep.subr.bf16.mxu1 %v4023_v21  ;;  %v4035_v21 = vld [vmem:[#allocation3 + $0x124] ss:$8 sps:$4 sm:$0xff]  }
 0x117   :  { %v1586_v62 = vpop.f32.mrf.mxu1  ;;  %v5335_v18 = vadd.f32 %v1584_v27, %v1472_v55  ;;  %v1474_v61 = vadd.f32 %v1473_v60, %v5321_v40  ;;  %v3988_v27 = vld [vmem:[#allocation3 + $0x10] ss:$8 sps:$4 sm:$0xff]  }
 0x118   :  { %v5338_v19 = vpop.f32.mrf.mxu0  ;;  %2962 = vmatpush1.bf16.msra.mxu0 %v3973_v44  ;;  %v4021_v44 = vld [vmem:[#allocation3 + $0x160] ss:$8 sps:$4 sm:$0xff]  }
 0x119   :  { %v5340_v4 = vpop.f32.mrf.mxu1  ;;  %v5342_v26 = vadd.f32 %v1586_v62, %v1474_v61  ;;  %2963 = vmatprep.subr.bf16.mxu0 %v3978_v56  ;;  %v3993_v56 = vld [vmem:[#allocation3 + $0x4] ss:$8 sps:$4 sm:$0xff]   ;;  %3075 = vmatpush1.bf16.msra.mxu1 %v4021_v44 }
 0x11a   :  { %v1479_v37 = vpop.f32.mrf.mxu0  ;;  %2156 = vmatmul.mubr.bf16.gmra.mxu0 %v4833_v23 }
 0x11b   :  { %v1592_v39 = vpop.f32.mrf.mxu1  ;;  %3599 = vmatmul.mubr.msk.bf16.gmra.mxu1 %vm1410_vm0, %v4835_v25  ;;  %v1480_v41 = vadd.f32 %v1479_v37, %v5321_v40  ;;  %2165 = vmatprep.mubr.bf16.mxu0 %v4858_v45 }
 0x11c   :  { %2278 = vmatprep.mubr.bf16.mxu1 %v5878_v35  ;;  %v1481_v52 = vpop.f32.mrf.mxu0  ;;  %2964 = vmatpush1.bf16.msra.mxu0 %v3976_v24  ;;  %v4026_v24 = vld [vmem:[#allocation3 + $0x154] ss:$8 sps:$4 sm:$0xff]  }
 0x11d   :  { %v1594_v53 = vpop.f32.mrf.mxu1  ;;  %v5350_v59 = vadd.f32 %v1592_v39, %v1480_v41  ;;  %v1482_v7 = vadd.f32 %v1481_v52, %v5324_v38  ;;  %2965 = vmatprep.subr.bf16.mxu0 %v3981_v36  ;;  %v3991_v39 = vld [vmem:[#allocation3] ss:$8 sps:$4 sm:$0xff]   ;;  %v4024_v41 = vld [vmem:[#allocation3 + $0x150] ss:$8 sps:$4 sm:$0xff]   ;;  %3076 = vmatprep.subr.bf16.mxu1 %v4026_v24 }
 0x11e   :  { %v1483_v23 = vpop.f32.mrf.mxu0  ;;  %3077 = vmatpush1.bf16.msra.mxu1 %v4024_v41 }
 0x11f   :  { %v1596_v10 = vpop.f32.mrf.mxu1  ;;  %v5353_v12 = vadd.f32 %v1594_v53, %v1482_v7  ;;  %v1484_v25 = vadd.f32 %v1483_v23, %v5321_v40  ;;  %v3996_v53 = vld [vmem:[#allocation3 + $0xf4] ss:$8 sps:$4 sm:$0xff]  }
 0x120   :  { %v5356_v28 = vpop.f32.mrf.mxu0  ;;  %2966 = vmatpush1.bf16.msra.mxu0 %v3979_v57 }
 0x121   :  { %v5358_v45 = vpop.f32.mrf.mxu1  ;;  %v5360_v31 = vadd.f32 %v1596_v10, %v1484_v25  ;;  %2967 = vmatprep.subr.bf16.mxu0 %v3984_v8  ;;  %v4029_v8 = vld [vmem:[#allocation3 + $0x144] ss:$8 sps:$4 sm:$0xff]   ;;  %v3994_v25 = vld [vmem:[#allocation3 + $0xf0] ss:$8 sps:$4 sm:$0xff]  }
 0x122   :  { %v1489_v48 = vpop.f32.mrf.mxu0  ;;  %2166 = vmatmul.mubr.bf16.gmra.mxu0 %v4889_v2  ;;  %v3990_v2 = vld [vmem:[#allocation3 + $0x14] ss:$8 sps:$4 sm:$0xff]   ;;  %3078 = vmatprep.subr.bf16.mxu1 %v4029_v8  ;;  %v4036_v8 = vld [vmem:[#allocation3 + $0x110] ss:$8 sps:$4 sm:$0xff]  }
 0x123   :  { %v1602_v49 = vpop.f32.mrf.mxu1  ;;  %3600 = vmatmul.mubr.msk.bf16.gmra.mxu1 %vm1410_vm0, %v4891_v5  ;;  %v1490_v51 = vadd.f32 %v1489_v48, %v5321_v40  ;;  %2175 = vmatprep.mubr.bf16.mxu0 %v4911_v22  ;;  %v3999_v48 = vld [vmem:[#allocation3 + $0xe4] ss:$8 sps:$4 sm:$0xff]  }
 0x124   :  { %2288 = vmatprep.mubr.bf16.mxu1 %v5878_v35  ;;  %v1491_v9 = vpop.f32.mrf.mxu0  ;;  %2968 = vmatpush1.bf16.msra.mxu0 %v3982_v29  ;;  %v4027_v29 = vld [vmem:[#allocation3 + $0x140] ss:$8 sps:$4 sm:$0xff]  }
 0x125   :  { %v1604_v14 = vpop.f32.mrf.mxu1  ;;  %v5368_v32 = vadd.f32 %v1602_v49, %v1490_v51  ;;  %v1492_v54 = vadd.f32 %v1491_v9, %v5324_v38  ;;  %2969 = vmatprep.subr.bf16.mxu0 %v3987_v33  ;;  %v4032_v9 = vld [vmem:[#allocation3 + $0x134] ss:$8 sps:$4 sm:$0xff]   ;;  %3079 = vmatpush1.bf16.msra.mxu1 %v4027_v29 }
 0x126   :  { %v1493_v5 = vpop.f32.mrf.mxu0  ;;  %3080 = vmatprep.subr.bf16.mxu1 %v4032_v9 }
 0x127   :  { %v1606_v0 = vpop.f32.mrf.mxu1  ;;  %v5371_v17 = vadd.f32 %v1604_v14, %v1492_v54  ;;  %v1494_v22 = vadd.f32 %v1493_v5, %v5321_v40  ;;  %v4030_v54 = vld [vmem:[#allocation3 + $0x130] ss:$8 sps:$4 sm:$0xff]   ;;  %v4002_v5 = vld [vmem:[#allocation3 + $0xd4] ss:$8 sps:$4 sm:$0xff]  }
 0x128   :  { %v5374_v20 = vpop.f32.mrf.mxu0  ;;  %2970 = vmatpush1.bf16.msra.mxu0 %v3985_v16 }
 0x129   :  { %v5376_v15 = vpop.f32.mrf.mxu1  ;;  %v5378_v55 = vadd.f32 %v1606_v0, %v1494_v22  ;;  %2971 = vmatprep.subr.bf16.mxu0 %v3990_v2  ;;  %3081 = vmatpush1.bf16.msra.mxu1 %v4030_v54  ;;  %v4006_v54 = vld [vmem:[#allocation3 + $0xb0] ss:$8 sps:$4 sm:$0xff]  }
 0x12a   :  { %v1499_v60 = vpop.f32.mrf.mxu0  ;;  %2176 = vmatmul.mubr.bf16.gmra.mxu0 %v4942_v47  ;;  %3082 = vmatprep.subr.bf16.mxu1 %v4035_v21  ;;  %v5883_v21 = vld [vmem:[#allocation12_spill] sm:$0xff] }
 0x12b   :  { %v1612_v62 = vpop.f32.mrf.mxu1  ;;  %3601 = vmatmul.mubr.msk.bf16.gmra.mxu1 %vm1410_vm0, %v4944_v50  ;;  %v1500_v61 = vadd.f32 %v1499_v60, %v5321_v40  ;;  %2185 = vmatprep.mubr.bf16.mxu0 %v4964_v13  ;;  %v4033_v60 = vld [vmem:[#allocation3 + $0x120] ss:$8 sps:$4 sm:$0xff]  }
 0x12c   :  { %2298 = vmatprep.mubr.bf16.mxu1 %v5878_v35  ;;  %v1501_v36 = vpop.f32.mrf.mxu0  ;;  %2972 = vmatpush1.bf16.msra.mxu0 %v3988_v27 }
 0x12d   :  { %v1614_v37 = vpop.f32.mrf.mxu1  ;;  %v5386_v52 = vadd.f32 %v1612_v62, %v1500_v61  ;;  %v1502_v47 = vadd.f32 %v1501_v36, %v5324_v38  ;;  %2973 = vmatprep.subr.bf16.mxu0 %v3993_v56  ;;  %v4000_v56 = vld [vmem:[#allocation3 + $0xd0] ss:$8 sps:$4 sm:$0xff]   ;;  %v4005_v61 = vld [vmem:[#allocation3 + $0xc4] ss:$8 sps:$4 sm:$0xff]   ;;  %3083 = vmatpush1.bf16.msra.mxu1 %v4033_v60 }
 0x12e   :  { %v1503_v50 = vpop.f32.mrf.mxu0 }
 0x12f   :  { %v1616_v57 = vpop.f32.mrf.mxu1  ;;  %v5389_v7 = vadd.f32 %v1614_v37, %v1502_v47  ;;  %v1504_v13 = vadd.f32 %v1503_v50, %v5321_v40  ;;  %v5880_v37 = vld [vmem:[#allocation9_spill] sm:$0xff]  ;;  %v5882_v47 = vld [vmem:[#allocation11_spill] sm:$0xff] }
 0x130   :  { %v5392_v23 = vpop.f32.mrf.mxu0  ;;  %2974 = vmatpush1.bf16.msra.mxu0 %v3991_v39  ;;  %v5881_v39 = vld [vmem:[#allocation10_spill] sm:$0xff] }
 0x131   :  { %v5394_v10 = vpop.f32.mrf.mxu1  ;;  %v5396_v33 = vadd.f32 %v1616_v57, %v1504_v13  ;;  %2975 = vmatprep.subr.bf16.mxu0 %v3996_v53  ;;  %v4038_v53 = vld [vmem:[#allocation3 + $0x114] ss:$8 sps:$4 sm:$0xff]   ;;  %v4003_v13 = vld [vmem:[#allocation3 + $0xc0] ss:$8 sps:$4 sm:$0xff]  }
 0x132   :  { %v1509_v49 = vpop.f32.mrf.mxu0  ;;  %2186 = vmatmul.mubr.bf16.gmra.mxu0 %v4995_v42  ;;  %3084 = vmatprep.subr.bf16.mxu1 %v4038_v53 }
 0x133   :  { %v1622_v51 = vpop.f32.mrf.mxu1  ;;  %3602 = vmatmul.mubr.msk.bf16.gmra.mxu1 %vm1410_vm0, %v4997_v43  ;;  %v1510_v58 = vadd.f32 %v1509_v49, %v5321_v40  ;;  %2195 = vmatprep.mubr.bf16.mxu0 %v5017_v1 }
 0x134   :  { %2308 = vmatprep.mubr.bf16.mxu1 %v5878_v35  ;;  %v1511_v14 = vpop.f32.mrf.mxu0  ;;  %2976 = vmatpush2.bf16.msra.mxu0 %v3994_v25 }
 0x135   :  { %v1624_v16 = vpop.f32.mrf.mxu1  ;;  %v5404_v2 = vadd.f32 %v1622_v51, %v1510_v58  ;;  %v1512_v42 = vadd.f32 %v1511_v14, %v5324_v38  ;;  %2977 = vmatprep.subr.bf16.mxu0 %v3999_v48  ;;  %v4008_v48 = vld [vmem:[#allocation3 + $0xb4] ss:$8 sps:$4 sm:$0xff]   ;;  %v4041_v14 = vld [vmem:[#allocation3 + $0x104] ss:$8 sps:$4 sm:$0xff]   ;;  %3085 = vmatpush1.bf16.msra.mxu1 %v4036_v8 }
 0x136   :  { %v1513_v43 = vpop.f32.mrf.mxu0  ;;  %3086 = vmatprep.subr.bf16.mxu1 %v4041_v14 }
 0x137   :  { %v1626_v0 = vpop.f32.mrf.mxu1  ;;  %v5407_v22 = vadd.f32 %v1624_v16, %v1512_v42  ;;  %v1514_v1 = vadd.f32 %v1513_v43, %v5321_v40  ;;  %v4039_v42 = vld [vmem:[#allocation3 + $0x100] ss:$8 sps:$4 sm:$0xff]   ;;  %v4011_v43 = vld [vmem:[#allocation3 + $0xa4] ss:$8 sps:$4 sm:$0xff]  }
 0x138   :  { %v5410_v27 = vpop.f32.mrf.mxu0  ;;  %2978 = vmatpush2.bf16.msra.mxu0 %v3997_v63 }
 0x139   :  { %v5412_v44 = vpop.f32.mrf.mxu1  ;;  %v5414_v62 = vadd.f32 %v1626_v0, %v1514_v1  ;;  %2979 = vmatprep.subr.bf16.mxu0 %v4002_v5  ;;  %3087 = vmatpush1.bf16.msra.mxu1 %v4039_v42 }
 0x13a   :  { %v1519_v24 = vpop.f32.mrf.mxu0  ;;  %2196 = vmatmul.mubr.bf16.gmra.mxu0 %v5880_v37 }
 0x13b   :  { %v1632_v36 = vpop.f32.mrf.mxu1  ;;  %3603 = vmatmul.mubr.msk.bf16.gmra.mxu1 %vm1410_vm0, %v5881_v39  ;;  %v1520_v41 = vadd.f32 %v1519_v24, %v5321_v40  ;;  %2205 = vmatprep.mubr.bf16.mxu0 %v5882_v47  ;;  %v4044_v24 = vld [vmem:[#allocation3 + $0x1f4] ss:$8 sps:$4 sm:$0xff]   ;;  %v4009_v39 = vld [vmem:[#allocation3 + $0xa0] ss:$8 sps:$4 sm:$0xff]  }
 0x13c   :  { %2318 = vmatprep.mubr.bf16.mxu1 %v5878_v35  ;;  %v1521_v50 = vpop.f32.mrf.mxu0  ;;  %2980 = vmatpush2.bf16.msra.mxu0 %v4000_v56  ;;  %v5884_v56 = vld [vmem:[#allocation13_spill] sm:$0xff] }
 0x13d   :  { %v1634_v57 = vpop.f32.mrf.mxu1  ;;  %v5422_v25 = vadd.f32 %v1632_v36, %v1520_v41  ;;  %v1522_v29 = vadd.f32 %v1521_v50, %v5324_v38  ;;  %2981 = vmatprep.subr.bf16.mxu0 %v4005_v61  ;;  %v5885_v61 = vld [vmem:[#allocation14_spill] sm:$0xff]  ;;  %v4014_v50 = vld [vmem:[#allocation3 + $0x94] ss:$8 sps:$4 sm:$0xff]   ;;  %3088 = vmatprep.subr.bf16.mxu1 %v4044_v24 }
 0x13e   :  { %v1523_v49 = vpop.f32.mrf.mxu0  ;;  %v4042_v41 = vld [vmem:[#allocation3 + $0x1f0] ss:$8 sps:$4 sm:$0xff]  }
 0x13f   :  { %v1636_v51 = vpop.f32.mrf.mxu1  ;;  %v5425_v58 = vadd.f32 %v1634_v57, %v1522_v29  ;;  %v1524_v9 = vadd.f32 %v1523_v49, %v5321_v40  ;;  %v4047_v29 = vld [vmem:[#allocation3 + $0x1e4] ss:$8 sps:$4 sm:$0xff]   ;;  %3089 = vmatpush2.bf16.msra.mxu1 %v4042_v41 }
 0x140   :  { %v5428_v16 = vpop.f32.mrf.mxu0  ;;  %2982 = vmatpush2.bf16.msra.mxu0 %v4003_v13  ;;  %3090 = vmatprep.subr.bf16.mxu1 %v4047_v29  ;;  %v4053_v41 = vld [vmem:[#allocation3 + $0x1c4] ss:$8 sps:$4 sm:$0xff]  }
 0x141   :  { %v5430_v63 = vpop.f32.mrf.mxu1  ;;  %v5432_v5 = vadd.f32 %v1636_v51, %v1524_v9  ;;  %2983 = vmatprep.subr.bf16.mxu0 %v4008_v48  ;;  %v4012_v51 = vld [vmem:[#allocation3 + $0x90] ss:$8 sps:$4 sm:$0xff]   ;;  %v4045_v9 = vld [vmem:[#allocation3 + $0x1e0] ss:$8 sps:$4 sm:$0xff]  }
 0x142   :  { %v1529_v0 = vpop.f32.mrf.mxu0  ;;  %2206 = vmatmul.mubr.bf16.gmra.mxu0 %v5883_v21 }
 0x143   :  { %v1642_v1 = vpop.f32.mrf.mxu1  ;;  %3604 = vmatmul.mubr.msk.bf16.gmra.mxu1 %vm1410_vm0, %v5884_v56  ;;  %v1530_v60 = vadd.f32 %v1529_v0, %v5321_v40  ;;  %2215 = vmatprep.mubr.bf16.mxu0 %v5885_v61  ;;  %v4048_v61 = vld [vmem:[#allocation3 + $0x1d0] ss:$8 sps:$4 sm:$0xff]  }
 0x144   :  { %2328 = vmatprep.mubr.bf16.mxu1 %v5878_v35  ;;  %v1531_v36 = vpop.f32.mrf.mxu0  ;;  %2984 = vmatpush2.bf16.msra.mxu0 %v4006_v54  ;;  %v4017_v54 = vld [vmem:[#allocation3 + $0x84] ss:$8 sps:$4 sm:$0xff]  }
 0x145   :  { %v1644_v37 = vpop.f32.mrf.mxu1  ;;  %v5440_v47 = vadd.f32 %v1642_v1, %v1530_v60  ;;  %v1532_v53 = vadd.f32 %v1531_v36, %v5324_v38  ;;  %2985 = vmatprep.subr.bf16.mxu0 %v4011_v43  ;;  %v4050_v1 = vld [vmem:[#allocation3 + $0x1d4] ss:$8 sps:$4 sm:$0xff]   ;;  %v4015_v60 = vld [vmem:[#allocation3 + $0x80] ss:$8 sps:$4 sm:$0xff]   ;;  %3091 = vmatpush2.bf16.msra.mxu1 %v4045_v9 }
 0x146   :  { %v1533_v57 = vpop.f32.mrf.mxu0  ;;  %3092 = vmatprep.subr.bf16.mxu1 %v4050_v1  ;;  %v4056_v9 = vld [vmem:[#allocation3 + $0x1b4] ss:$8 sps:$4 sm:$0xff]  }
 0x147   :  { %v1646_v13 = vpop.f32.mrf.mxu1  ;;  %v5443_v8 = vadd.f32 %v1644_v37, %v1532_v53  ;;  %v1534_v35 = vadd.f32 %v1533_v57, %v5321_v40  ;;  %v4051_v57 = vld [vmem:[#allocation3 + $0x1c0] ss:$8 sps:$4 sm:$0xff]  }
 0x148   :  { %v5446_v48 = vpop.f32.mrf.mxu0  ;;  %2986 = vmatpush2.bf16.msra.mxu0 %v4009_v39 }
 0x149   :  { %v5448_v49 = vpop.f32.mrf.mxu1  ;;  %v5450_v14 = vadd.f32 %v1646_v13, %v1534_v35  ;;  %2987 = vmatprep.subr.bf16.mxu0 %v4014_v50  ;;  %3093 = vmatpush2.bf16.msra.mxu1 %v4048_v61  ;;  %v4059_v61 = vld [vmem:[#allocation3 + $0x1a4] ss:$8 sps:$4 sm:$0xff]  }
 0x14a   :  { %v1539_v42 = vpop.f32.mrf.mxu0  ;;  %2216 = vmatmul.mubr.bf16.gmra.mxu0 %v5154_v30  ;;  %3094 = vmatprep.subr.bf16.mxu1 %v4053_v41 }
 0x14b   :  { %v1652_v43 = vpop.f32.mrf.mxu1  ;;  %3605 = vmatmul.mubr.msk.bf16.gmra.mxu1 %vm1410_vm0, %v5156_v3  ;;  %v1540_v0 = vadd.f32 %v1539_v42, %v5321_v40 }
 0x14c   :  { %v1541_v21 = vpop.f32.mrf.mxu0  ;;  %2988 = vmatpush2.bf16.msra.mxu0 %v4012_v51 }
 0x14d   :  { %v1654_v56 = vpop.f32.mrf.mxu1  ;;  %v5456_v24 = vadd.f32 %v1652_v43, %v1540_v0  ;;  %v1542_v36 = vadd.f32 %v1541_v21, %v5324_v38  ;;  %2989 = vmatprep.subr.bf16.mxu0 %v4017_v54  ;;  %v1476_v54 = vadd.f32 %v5338_v19, %v5324_v38  ;;  %3095 = vmatpush2.bf16.msra.mxu1 %v4051_v57  ;;  %v4054_v43 = vld [vmem:[#allocation3 + $0x1b0] ss:$8 sps:$4 sm:$0xff]   ;;  %v4057_v19 = vld [vmem:[#allocation3 + $0x1a0] ss:$8 sps:$4 sm:$0xff]  }
 0x14e   :  { %v1543_v37 = vpop.f32.mrf.mxu0  ;;  %3096 = vmatprep.subr.bf16.mxu1 %v4056_v9 }
 0x14f   :  { %v1656_v30 = vpop.f32.mrf.mxu1  ;;  %v5459_v39 = vadd.f32 %v1654_v56, %v1542_v36  ;;  %v1544_v3 = vadd.f32 %v1543_v37, %v5321_v40  ;;  %v1589_v36 = vadd.f32 %v5340_v4, %v1476_v54  ;;  %v1486_v4 = vadd.f32 %v5356_v28, %v5324_v38 }
 0x150   :  { %v5462_v53 = vpop.f32.mrf.mxu0  ;;  %2990 = vmatpush2.bf16.msra.mxu0 %v4015_v60 }
 0x151   :  { %v5464_v50 = vpop.f32.mrf.mxu1  ;;  %v5466_v13 = vadd.f32 %v1656_v30, %v1544_v3  ;;  %3097 = vmatpush2.bf16.msra.mxu1 %v4054_v43 }
 0x152   :  { %v1695_v35 = vpop.f32.mrf.mxu0  ;;  %3098 = vmatprep.subr.bf16.mxu1 %v4059_v61 }
 0x153   :  { %v1808_v29 = vpop.f32.mrf.mxu1  ;;  %v1696_v51 = vadd.f32 %v1695_v35, %v5332_v46 }
 0x154   :  { %v1697_v40 = vpop.f32.mrf.mxu0 }
 0x155   :  { %v1810_v42 = vpop.f32.mrf.mxu1  ;;  %v1809_v0 = vadd.f32 %v1808_v29, %v1696_v51  ;;  %v1698_v1 = vadd.f32 %v1697_v40, %v5335_v18  ;;  %3099 = vmatpush2.bf16.msra.mxu1 %v4057_v19 }
 0x156   :  { %v1699_v21 = vpop.f32.mrf.mxu0 }
 0x157   :  { %v1812_v56 = vpop.f32.mrf.mxu1  ;;  %v1700_v60 = vadd.f32 %v1699_v21, %v5342_v26  ;;  %v2403_v46 = vmul.f32 0.2, %v1809_v0  ;;  %vm2339_vm1 = vcmp.ge.f32.partialorder %v1809_v0, 0.0  ;;  %v1811_v3 = vadd.f32 %v1810_v42, %v1698_v1  ;;  %v4062_v26 = vld [vmem:[#allocation3 + $0x194] ss:$8 sps:$4 sm:$0xff]  }
 0x158   :  { %v1701_v37 = vpop.f32.mrf.mxu0  ;;  %v4060_v21 = vld [vmem:[#allocation3 + $0x190] ss:$8 sps:$4 sm:$0xff]   ;;  %3100 = vmatprep.subr.bf16.mxu1 %v4062_v26 }
 0x159   :  { %v1814_v30 = vpop.f32.mrf.mxu1  ;;  %v1813_v41 = vadd.f32 %v1812_v56, %v1700_v60  ;;  %v1702_v57 = vadd.f32 %v1701_v37, %v1589_v36  ;;  %v2467_v9 = vsel %vm2339_vm1, %v1809_v0, %v2403_v46  ;;  %v2404_v42 = vmul.f32 0.2, %v1811_v3  ;;  %v4065_v0 = vld [vmem:[#allocation3 + $0x184] ss:$8 sps:$4 sm:$0xff]   ;;  %3101 = vmatpush2.bf16.msra.mxu1 %v4060_v21 }
 0x15a   :  { %v1705_v35 = vpop.f32.mrf.mxu0  ;;  %vm2340_vm3 = vcmp.ge.f32.partialorder %v1811_v3, 0.0  ;;  %v1599_v46 = vadd.f32 %v5358_v45, %v1486_v4  ;;  %3102 = vmatprep.subr.bf16.mxu1 %v4065_v0  ;;  %v1496_v4 = vadd.f32 %v5374_v20, %v5324_v38 }
 0x15b   :  { %v1818_v18 = vpop.f32.mrf.mxu1  ;;  %vm2343_vm2 = vcmp.ge.f32.partialorder %v1813_v41, 0.0  ;;  %v2407_v29 = vmul.f32 0.2, %v1813_v41  ;;  %v1706_v51 = vadd.f32 %v1705_v35, %v5350_v59  ;;  %v1815_v54 = vadd.f32 %v1814_v30, %v1702_v57 }
 0x15c   :  { %v1707_v40 = vpop.f32.mrf.mxu0 }
 0x15d   :  { %v1820_v43 = vpop.f32.mrf.mxu1  ;;  %v2471_v1 = vsel %vm2343_vm2, %v1813_v41, %v2407_v29  ;;  %v1819_v56 = vadd.f32 %v1818_v18, %v1706_v51  ;;  %v1708_v60 = vadd.f32 %v1707_v40, %v5353_v12  ;;  %vm2344_vm4 = vcmp.ge.f32.partialorder %v1815_v54, 0.0  ;;  %v4063_v41 = vld [vmem:[#allocation3 + $0x180] ss:$8 sps:$4 sm:$0xff]  }
 0x15e   :  { %v2531_v61 = vpack.c.bf16 %v2471_v1, %v2467_v9  ;;  %v2408_v59 = vmul.f32 0.2, %v1815_v54  ;;  %v1709_v36 = vpop.f32.mrf.mxu0  ;;  %v2468_v29 = vsel %vm2340_vm3, %v1811_v3, %v2404_v42  ;;  %3103 = vmatpush2.bf16.msra.mxu1 %v4063_v41 }
 0x15f   :  { %v1822_v37 = vpop.f32.mrf.mxu1  ;;  %v1710_v28 = vadd.f32 %v1709_v36, %v5360_v31  ;;  %v2411_v30 = vmul.f32 0.2, %v1819_v56  ;;  %vm2347_vm5 = vcmp.ge.f32.partialorder %v1819_v56, 0.0  ;;  %v1821_v12 = vadd.f32 %v1820_v43, %v1708_v60 }
 0x160   :  { %v1711_v19 = vpop.f32.mrf.mxu0  ;;  %v2472_v35 = vsel %vm2344_vm4, %v1815_v54, %v2408_v59 }
 0x161   :  { %v1824_v57 = vpop.f32.mrf.mxu1  ;;  %v1823_v18 = vadd.f32 %v1822_v37, %v1710_v28  ;;  %v1712_v51 = vadd.f32 %v1711_v19, %v1599_v46  ;;  %v2532_v40 = vpack.c.bf16 %v2472_v35, %v2468_v29  ;;  %v2475_v54 = vsel %vm2347_vm5, %v1819_v56, %v2411_v30 }
 0x162   :  { %v1715_v26 = vpop.f32.mrf.mxu0  ;;  %v2412_v60 = vmul.f32 0.2, %v1821_v12  ;;  %vm2348_vm7 = vcmp.ge.f32.partialorder %v1821_v12, 0.0  ;;  %v1609_v56 = vadd.f32 %v5376_v15, %v1496_v4 }
 0x163   :  { %v1828_v9 = vpop.f32.mrf.mxu1  ;;  %vm2351_vm6 = vcmp.ge.f32.partialorder %v1823_v18, 0.0  ;;  %v2415_v31 = vmul.f32 0.2, %v1823_v18  ;;  %v1716_v45 = vadd.f32 %v1715_v26, %v5368_v32  ;;  %v1825_v21 = vadd.f32 %v1824_v57, %v1712_v51  ;;  %2991 = vmatprep.mubr.bf16.mxu0 %v2532_v40 }
 0x164   :  { %v1717_v1 = vpop.f32.mrf.mxu0  ;;  %2992 = vmatmul.mubr.bf16.vlgmr.msra.gmra.mxu0 %v2531_v61  ;;  %v2476_v61 = vsel %vm2348_vm7, %v1821_v12, %v2412_v60 }
 0x165   :  { %v1830_v43 = vpop.f32.mrf.mxu1  ;;  %v2479_v3 = vsel %vm2351_vm6, %v1823_v18, %v2415_v31  ;;  %v1829_v42 = vadd.f32 %v1828_v9, %v1716_v45  ;;  %v1718_v59 = vadd.f32 %v1717_v1, %v5371_v17  ;;  %vm2352_vm8 = vcmp.ge.f32.partialorder %v1825_v21, 0.0 }
 0x166   :  { %v2535_v36 = vpack.c.bf16 %v2479_v3, %v2475_v54  ;;  %v2416_v37 = vmul.f32 0.2, %v1825_v21  ;;  %v1719_v32 = vpop.f32.mrf.mxu0 }
 0x167   :  { %v1832_v28 = vpop.f32.mrf.mxu1  ;;  %v1720_v20 = vadd.f32 %v1719_v32, %v5378_v55  ;;  %v2419_v0 = vmul.f32 0.2, %v1829_v42  ;;  %vm2355_vm9 = vcmp.ge.f32.partialorder %v1829_v42, 0.0  ;;  %v1831_v57 = vadd.f32 %v1830_v43, %v1718_v59 }
 0x168   :  { %v1721_v46 = vpop.f32.mrf.mxu0  ;;  %v2480_v19 = vsel %vm2352_vm8, %v1825_v21, %v2416_v37  ;;  %v1506_v55 = vadd.f32 %v5392_v23, %v5324_v38 }
 0x169   :  { %v1834_v30 = vpop.f32.mrf.mxu1  ;;  %v1833_v35 = vadd.f32 %v1832_v28, %v1720_v20  ;;  %v1722_v41 = vadd.f32 %v1721_v46, %v1609_v56  ;;  %v2536_v29 = vpack.c.bf16 %v2480_v19, %v2476_v61  ;;  %v2483_v15 = vsel %vm2355_vm9, %v1829_v42, %v2419_v0 }
 0x16a   :  { %v1725_v17 = vpop.f32.mrf.mxu0  ;;  %v2420_v45 = vmul.f32 0.2, %v1831_v57  ;;  %vm2356_vm11 = vcmp.ge.f32.partialorder %v1831_v57, 0.0  ;;  %v1619_v23 = vadd.f32 %v5394_v10, %v1506_v55 }
 0x16b   :  { %v1838_v18 = vpop.f32.mrf.mxu1  ;;  %vm2359_vm10 = vcmp.ge.f32.partialorder %v1833_v35, 0.0  ;;  %v2423_v51 = vmul.f32 0.2, %v1833_v35  ;;  %v1726_v26 = vadd.f32 %v1725_v17, %v5386_v52  ;;  %v1835_v9 = vadd.f32 %v1834_v30, %v1722_v41  ;;  %3001 = vmatprep.mubr.bf16.mxu0 %v2536_v29 }
 0x16c   :  { %v1727_v40 = vpop.f32.mrf.mxu0  ;;  %3002 = vmatmul.mubr.bf16.gmra.mxu0 %v2535_v36  ;;  %v2484_v36 = vsel %vm2356_vm11, %v1831_v57, %v2420_v45 }
 0x16d   :  { %v1840_v31 = vpop.f32.mrf.mxu1  ;;  %v2487_v4 = vsel %vm2359_vm10, %v1833_v35, %v2423_v51  ;;  %v1839_v54 = vadd.f32 %v1838_v18, %v1726_v26  ;;  %v1728_v12 = vadd.f32 %v1727_v40, %v5389_v7  ;;  %vm2360_vm12 = vcmp.ge.f32.partialorder %v1835_v9, 0.0 }
 0x16e   :  { %v2539_v21 = vpack.c.bf16 %v2487_v4, %v2483_v15  ;;  %v2424_v1 = vmul.f32 0.2, %v1835_v9  ;;  %v1729_v43 = vpop.f32.mrf.mxu0 }
 0x16f   :  { %v1842_v52 = vpop.f32.mrf.mxu1  ;;  %v1730_v60 = vadd.f32 %v1729_v43, %v5396_v33  ;;  %v2427_v3 = vmul.f32 0.2, %v1839_v54  ;;  %vm2363_vm13 = vcmp.ge.f32.partialorder %v1839_v54, 0.0  ;;  %v1841_v32 = vadd.f32 %v1840_v31, %v1728_v12 }
 0x170   :  { %v1731_v42 = vpop.f32.mrf.mxu0  ;;  %v2488_v37 = vsel %vm2360_vm12, %v1835_v9, %v2424_v1  ;;  %v1516_v33 = vadd.f32 %v5410_v27, %v5324_v38 }
 0x171   :  { %v1844_v59 = vpop.f32.mrf.mxu1  ;;  %v1843_v28 = vadd.f32 %v1842_v52, %v1730_v60  ;;  %v1732_v20 = vadd.f32 %v1731_v42, %v1619_v23  ;;  %v2540_v0 = vpack.c.bf16 %v2488_v37, %v2484_v36  ;;  %v2491_v10 = vsel %vm2363_vm13, %v1839_v54, %v2427_v3 }
 0x172   :  { %v1735_v7 = vpop.f32.mrf.mxu0  ;;  %v2428_v41 = vmul.f32 0.2, %v1841_v32  ;;  %vm2364_vm15 = vcmp.ge.f32.partialorder %v1841_v32, 0.0  ;;  %v1629_v27 = vadd.f32 %v5412_v44, %v1516_v33 }
 0x173   :  { %v1848_v56 = vpop.f32.mrf.mxu1  ;;  %vm2367_vm14 = vcmp.ge.f32.partialorder %v1843_v28, 0.0  ;;  %v2431_v46 = vmul.f32 0.2, %v1843_v28  ;;  %v1736_v30 = vadd.f32 %v1735_v7, %v5404_v2  ;;  %v1845_v19 = vadd.f32 %v1844_v59, %v1732_v20  ;;  %3011 = vmatprep.mubr.bf16.mxu0 %v2540_v0 }
 0x174   :  { %v1737_v35 = vpop.f32.mrf.mxu0  ;;  %3012 = vmatmul.mubr.bf16.gmra.mxu0 %v2539_v21  ;;  %v2492_v54 = vsel %vm2364_vm15, %v1841_v32, %v2428_v41 }
 0x175   :  { %v1850_v61 = vpop.f32.mrf.mxu1  ;;  %v2495_v17 = vsel %vm2367_vm14, %v1843_v28, %v2431_v46  ;;  %v1849_v18 = vadd.f32 %v1848_v56, %v1736_v30  ;;  %v1738_v57 = vadd.f32 %v1737_v35, %v5407_v22  ;;  %vm2368_vm0 = vcmp.ge.f32.partialorder %v1845_v19, 0.0 }
 0x176   :  { %v2543_v29 = vpack.c.bf16 %v2495_v17, %v2491_v10  ;;  %v2432_v51 = vmul.f32 0.2, %v1845_v19  ;;  %v1739_v26 = vpop.f32.mrf.mxu0 }
 0x177   :  { %v1852_v2 = vpop.f32.mrf.mxu1  ;;  %v1740_v55 = vadd.f32 %v1739_v26, %v5414_v62  ;;  %v2435_v15 = vmul.f32 0.2, %v1849_v18  ;;  %vm2371_vm1 = vcmp.ge.f32.partialorder %v1849_v18, 0.0  ;;  %v1851_v45 = vadd.f32 %v1850_v61, %v1738_v57 }
 0x178   :  { %v1741_v9 = vpop.f32.mrf.mxu0  ;;  %v2496_v31 = vsel %vm2368_vm0, %v1845_v19, %v2432_v51  ;;  %v1526_v62 = vadd.f32 %v5428_v16, %v5324_v38 }
 0x179   :  { %v1854_v40 = vpop.f32.mrf.mxu1  ;;  %v1853_v4 = vadd.f32 %v1852_v2, %v1740_v55  ;;  %v1742_v12 = vadd.f32 %v1741_v9, %v1629_v27  ;;  %v2544_v1 = vpack.c.bf16 %v2496_v31, %v2492_v54  ;;  %v2499_v44 = vsel %vm2371_vm1, %v1849_v18, %v2435_v15 }
 0x17a   :  { %v1745_v22 = vpop.f32.mrf.mxu0  ;;  %v2436_v42 = vmul.f32 0.2, %v1851_v45  ;;  %vm2372_vm3 = vcmp.ge.f32.partialorder %v1851_v45, 0.0  ;;  %v1639_v16 = vadd.f32 %v5430_v63, %v1526_v62 }
 0x17b   :  { %v1858_v21 = vpop.f32.mrf.mxu1  ;;  %vm2375_vm2 = vcmp.ge.f32.partialorder %v1853_v4, 0.0  ;;  %v2439_v43 = vmul.f32 0.2, %v1853_v4  ;;  %v1746_v52 = vadd.f32 %v1745_v22, %v5422_v25  ;;  %v1855_v60 = vadd.f32 %v1854_v40, %v1742_v12  ;;  %3021 = vmatprep.mubr.bf16.mxu0 %v2544_v1 }
 0x17c   :  { %v1747_v23 = vpop.f32.mrf.mxu0  ;;  %3022 = vmatmul.mubr.bf16.gmra.mxu0 %v2543_v29  ;;  %v2500_v19 = vsel %vm2372_vm3, %v1851_v45, %v2436_v42 }
 0x17d   :  { %v1860_v3 = vpop.f32.mrf.mxu1  ;;  %v2503_v59 = vsel %vm2375_vm2, %v1853_v4, %v2439_v43  ;;  %v1859_v37 = vadd.f32 %v1858_v21, %v1746_v52  ;;  %v1748_v32 = vadd.f32 %v1747_v23, %v5425_v58  ;;  %vm2376_vm4 = vcmp.ge.f32.partialorder %v1855_v60, 0.0 }
 0x17e   :  { %v2547_v28 = vpack.c.bf16 %v2503_v59, %v2499_v44  ;;  %v2440_v36 = vmul.f32 0.2, %v1855_v60  ;;  %v1749_v20 = vpop.f32.mrf.mxu0 }
 0x17f   :  { %v1862_v25 = vpop.f32.mrf.mxu1  ;;  %v1750_v7 = vadd.f32 %v1749_v20, %v5432_v5  ;;  %v2443_v56 = vmul.f32 0.2, %v1859_v37  ;;  %vm2379_vm5 = vcmp.ge.f32.partialorder %v1859_v37, 0.0  ;;  %v1861_v33 = vadd.f32 %v1860_v3, %v1748_v32 }
 0x180   :  { %v1751_v0 = vpop.f32.mrf.mxu0  ;;  %v2504_v30 = vsel %vm2376_vm4, %v1855_v60, %v2440_v36  ;;  %v1536_v5 = vadd.f32 %v5446_v48, %v5324_v38 }
 0x181   :  { %v1864_v46 = vpop.f32.mrf.mxu1  ;;  %v1863_v10 = vadd.f32 %v1862_v25, %v1750_v7  ;;  %v1752_v35 = vadd.f32 %v1751_v0, %v1639_v16  ;;  %v2548_v41 = vpack.c.bf16 %v2504_v30, %v2500_v19  ;;  %v2507_v63 = vsel %vm2379_vm5, %v1859_v37, %v2443_v56 }
 0x182   :  { %v1755_v58 = vpop.f32.mrf.mxu0  ;;  %v2444_v26 = vmul.f32 0.2, %v1861_v33  ;;  %vm2380_vm7 = vcmp.ge.f32.partialorder %v1861_v33, 0.0  ;;  %v1649_v48 = vadd.f32 %v5448_v49, %v1536_v5  ;;  %v1546_v49 = vadd.f32 %v5462_v53, %v5324_v38  ;;  %v4070_v53 = vld [vmem:[%s5855_s2] sm:$0xf] }
 0x183   :  { %v1868_v61 = vpop.f32.mrf.mxu1  ;;  %vm2383_vm6 = vcmp.ge.f32.partialorder %v1863_v10, 0.0  ;;  %v2447_v17 = vmul.f32 0.2, %v1863_v10  ;;  %v1756_v18 = vadd.f32 %v1755_v58, %v5440_v47  ;;  %v1865_v57 = vadd.f32 %v1864_v46, %v1752_v35  ;;  %3031 = vmatprep.mubr.bf16.mxu0 %v2548_v41 }
 0x184   :  { %v1757_v29 = vpop.f32.mrf.mxu0  ;;  %3032 = vmatmul.mubr.bf16.gmra.mxu0 %v2547_v28  ;;  %v2508_v1 = vsel %vm2380_vm7, %v1861_v33, %v2444_v26  ;;  %v424_v37 = vsub.s32 3, %v5299_v11 }
 0x185   :  { %v1870_v51 = vpop.f32.mrf.mxu1  ;;  %v2511_v2 = vsel %vm2383_vm6, %v1863_v10, %v2447_v17  ;;  %v1869_v55 = vadd.f32 %v1868_v61, %v1756_v18  ;;  %v1758_v27 = vadd.f32 %v1757_v29, %v5443_v8  ;;  %vm2384_vm8 = vcmp.ge.f32.partialorder %v1865_v57, 0.0 }
 0x186   :  { %v2551_v15 = vpack.c.bf16 %v2511_v2, %v2507_v63  ;;  %v2448_v9 = vmul.f32 0.2, %v1865_v57  ;;  %v1759_v40 = vpop.f32.mrf.mxu0  ;;  %v5525_v35 = vrot.slane %v4070_v53, %v424_v37 }
 0x187   :  { %v1872_v47 = vpop.f32.mrf.mxu1  ;;  %v1760_v31 = vadd.f32 %v1759_v40, %v5450_v14  ;;  %v2451_v45 = vmul.f32 0.2, %v1869_v55  ;;  %vm2387_vm9 = vcmp.ge.f32.partialorder %v1869_v55, 0.0  ;;  %v1871_v22 = vadd.f32 %v1870_v51, %v1758_v27 }
 0x188   :  { %v1761_v4 = vpop.f32.mrf.mxu0  ;;  %v2512_v12 = vsel %vm2384_vm8, %v1865_v57, %v2448_v9  ;;  %v420_v14 = vsub.s32 2, %v5299_v11  ;;  %v1659_v11 = vadd.f32 %v5464_v50, %v1546_v49 }
 0x189   :  { %v1874_v54 = vpop.f32.mrf.mxu1  ;;  %v1873_v21 = vadd.f32 %v1872_v47, %v1760_v31  ;;  %v1762_v43 = vadd.f32 %v1761_v4, %v1649_v48  ;;  %v2552_v62 = vpack.c.bf16 %v2512_v12, %v2508_v1  ;;  %v2515_v23 = vsel %vm2387_vm9, %v1869_v55, %v2451_v45 }
 0x18a   :  { %v1765_v8 = vpop.f32.mrf.mxu0  ;;  %v2452_v32 = vmul.f32 0.2, %v1871_v22  ;;  %vm2388_vm11 = vcmp.ge.f32.partialorder %v1871_v22, 0.0  ;;  %v5521_v56 = vrot.slane %v4070_v53, %v420_v14 }
 0x18b   :  { %v1878_v52 = vpop.f32.mrf.mxu1  ;;  %vm2391_vm10 = vcmp.ge.f32.partialorder %v1873_v21, 0.0  ;;  %v2455_v44 = vmul.f32 0.2, %v1873_v21  ;;  %v1766_v60 = vadd.f32 %v1765_v8, %v5456_v24  ;;  %v1875_v3 = vadd.f32 %v1874_v54, %v1762_v43  ;;  %3041 = vmatprep.mubr.bf16.mxu0 %v2552_v62 }
 0x18c   :  { %v1767_v42 = vpop.f32.mrf.mxu0  ;;  %3042 = vmatmul.mubr.bf16.gmra.mxu0 %v2551_v15  ;;  %v2516_v19 = vsel %vm2388_vm11, %v1871_v22, %v2452_v32 }
 0x18d   :  { %v1880_v59 = vpop.f32.mrf.mxu1  ;;  %v2519_v28 = vsel %vm2391_vm10, %v1873_v21, %v2455_v44  ;;  %v1879_v36 = vadd.f32 %v1878_v52, %v1766_v60  ;;  %v1768_v20 = vadd.f32 %v1767_v42, %v5459_v39  ;;  %vm2392_vm12 = vcmp.ge.f32.partialorder %v1875_v3, 0.0 }
 0x18e   :  { %v2555_v24 = vpack.c.bf16 %v2519_v28, %v2515_v23  ;;  %v2456_v25 = vmul.f32 0.2, %v1875_v3  ;;  %v1769_v7 = vpop.f32.mrf.mxu0 }
 0x18f   :  { %v1882_v16 = vpop.f32.mrf.mxu1  ;;  %v1770_v38 = vadd.f32 %v1769_v7, %v5466_v13  ;;  %v2459_v0 = vmul.f32 0.2, %v1879_v36  ;;  %v1881_v46 = vadd.f32 %v1880_v59, %v1768_v20  ;;  %vm2395_vm13 = vcmp.ge.f32.partialorder %v1879_v36, 0.0 }
 0x190   :  { %v1771_v30 = vpop.f32.mrf.mxu0  ;;  %v2520_v33 = vsel %vm2392_vm12, %v1875_v3, %v2456_v25 }
 0x191   :  { %v1884_v39 = vpop.f32.mrf.mxu1  ;;  %v1883_v10 = vadd.f32 %v1882_v16, %v1770_v38  ;;  %v1772_v13 = vadd.f32 %v1771_v30, %v1659_v11  ;;  %v2556_v41 = vpack.c.bf16 %v2520_v33, %v2516_v19  ;;  %v2523_v50 = vsel %vm2395_vm13, %v1879_v36, %v2459_v0 }
 0x192   :  { %v1921_v58 = vpop.f32.mrf.mxu0  ;;  %v2460_v5 = vmul.f32 0.2, %v1881_v46  ;;  %vm2396_vm15 = vcmp.ge.f32.partialorder %v1881_v46, 0.0 }
 0x193   :  { %v2034_v61 = vpop.f32.mrf.mxu1  ;;  %vm2399_vm14 = vcmp.ge.f32.partialorder %v1883_v10, 0.0  ;;  %v2463_v17 = vmul.f32 0.2, %v1883_v10  ;;  %v1922_v18 = vadd.f32 %v1921_v58, %v5521_v56  ;;  %v1885_v63 = vadd.f32 %v1884_v39, %v1772_v13  ;;  %3051 = vmatprep.mubr.bf16.mxu0 %v2556_v41 }
 0x194   :  { %v1923_v57 = vpop.f32.mrf.mxu0  ;;  %3052 = vmatmul.mubr.bf16.gmra.mxu0 %v2555_v24  ;;  %v2524_v45 = vsel %vm2396_vm15, %v1881_v46, %v2460_v5 }
 0x195   :  { %v2036_v29 = vpop.f32.mrf.mxu1  ;;  %v2527_v51 = vsel %vm2399_vm14, %v1883_v10, %v2463_v17  ;;  %v5528_v26 = vadd.f32 %v2034_v61, %v1922_v18  ;;  %v1924_v2 = vadd.f32 %v1923_v57, %v5525_v35  ;;  %vm2400_vm0 = vcmp.ge.f32.partialorder %v1885_v63, 0.0 }
 0x196   :  { %v2559_v55 = vpack.c.bf16 %v2527_v51, %v2523_v50  ;;  %v2464_v27 = vmul.f32 0.2, %v1885_v63  ;;  %v1925_v15 = vpop.f32.mrf.mxu0 }
 0x197   :  { %v2038_v9 = vpop.f32.mrf.mxu1  ;;  %v5531_v40 = vadd.f32 %v2036_v29, %v1924_v2  ;;  %v1926_v47 = vadd.f32 %v1925_v15, %v5521_v56 }
 0x198   :  { %v5534_v31 = vpop.f32.mrf.mxu0  ;;  %v2528_v4 = vsel %vm2400_vm0, %v1885_v63, %v2464_v27 }
 0x199   :  { %v5536_v48 = vpop.f32.mrf.mxu1  ;;  %v5538_v54 = vadd.f32 %v2038_v9, %v1926_v47  ;;  %v2560_v12 = vpack.c.bf16 %v2528_v4, %v2524_v45 }
 0x19a   :  { %v1931_v22 = vpop.f32.mrf.mxu0 }
 0x19b   :  { %v2044_v21 = vpop.f32.mrf.mxu1  ;;  %v1932_v1 = vadd.f32 %v1931_v22, %v5521_v56  ;;  %3061 = vmatprep.mubr.bf16.mxu0 %v2560_v12 }
 0x19c   :  { %v1933_v43 = vpop.f32.mrf.mxu0  ;;  %3062 = vmatmul.mubr.bf16.gmra.mxu0 %v2559_v55 }
 0x19d   :  { %v2046_v8 = vpop.f32.mrf.mxu1  ;;  %v5541_v52 = vadd.f32 %v2044_v21, %v1932_v1  ;;  %v1934_v62 = vadd.f32 %v1933_v43, %v5525_v35 }
 0x19e   :  { %v1935_v44 = vpop.f32.mrf.mxu0 }
 0x19f   :  { %v2048_v60 = vpop.f32.mrf.mxu1  ;;  %v5544_v14 = vadd.f32 %v2046_v8, %v1934_v62  ;;  %v1936_v49 = vadd.f32 %v1935_v44, %v5521_v56 }
 0x1a0   :  { %v5547_v23 = vpop.f32.mrf.mxu0 }
 0x1a1   :  { %v5549_v3 = vpop.f32.mrf.mxu1  ;;  %v5551_v42 = vadd.f32 %v2048_v60, %v1936_v49 }
 0x1a2   :  { %v1941_v59 = vpop.f32.mrf.mxu0 }
 0x1a3   :  { %v2054_v37 = vpop.f32.mrf.mxu1  ;;  %v1942_v32 = vadd.f32 %v1941_v59, %v5521_v56 }
 0x1a4   :  { %v1943_v28 = vpop.f32.mrf.mxu0 }
 0x1a5   :  { %v2056_v36 = vpop.f32.mrf.mxu1  ;;  %v5554_v20 = vadd.f32 %v2054_v37, %v1942_v32  ;;  %v1944_v24 = vadd.f32 %v1943_v28, %v5525_v35 }
 0x1a6   :  { %v1945_v25 = vpop.f32.mrf.mxu0 }
 0x1a7   :  { %v2058_v7 = vpop.f32.mrf.mxu1  ;;  %v5557_v16 = vadd.f32 %v2056_v36, %v1944_v24  ;;  %v1946_v38 = vadd.f32 %v1945_v25, %v5521_v56 }
 0x1a8   :  { %v5560_v53 = vpop.f32.mrf.mxu0 }
 0x1a9   :  { %v5562_v11 = vpop.f32.mrf.mxu1  ;;  %v5564_v0 = vadd.f32 %v2058_v7, %v1946_v38 }
 0x1aa   :  { %v1951_v46 = vpop.f32.mrf.mxu0 }
 0x1ab   :  { %v2064_v30 = vpop.f32.mrf.mxu1  ;;  %v1952_v39 = vadd.f32 %v1951_v46, %v5521_v56 }
 0x1ac   :  { %v1953_v33 = vpop.f32.mrf.mxu0 }
 0x1ad   :  { %v2066_v10 = vpop.f32.mrf.mxu1  ;;  %v5567_v19 = vadd.f32 %v2064_v30, %v1952_v39  ;;  %v1954_v13 = vadd.f32 %v1953_v33, %v5525_v35 }
 0x1ae   :  { %v1955_v58 = vpop.f32.mrf.mxu0 }
 0x1af   :  { %v2068_v61 = vpop.f32.mrf.mxu1  ;;  %v5570_v41 = vadd.f32 %v2066_v10, %v1954_v13  ;;  %v1956_v17 = vadd.f32 %v1955_v58, %v5521_v56 }
 0x1b0   :  { %v5573_v18 = vpop.f32.mrf.mxu0 }
 0x1b1   :  { %v5575_v50 = vpop.f32.mrf.mxu1  ;;  %v5577_v5 = vadd.f32 %v2068_v61, %v1956_v17 }
 0x1b2   :  { %v1961_v63 = vpop.f32.mrf.mxu0 }
 0x1b3   :  { %v2074_v57 = vpop.f32.mrf.mxu1  ;;  %v1962_v29 = vadd.f32 %v1961_v63, %v5521_v56 }
 0x1b4   :  { %v1963_v51 = vpop.f32.mrf.mxu0 }
 0x1b5   :  { %v2076_v2 = vpop.f32.mrf.mxu1  ;;  %v5580_v55 = vadd.f32 %v2074_v57, %v1962_v29  ;;  %v1964_v27 = vadd.f32 %v1963_v51, %v5525_v35 }
 0x1b6   :  { %v1965_v15 = vpop.f32.mrf.mxu0 }
 0x1b7   :  { %v2078_v9 = vpop.f32.mrf.mxu1  ;;  %v5583_v47 = vadd.f32 %v2076_v2, %v1964_v27  ;;  %v1966_v45 = vadd.f32 %v1965_v15, %v5521_v56 }
 0x1b8   :  { %v5586_v4 = vpop.f32.mrf.mxu0 }
 0x1b9   :  { %v5588_v12 = vpop.f32.mrf.mxu1  ;;  %v5590_v22 = vadd.f32 %v2078_v9, %v1966_v45 }
 0x1ba   :  { %v1971_v21 = vpop.f32.mrf.mxu0 }
 0x1bb   :  { %v2084_v1 = vpop.f32.mrf.mxu1  ;;  %v1972_v43 = vadd.f32 %v1971_v21, %v5521_v56 }
 0x1bc   :  { %v1973_v8 = vpop.f32.mrf.mxu0 }
 0x1bd   :  { %v2086_v62 = vpop.f32.mrf.mxu1  ;;  %v5593_v44 = vadd.f32 %v2084_v1, %v1972_v43  ;;  %v1974_v60 = vadd.f32 %v1973_v8, %v5525_v35 }
 0x1be   :  { %v1975_v49 = vpop.f32.mrf.mxu0 }
 0x1bf   :  { %v2088_v59 = vpop.f32.mrf.mxu1  ;;  %v5596_v37 = vadd.f32 %v2086_v62, %v1974_v60  ;;  %v1976_v32 = vadd.f32 %v1975_v49, %v5521_v56 }
 0x1c0   :  { %v5599_v28 = vpop.f32.mrf.mxu0 }
 0x1c1   :  { %v5601_v36 = vpop.f32.mrf.mxu1  ;;  %v5603_v24 = vadd.f32 %v2088_v59, %v1976_v32 }
 0x1c2   :  { %v1981_v25 = vpop.f32.mrf.mxu0 }
 0x1c3   :  { %v2094_v7 = vpop.f32.mrf.mxu1  ;;  %v1982_v38 = vadd.f32 %v1981_v25, %v5521_v56 }
 0x1c4   :  { %v1983_v46 = vpop.f32.mrf.mxu0 }
 0x1c5   :  { %v2096_v30 = vpop.f32.mrf.mxu1  ;;  %v5606_v39 = vadd.f32 %v2094_v7, %v1982_v38  ;;  %v1984_v33 = vadd.f32 %v1983_v46, %v5525_v35  ;;  %v1928_v7 = vadd.f32 %v5534_v31, %v5525_v35 }
 0x1c6   :  { %v1985_v10 = vpop.f32.mrf.mxu0 }
 0x1c7   :  { %v2098_v13 = vpop.f32.mrf.mxu1  ;;  %v5609_v58 = vadd.f32 %v2096_v30, %v1984_v33  ;;  %v1986_v61 = vadd.f32 %v1985_v10, %v5521_v56 }
 0x1c8   :  { %v5612_v17 = vpop.f32.mrf.mxu0 }
 0x1c9   :  { %v5614_v63 = vpop.f32.mrf.mxu1  ;;  %v5616_v57 = vadd.f32 %v2098_v13, %v1986_v61  ;;  %v2041_v61 = vadd.f32 %v5536_v48, %v1928_v7 }
 0x1ca   :  { %v1991_v29 = vpop.f32.mrf.mxu0 }
 0x1cb   :  { %v2104_v51 = vpop.f32.mrf.mxu1  ;;  %v1992_v2 = vadd.f32 %v1991_v29, %v5521_v56 }
 0x1cc   :  { %v1993_v27 = vpop.f32.mrf.mxu0 }
 0x1cd   :  { %v2106_v15 = vpop.f32.mrf.mxu1  ;;  %v5619_v9 = vadd.f32 %v2104_v51, %v1992_v2  ;;  %v1994_v45 = vadd.f32 %v1993_v27, %v5525_v35 }
 0x1ce   :  { %v1995_v21 = vpop.f32.mrf.mxu0 }
 0x1cf   :  { %v2108_v1 = vpop.f32.mrf.mxu1  ;;  %v5622_v43 = vadd.f32 %v2106_v15, %v1994_v45  ;;  %v1996_v8 = vadd.f32 %v1995_v21, %v5521_v56 }
 0x1d0   :  { %v5625_v62 = vpop.f32.mrf.mxu0 }
 0x1d1   :  { %v5627_v60 = vpop.f32.mrf.mxu1  ;;  %v5629_v49 = vadd.f32 %v2108_v1, %v1996_v8 }
 0x1d2   :  { %v2147_v59 = vpop.f32.mrf.mxu0 }
 0x1d3   :  { %v2260_v32 = vpop.f32.mrf.mxu1  ;;  %v2148_v25 = vadd.f32 %v2147_v59, %v5528_v26 }
 0x1d4   :  { %v2149_v38 = vpop.f32.mrf.mxu0 }
 0x1d5   :  { %v2262_v46 = vpop.f32.mrf.mxu1  ;;  %v2261_v30 = vadd.f32 %v2260_v32, %v2148_v25  ;;  %v2150_v33 = vadd.f32 %v2149_v38, %v5531_v40  ;;  %v1938_v40 = vadd.f32 %v5547_v23, %v5525_v35 }
 0x1d6   :  { %v2151_v10 = vpop.f32.mrf.mxu0 }
 0x1d7   :  { %v2264_v56 = vpop.f32.mrf.mxu1  ;;  %v2152_v13 = vadd.f32 %v2151_v10, %v5538_v54  ;;  %v2405_v29 = vmul.f32 0.2, %v2261_v30  ;;  %vm2341_vm1 = vcmp.ge.f32.partialorder %v2261_v30, 0.0  ;;  %v2263_v27 = vadd.f32 %v2262_v46, %v2150_v33 }
 0x1d8   :  { %v2153_v51 = vpop.f32.mrf.mxu0 }
 0x1d9   :  { %v2266_v2 = vpop.f32.mrf.mxu1  ;;  %v2265_v26 = vadd.f32 %v2264_v56, %v2152_v13  ;;  %v2154_v15 = vadd.f32 %v2153_v51, %v2041_v61  ;;  %v2469_v8 = vsel %vm2341_vm1, %v2261_v30, %v2405_v29  ;;  %v2406_v32 = vmul.f32 0.2, %v2263_v27 }
 0x1da   :  { %v2157_v45 = vpop.f32.mrf.mxu0  ;;  %vm2342_vm3 = vcmp.ge.f32.partialorder %v2263_v27, 0.0  ;;  %v2051_v13 = vadd.f32 %v5549_v3, %v1938_v40 }
 0x1db   :  { %v2270_v31 = vpop.f32.mrf.mxu1  ;;  %vm2345_vm2 = vcmp.ge.f32.partialorder %v2265_v26, 0.0  ;;  %v2409_v21 = vmul.f32 0.2, %v2265_v26  ;;  %v2158_v1 = vadd.f32 %v2157_v45, %v5541_v52  ;;  %v2267_v54 = vadd.f32 %v2266_v2, %v2154_v15 }
 0x1dc   :  { %v2159_v59 = vpop.f32.mrf.mxu0 }
 0x1dd   :  { %v2272_v48 = vpop.f32.mrf.mxu1  ;;  %v2473_v25 = vsel %vm2345_vm2, %v2265_v26, %v2409_v21  ;;  %v2271_v7 = vadd.f32 %v2270_v31, %v2158_v1  ;;  %v2160_v38 = vadd.f32 %v2159_v59, %v5544_v14  ;;  %vm2346_vm4 = vcmp.ge.f32.partialorder %v2267_v54, 0.0 }
 0x1de   :  { %v2533_v46 = vpack.c.bf16 %v2473_v25, %v2469_v8  ;;  %v2410_v33 = vmul.f32 0.2, %v2267_v54  ;;  %v2161_v10 = vpop.f32.mrf.mxu0  ;;  %v2470_v26 = vsel %vm2342_vm3, %v2263_v27, %v2406_v32 }
 0x1df   :  { %v2274_v56 = vpop.f32.mrf.mxu1  ;;  %v2162_v52 = vadd.f32 %v2161_v10, %v5551_v42  ;;  %v2413_v23 = vmul.f32 0.2, %v2271_v7  ;;  %vm2349_vm5 = vcmp.ge.f32.partialorder %v2271_v7, 0.0  ;;  %v2273_v51 = vadd.f32 %v2272_v48, %v2160_v38 }
 0x1e0   :  { %v2163_v30 = vpop.f32.mrf.mxu0  ;;  %v2474_v29 = vsel %vm2346_vm4, %v2267_v54, %v2410_v33  ;;  %v1948_v42 = vadd.f32 %v5560_v53, %v5525_v35 }
 0x1e1   :  { %v2276_v61 = vpop.f32.mrf.mxu1  ;;  %v2275_v2 = vadd.f32 %v2274_v56, %v2162_v52  ;;  %v2164_v15 = vadd.f32 %v2163_v30, %v2051_v13  ;;  %v2534_v31 = vpack.c.bf16 %v2474_v29, %v2470_v26  ;;  %v2477_v3 = vsel %vm2349_vm5, %v2271_v7, %v2413_v23 }
 0x1e2   :  { %v2167_v14 = vpop.f32.mrf.mxu0  ;;  %v2414_v59 = vmul.f32 0.2, %v2273_v51  ;;  %vm2350_vm7 = vcmp.ge.f32.partialorder %v2273_v51, 0.0  ;;  %v2061_v53 = vadd.f32 %v5562_v11, %v1948_v42 }
 0x1e3   :  { %v2280_v45 = vpop.f32.mrf.mxu1  ;;  %vm2353_vm6 = vcmp.ge.f32.partialorder %v2275_v2, 0.0  ;;  %v2417_v21 = vmul.f32 0.2, %v2275_v2  ;;  %v2168_v1 = vadd.f32 %v2167_v14, %v5554_v20  ;;  %v2277_v40 = vadd.f32 %v2276_v61, %v2164_v15  ;;  %3104 = vmatprep.mubr.bf16.mxu1 %v2534_v31 }
 0x1e4   :  { %v2169_v8 = vpop.f32.mrf.mxu0  ;;  %3105 = vmatmul.mubr.bf16.vlgmr.msra.gmra.mxu1 %v2533_v46  ;;  %v2478_v46 = vsel %vm2350_vm7, %v2273_v51, %v2414_v59 }
 0x1e5   :  { %v2282_v54 = vpop.f32.mrf.mxu1  ;;  %v2481_v48 = vsel %vm2353_vm6, %v2275_v2, %v2417_v21  ;;  %v2281_v25 = vadd.f32 %v2280_v45, %v2168_v1  ;;  %v2170_v27 = vadd.f32 %v2169_v8, %v5557_v16  ;;  %vm2354_vm8 = vcmp.ge.f32.partialorder %v2277_v40, 0.0 }
 0x1e6   :  { %v2537_v32 = vpack.c.bf16 %v2481_v48, %v2477_v3  ;;  %v2418_v38 = vmul.f32 0.2, %v2277_v40  ;;  %v2171_v33 = vpop.f32.mrf.mxu0 }
 0x1e7   :  { %v2284_v20 = vpop.f32.mrf.mxu1  ;;  %v2172_v10 = vadd.f32 %v2171_v33, %v5564_v0  ;;  %v2421_v7 = vmul.f32 0.2, %v2281_v25  ;;  %vm2357_vm9 = vcmp.ge.f32.partialorder %v2281_v25, 0.0  ;;  %v2283_v23 = vadd.f32 %v2282_v54, %v2170_v27 }
 0x1e8   :  { %v2173_v56 = vpop.f32.mrf.mxu0  ;;  %v2482_v13 = vsel %vm2354_vm8, %v2277_v40, %v2418_v38  ;;  %v1958_v0 = vadd.f32 %v5573_v18, %v5525_v35 }
 0x1e9   :  { %v2286_v52 = vpop.f32.mrf.mxu1  ;;  %v2285_v30 = vadd.f32 %v2284_v20, %v2172_v10  ;;  %v2174_v61 = vadd.f32 %v2173_v56, %v2061_v53  ;;  %v2538_v2 = vpack.c.bf16 %v2482_v13, %v2478_v46  ;;  %v2485_v11 = vsel %vm2357_vm9, %v2281_v25, %v2421_v7 }
 0x1ea   :  { %v2177_v16 = vpop.f32.mrf.mxu0  ;;  %v2422_v21 = vmul.f32 0.2, %v2283_v23  ;;  %vm2358_vm11 = vcmp.ge.f32.partialorder %v2283_v23, 0.0  ;;  %v2071_v18 = vadd.f32 %v5575_v50, %v1958_v0 }
 0x1eb   :  { %v2290_v29 = vpop.f32.mrf.mxu1  ;;  %vm2361_vm10 = vcmp.ge.f32.partialorder %v2285_v30, 0.0  ;;  %v2425_v26 = vmul.f32 0.2, %v2285_v30  ;;  %v2178_v15 = vadd.f32 %v2177_v16, %v5567_v19  ;;  %v2287_v14 = vadd.f32 %v2286_v52, %v2174_v61  ;;  %3114 = vmatprep.mubr.bf16.mxu1 %v2538_v2 }
 0x1ec   :  { %v2179_v45 = vpop.f32.mrf.mxu0  ;;  %3115 = vmatmul.mubr.bf16.gmra.mxu1 %v2537_v32  ;;  %v2486_v32 = vsel %vm2358_vm11, %v2283_v23, %v2422_v21 }
 0x1ed   :  { %v2292_v31 = vpop.f32.mrf.mxu1  ;;  %v2489_v1 = vsel %vm2361_vm10, %v2285_v30, %v2425_v26  ;;  %v2291_v42 = vadd.f32 %v2290_v29, %v2178_v15  ;;  %v2180_v51 = vadd.f32 %v2179_v45, %v5570_v41  ;;  %vm2362_vm12 = vcmp.ge.f32.partialorder %v2287_v14, 0.0 }
 0x1ee   :  { %v2541_v3 = vpack.c.bf16 %v2489_v1, %v2485_v11  ;;  %v2426_v40 = vmul.f32 0.2, %v2287_v14  ;;  %v2181_v8 = vpop.f32.mrf.mxu0 }
 0x1ef   :  { %v2294_v19 = vpop.f32.mrf.mxu1  ;;  %v2182_v54 = vadd.f32 %v2181_v8, %v5577_v5  ;;  %v2429_v59 = vmul.f32 0.2, %v2291_v42  ;;  %vm2365_vm13 = vcmp.ge.f32.partialorder %v2291_v42, 0.0  ;;  %v2293_v38 = vadd.f32 %v2292_v31, %v2180_v51 }
 0x1f0   :  { %v2183_v48 = vpop.f32.mrf.mxu0  ;;  %v2490_v27 = vsel %vm2362_vm12, %v2287_v14, %v2426_v40  ;;  %v1968_v5 = vadd.f32 %v5586_v4, %v5525_v35 }
 0x1f1   :  { %v2296_v25 = vpop.f32.mrf.mxu1  ;;  %v2295_v33 = vadd.f32 %v2294_v19, %v2182_v54  ;;  %v2184_v20 = vadd.f32 %v2183_v48, %v2071_v18  ;;  %v2542_v53 = vpack.c.bf16 %v2490_v27, %v2486_v32  ;;  %v2493_v50 = vsel %vm2365_vm13, %v2291_v42, %v2429_v59 }
 0x1f2   :  { %v2187_v41 = vpop.f32.mrf.mxu0  ;;  %v2430_v46 = vmul.f32 0.2, %v2293_v38  ;;  %vm2366_vm15 = vcmp.ge.f32.partialorder %v2293_v38, 0.0  ;;  %v2081_v4 = vadd.f32 %v5588_v12, %v1968_v5 }
 0x1f3   :  { %v2300_v10 = vpop.f32.mrf.mxu1  ;;  %vm2369_vm14 = vcmp.ge.f32.partialorder %v2295_v33, 0.0  ;;  %v2433_v7 = vmul.f32 0.2, %v2295_v33  ;;  %v2188_v56 = vadd.f32 %v2187_v41, %v5580_v55  ;;  %v2297_v52 = vadd.f32 %v2296_v25, %v2184_v20  ;;  %3124 = vmatprep.mubr.bf16.mxu1 %v2542_v53 }
 0x1f4   :  { %v2189_v13 = vpop.f32.mrf.mxu0  ;;  %3125 = vmatmul.mubr.bf16.gmra.mxu1 %v2541_v3  ;;  %v2494_v1 = vsel %vm2366_vm15, %v2293_v38, %v2430_v46 }
 0x1f5   :  { %v2302_v30 = vpop.f32.mrf.mxu1  ;;  %v2497_v61 = vsel %vm2369_vm14, %v2295_v33, %v2433_v7  ;;  %v2301_v16 = vadd.f32 %v2300_v10, %v2188_v56  ;;  %v2190_v23 = vadd.f32 %v2189_v13, %v5583_v47  ;;  %vm2370_vm0 = vcmp.ge.f32.partialorder %v2297_v52, 0.0 }
 0x1f6   :  { %v2545_v29 = vpack.c.bf16 %v2497_v61, %v2493_v50  ;;  %v2434_v2 = vmul.f32 0.2, %v2297_v52  ;;  %v2191_v26 = vpop.f32.mrf.mxu0 }
 0x1f7   :  { %v2304_v55 = vpop.f32.mrf.mxu1  ;;  %v2192_v15 = vadd.f32 %v2191_v26, %v5590_v22  ;;  %v2437_v0 = vmul.f32 0.2, %v2301_v16  ;;  %vm2373_vm1 = vcmp.ge.f32.partialorder %v2301_v16, 0.0  ;;  %v2303_v31 = vadd.f32 %v2302_v30, %v2190_v23 }
 0x1f8   :  { %v2193_v11 = vpop.f32.mrf.mxu0  ;;  %v2498_v45 = vsel %vm2370_vm0, %v2297_v52, %v2434_v2  ;;  %v1978_v22 = vadd.f32 %v5599_v28, %v5525_v35 }
 0x1f9   :  { %v2306_v14 = vpop.f32.mrf.mxu1  ;;  %v2305_v21 = vadd.f32 %v2304_v55, %v2192_v15  ;;  %v2194_v42 = vadd.f32 %v2193_v11, %v2081_v4  ;;  %v2546_v3 = vpack.c.bf16 %v2498_v45, %v2494_v1  ;;  %v2501_v12 = vsel %vm2373_vm1, %v2301_v16, %v2437_v0 }
 0x1fa   :  { %v2197_v47 = vpop.f32.mrf.mxu0  ;;  %v2438_v59 = vmul.f32 0.2, %v2303_v31  ;;  %vm2374_vm3 = vcmp.ge.f32.partialorder %v2303_v31, 0.0  ;;  %v2091_v28 = vadd.f32 %v5601_v36, %v1978_v22 }
 0x1fb   :  { %v2310_v51 = vpop.f32.mrf.mxu1  ;;  %vm2377_vm2 = vcmp.ge.f32.partialorder %v2305_v21, 0.0  ;;  %v2441_v40 = vmul.f32 0.2, %v2305_v21  ;;  %v2198_v8 = vadd.f32 %v2197_v47, %v5593_v44  ;;  %v2307_v19 = vadd.f32 %v2306_v14, %v2194_v42  ;;  %3134 = vmatprep.mubr.bf16.mxu1 %v2546_v3 }
 0x1fc   :  { %v2199_v54 = vpop.f32.mrf.mxu0  ;;  %3135 = vmatmul.mubr.bf16.gmra.mxu1 %v2545_v29  ;;  %v2502_v50 = vsel %vm2374_vm3, %v2303_v31, %v2438_v59 }
 0x1fd   :  { %v2312_v18 = vpop.f32.mrf.mxu1  ;;  %v2505_v48 = vsel %vm2377_vm2, %v2305_v21, %v2441_v40  ;;  %v2311_v25 = vadd.f32 %v2310_v51, %v2198_v8  ;;  %v2200_v27 = vadd.f32 %v2199_v54, %v5596_v37  ;;  %vm2378_vm4 = vcmp.ge.f32.partialorder %v2307_v19, 0.0 }
 0x1fe   :  { %v2549_v38 = vpack.c.bf16 %v2505_v48, %v2501_v12  ;;  %v2442_v33 = vmul.f32 0.2, %v2307_v19  ;;  %v2201_v32 = vpop.f32.mrf.mxu0 }
 0x1ff   :  { %v2314_v44 = vpop.f32.mrf.mxu1  ;;  %v2202_v20 = vadd.f32 %v2201_v32, %v5603_v24  ;;  %v2445_v41 = vmul.f32 0.2, %v2311_v25  ;;  %vm2381_vm5 = vcmp.ge.f32.partialorder %v2311_v25, 0.0  ;;  %v2313_v56 = vadd.f32 %v2312_v18, %v2200_v27 }
 0x200   :  { %v2203_v10 = vpop.f32.mrf.mxu0  ;;  %v2506_v7 = vsel %vm2378_vm4, %v2307_v19, %v2442_v33  ;;  %v1988_v24 = vadd.f32 %v5612_v17, %v5525_v35 }
 0x201   :  { %v2316_v53 = vpop.f32.mrf.mxu1  ;;  %v2315_v5 = vadd.f32 %v2314_v44, %v2202_v20  ;;  %v2204_v52 = vadd.f32 %v2203_v10, %v2091_v28  ;;  %v2550_v30 = vpack.c.bf16 %v2506_v7, %v2502_v50  ;;  %v2509_v36 = vsel %vm2381_vm5, %v2311_v25, %v2445_v41 }
 0x202   :  { %v2207_v37 = vpop.f32.mrf.mxu0  ;;  %v2446_v2 = vmul.f32 0.2, %v2313_v56  ;;  %vm2382_vm7 = vcmp.ge.f32.partialorder %v2313_v56, 0.0  ;;  %v2101_v17 = vadd.f32 %v5614_v63, %v1988_v24 }
 0x203   :  { %v2320_v13 = vpop.f32.mrf.mxu1  ;;  %vm2385_vm6 = vcmp.ge.f32.partialorder %v2315_v5, 0.0  ;;  %v2449_v46 = vmul.f32 0.2, %v2315_v5  ;;  %v2208_v61 = vadd.f32 %v2207_v37, %v5606_v39  ;;  %v2317_v16 = vadd.f32 %v2316_v53, %v2204_v52  ;;  %3144 = vmatprep.mubr.bf16.mxu1 %v2550_v30 }
 0x204   :  { %v2209_v23 = vpop.f32.mrf.mxu0  ;;  %3145 = vmatmul.mubr.bf16.gmra.mxu1 %v2549_v38  ;;  %v2510_v51 = vsel %vm2382_vm7, %v2313_v56, %v2446_v2 }
 0x205   :  { %v2322_v29 = vpop.f32.mrf.mxu1  ;;  %v2513_v26 = vsel %vm2385_vm6, %v2315_v5, %v2449_v46  ;;  %v2321_v55 = vadd.f32 %v2320_v13, %v2208_v61  ;;  %v2210_v15 = vadd.f32 %v2209_v23, %v5609_v58  ;;  %vm2386_vm8 = vcmp.ge.f32.partialorder %v2317_v16, 0.0 }
 0x206   :  { %v2553_v4 = vpack.c.bf16 %v2513_v26, %v2509_v36  ;;  %v2450_v0 = vmul.f32 0.2, %v2317_v16  ;;  %v2211_v11 = vpop.f32.mrf.mxu0 }
 0x207   :  { %v2324_v39 = vpop.f32.mrf.mxu1  ;;  %v2212_v14 = vadd.f32 %v2211_v11, %v5616_v57  ;;  %v2453_v45 = vmul.f32 0.2, %v2321_v55  ;;  %vm2389_vm9 = vcmp.ge.f32.partialorder %v2321_v55, 0.0  ;;  %v2323_v42 = vadd.f32 %v2322_v29, %v2210_v15 }
 0x208   :  { %v2213_v31 = vpop.f32.mrf.mxu0  ;;  %v2514_v1 = vsel %vm2386_vm8, %v2317_v16, %v2450_v0  ;;  %v1998_v57 = vadd.f32 %v5625_v62, %v5525_v35 }
 0x209   :  { %v2326_v21 = vpop.f32.mrf.mxu1  ;;  %v2325_v47 = vadd.f32 %v2324_v39, %v2212_v14  ;;  %v2214_v3 = vadd.f32 %v2213_v31, %v2101_v17  ;;  %v2554_v8 = vpack.c.bf16 %v2514_v1, %v2510_v51  ;;  %v2517_v63 = vsel %vm2389_vm9, %v2321_v55, %v2453_v45  ;;  %v2627_v45 = vld [vmem:[%s5857_s4] sm:$0x3]  ;;  %s4119_s4 = smov [#allocation6]  }
 0x20a   :  { %v2217_v58 = vpop.f32.mrf.mxu0  ;;  %v2454_v59 = vmul.f32 0.2, %v2323_v42  ;;  %vm2390_vm11 = vcmp.ge.f32.partialorder %v2323_v42, 0.0  ;;  %v2111_v35 = vadd.f32 %v5627_v60, %v1998_v57  ;;  %v5688_v1 = vrot.slane %v2627_v45, %v5318_v34 }
 0x20b   :  { %v2330_v40 = vpop.f32.mrf.mxu1  ;;  %vm2393_vm10 = vcmp.ge.f32.partialorder %v2325_v47, 0.0  ;;  %v2457_v22 = vmul.f32 0.2, %v2325_v47  ;;  %v2218_v12 = vadd.f32 %v2217_v58, %v5619_v9  ;;  %v2327_v19 = vadd.f32 %v2326_v21, %v2214_v3  ;;  %3154 = vmatprep.mubr.bf16.mxu1 %v2554_v8  ;;  %v5696_v3 = vld [vmem:[%s5858_s5] sm:$0x3]  ;;  %s3385_s5 = sshll.u32 %s4119_s4, 4  ;;  %s3386_s5 = int_to_ptr.vmem [resolvable:$true] %s3385_s5 }
 0x20c   :  { %v2219_v54 = vpop.f32.mrf.mxu0  ;;  %3155 = vmatmul.mubr.bf16.gmra.mxu1 %v2553_v4  ;;  %v2518_v53 = vsel %vm2390_vm11, %v2323_v42, %v2454_v59  ;;  %v5685_v21 = vrot.slane %v2627_v45, %v5311_v6  ;;  %5886 = vst [vmem:[#allocation9_spill] sm:$0xff] %v5696_v3  ;;  %v3300_v8 = vrot.slane %v5696_v3, %v5318_v34  ;;  %s4091_s26 = scalar_lea.vmem %s3386_s5, 16  ;;  %s4095_s27 = scalar_lea.vmem %s3386_s5, 32 }
 0x20d   :  { %v2332_v18 = vpop.f32.mrf.mxu1  ;;  %v2521_v48 = vsel %vm2393_vm10, %v2325_v47, %v2457_v22  ;;  %v2331_v25 = vadd.f32 %v2330_v40, %v2218_v12  ;;  %v2220_v27 = vadd.f32 %v2219_v54, %v5622_v43  ;;  %vm2394_vm12 = vcmp.ge.f32.partialorder %v2327_v19, 0.0  ;;  %v3282_v54 = vld [vmem:[#allocation2] sm:$0x1]  ;;  %p4092_p5 = scmp.ne.s32.totalorder %s3386_s5, %s4091_s26  ;;  %p4096_p6 = scmp.lt.s32.totalorder %s3386_s5, %s3386_s5 }
 0x20e   :  { %v2557_v38 = vpack.c.bf16 %v2521_v48, %v2517_v63  ;;  %v2458_v33 = vmul.f32 0.2, %v2327_v19  ;;  %v2221_v32 = vpop.f32.mrf.mxu0  ;;  %3367 = vmatprep.mubr.f32.mxu0 %v3300_v8  ;;  %3285 = vperm.xlu0 %3675, %v3282_v54   ;;  %p4097_p7 = scmp.lt.s32.totalorder %s4095_s27, %s4091_s26 }
 0x20f   :  { %v2222_v9 = vadd.f32 %v2221_v32, %v5629_v49  ;;  %v2334_v44 = vpop.f32.mrf.mxu1  ;;  %v2333_v62 = vadd.f32 %v2332_v18, %v2220_v27  ;;  %v2461_v41 = vmul.f32 0.2, %v2331_v25  ;;  %vm2397_vm13 = vcmp.ge.f32.partialorder %v2331_v25, 0.0 }
 0x210   :  { %v2223_v20 = vpop.f32.mrf.mxu0  ;;  %v2522_v28 = vsel %vm2394_vm12, %v2327_v19, %v2458_v33  ;;  %p4098_p8 = por %p4097_p7, %p4096_p6 }
 0x211   :  { %v2335_v10 = vadd.f32 %v2334_v44, %v2222_v9  ;;  %v2224_v7 = vadd.f32 %v2223_v20, %v2111_v35  ;;  %v2558_v56 = vpack.c.bf16 %v2522_v28, %v2518_v53  ;;  %v2336_v5 = vpop.f32.mrf.mxu1  ;;  %v2462_v50 = vmul.f32 0.2, %v2333_v62 }
 0x212   :  { %v2525_v37 = vsel %vm2397_vm13, %v2331_v25, %v2461_v41  ;;  %vm2398_vm15 = vcmp.ge.f32.partialorder %v2333_v62, 0.0  ;;  %p4099_p9 = pnand %p4098_p8, %p4092_p5 }
 0x213   :  { %vm2401_vm14 = vcmp.ge.f32.partialorder %v2335_v10, 0.0  ;;  %v2465_v43 = vmul.f32 0.2, %v2335_v10  ;;  %v2337_v52 = vadd.f32 %v2336_v5, %v2224_v7  ;;  %3164 = vmatprep.mubr.bf16.mxu1 %v2558_v56  ;;  %v2526_v30 = vsel %vm2398_vm15, %v2333_v62, %v2462_v50 }
 0x214   :  { %3165 = vmatmul.mubr.bf16.gmra.mxu1 %v2557_v38 }
 0x215   :  { %v2529_v49 = vsel %vm2401_vm14, %v2335_v10, %v2465_v43  ;;  %vm2402_vm0 = vcmp.ge.f32.partialorder %v2337_v52, 0.0  ;;  %v2466_v13 = vmul.f32 0.2, %v2337_v52 }
 0x216   :  { %v2561_v60 = vpack.c.bf16 %v2529_v49, %v2525_v37 }
 0x217   :  { %v2530_v46 = vsel %vm2402_vm0, %v2337_v52, %v2466_v13 }
 0x218   :  { %v2562_v61 = vpack.c.bf16 %v2530_v46, %v2526_v30 }
 0x21a   :  { %3174 = vmatprep.mubr.bf16.mxu1 %v2562_v61 }
 0x21c   :  { %3175 = vmatmul.mubr.bf16.gmra.mxu1 %v2561_v60 }
 0x224   :  { %v2993_v24 = vpop.f32.mrf.mxu0 }
 0x225   :  { %v2994_v47 = vadd.f32 %v2993_v24, %v5685_v21 }
 0x226   :  { %v2995_v36 = vpop.f32.mrf.mxu0 }
 0x227   :  { %v2996_v58 = vadd.f32 %v2995_v36, %v5688_v1 }
 0x228   :  { %v2997_v16 = vpop.f32.mrf.mxu0 }
 0x229   :  { %v2998_v57 = vadd.f32 %v2997_v16, %v5685_v21 }
 0x22a   :  { %v2999_v23 = vpop.f32.mrf.mxu0 }
 0x22b   :  { %v3000_v18 = vadd.f32 %v2999_v23, %v5688_v1 }
 0x22c   :  { %v3003_v29 = vpop.f32.mrf.mxu0 }
 0x22d   :  { %v3004_v34 = vadd.f32 %v3003_v29, %v5685_v21 }
 0x22e   :  { %v3005_v2 = vpop.f32.mrf.mxu0 }
 0x22f   :  { %v3006_v33 = vadd.f32 %v3005_v2, %v5688_v1 }
 0x230   :  { %v3007_v26 = vpop.f32.mrf.mxu0 }
 0x231   :  { %v3008_v35 = vadd.f32 %v3007_v26, %v5685_v21 }
 0x232   :  { %v3009_v55 = vpop.f32.mrf.mxu0 }
 0x233   :  { %v3010_v28 = vadd.f32 %v3009_v55, %v5688_v1 }
 0x234   :  { %v3013_v15 = vpop.f32.mrf.mxu0 }
 0x235   :  { %v3014_v7 = vadd.f32 %v3013_v15, %v5685_v21 }
 0x236   :  { %v3015_v4 = vpop.f32.mrf.mxu0 }
 0x237   :  { %v3016_v5 = vadd.f32 %v3015_v4, %v5688_v1 }
 0x238   :  { %v3017_v0 = vpop.f32.mrf.mxu0 }
 0x239   :  { %v3018_v49 = vadd.f32 %v3017_v0, %v5685_v21 }
 0x23a   :  { %v3019_v11 = vpop.f32.mrf.mxu0 }
 0x23b   :  { %v3020_v30 = vadd.f32 %v3019_v11, %v5688_v1 }
 0x23c   :  { %v3023_v39 = vpop.f32.mrf.mxu0 }
 0x23d   :  { %v3024_v36 = vadd.f32 %v3023_v39, %v5685_v21 }
 0x23e   :  { %v3025_v14 = vpop.f32.mrf.mxu0 }
 0x23f   :  { %v3026_v29 = vadd.f32 %v3025_v14, %v5688_v1 }
 0x240   :  { %v3027_v17 = vpop.f32.mrf.mxu0 }
 0x241   :  { %v3028_v15 = vadd.f32 %v3027_v17, %v5685_v21 }
 0x242   :  { %v5682_v31 = vpop.f32.mrf.mxu0 }
 0x244   :  { %v5690_v42 = vpop.f32.mrf.mxu0 }
 0x246   :  { %v5703_v22 = vpop.f32.mrf.mxu0 }
 0x248   :  { %v5711_v48 = vpop.f32.mrf.mxu0 }
 0x24a   :  { %v5719_v9 = vpop.f32.mrf.mxu0 }
 0x24c   :  { %v5727_v10 = vpop.f32.mrf.mxu0 }
 0x24e   :  { %v5735_v52 = vpop.f32.mrf.mxu0 }
 0x250   :  { %v5743_v61 = vpop.f32.mrf.mxu0 }
 0x252   :  { %v3049_v26 = vpop.f32.mrf.mxu0 }
 0x254   :  { %v3053_v45 = vpop.f32.mrf.mxu0 }
 0x2a4   :  { %v3106_v51 = vpop.f32.mrf.mxu1 }
 0x2a5   :  { %v5699_v40 = vadd.f32 %v3106_v51, %v2994_v47  ;;  %v3055_v51 = vpop.f32.mrf.mxu0 }
 0x2a6   :  { %v3108_v12 = vpop.f32.mrf.mxu1 }
 0x2a7   :  { %v5706_v63 = vadd.f32 %v3108_v12, %v2996_v58  ;;  %v3057_v8 = vpop.f32.mrf.mxu0 }
 0x2a8   :  { %v3110_v19 = vpop.f32.mrf.mxu1 }
 0x2a9   :  { %v5709_v59 = vadd.f32 %v3110_v19, %v2998_v57  ;;  %v3059_v17 = vpop.f32.mrf.mxu0 }
 0x2aa   :  { %v3112_v25 = vpop.f32.mrf.mxu1 }
 0x2ab   :  { %v5714_v27 = vadd.f32 %v3112_v25, %v3000_v18  ;;  %v3063_v18 = vpop.f32.mrf.mxu0 }
 0x2ac   :  { %v3116_v38 = vpop.f32.mrf.mxu1 }
 0x2ad   :  { %v5717_v32 = vadd.f32 %v3116_v38, %v3004_v34  ;;  %v3065_v38 = vpop.f32.mrf.mxu0 }
 0x2ae   :  { %v3118_v44 = vpop.f32.mrf.mxu1 }
 0x2af   :  { %v5722_v62 = vadd.f32 %v3118_v44, %v3006_v33 }
 0x2b0   :  { %v3120_v20 = vpop.f32.mrf.mxu1 }
 0x2b1   :  { %v5725_v41 = vadd.f32 %v3120_v20, %v3008_v35  ;;  %v3067_v35 = vpop.f32.mrf.mxu0 }
 0x2b2   :  { %v3122_v53 = vpop.f32.mrf.mxu1 }
 0x2b3   :  { %v5730_v56 = vadd.f32 %v3122_v53, %v3010_v28  ;;  %v3069_v53 = vpop.f32.mrf.mxu0 }
 0x2b4   :  { %v3126_v43 = vpop.f32.mrf.mxu1 }
 0x2b5   :  { %v5733_v50 = vadd.f32 %v3126_v43, %v3014_v7  ;;  %v3066_v43 = vadd.f32 %v3065_v38, %v5688_v1  ;;  %v3058_v38 = vadd.f32 %v3057_v8, %v5685_v21 }
 0x2b6   :  { %v3128_v37 = vpop.f32.mrf.mxu1 }
 0x2b7   :  { %v5738_v60 = vadd.f32 %v3128_v37, %v3016_v5  ;;  %v3068_v5 = vadd.f32 %v3067_v35, %v5685_v21  ;;  %v3056_v35 = vadd.f32 %v3055_v51, %v5688_v1 }
 0x2b8   :  { %v3130_v13 = vpop.f32.mrf.mxu1 }
 0x2b9   :  { %v5741_v46 = vadd.f32 %v3130_v13, %v3018_v49  ;;  %v3070_v49 = vadd.f32 %v3069_v53, %v5688_v1 }
 0x2ba   :  { %v3132_v24 = vpop.f32.mrf.mxu1 }
 0x2bb   :  { %v5746_v16 = vadd.f32 %v3132_v24, %v3020_v30  ;;  %v3060_v24 = vadd.f32 %v3059_v17, %v5688_v1 }
 0x2bc   :  { %v3136_v23 = vpop.f32.mrf.mxu1 }
 0x2bd   :  { %v5749_v2 = vadd.f32 %v3136_v23, %v3024_v36  ;;  %v3064_v36 = vadd.f32 %v3063_v18, %v5685_v21 }
 0x2be   :  { %v3138_v55 = vpop.f32.mrf.mxu1 }
 0x2bf   :  { %v5752_v4 = vadd.f32 %v3138_v55, %v3026_v29 }
 0x2c0   :  { %v3140_v0 = vpop.f32.mrf.mxu1 }
 0x2c1   :  { %v5754_v11 = vadd.f32 %v3140_v0, %v3028_v15 }
 0x2c2   :  { %v5756_v47 = vpop.f32.mrf.mxu1 }
 0x2c4   :  { %v5758_v39 = vpop.f32.mrf.mxu1 }
 0x2c6   :  { %v5760_v58 = vpop.f32.mrf.mxu1 }
 0x2c8   :  { %v5762_v14 = vpop.f32.mrf.mxu1 }
 0x2ca   :  { %v5764_v12 = vpop.f32.mrf.mxu1 }
 0x2cc   :  { %v5766_v57 = vpop.f32.mrf.mxu1 }
 0x2ce   :  { %v5768_v19 = vpop.f32.mrf.mxu1 }
 0x2d0   :  { %v3160_v54 = vpop.f32.mrf.mxu1 }
 0x2d2   :  { %v3162_v25 = vpop.f32.mrf.mxu1 }
 0x2d4   :  { %v3166_v34 = vpop.f32.mrf.mxu1 }
 0x2d6   :  { %v3168_v33 = vpop.f32.mrf.mxu1 }
 0x2d7   :  { %v3169_v18 = vadd.f32 %v3168_v33, %v3056_v35  ;;  %v3048_v33 = vadd.f32 %v5743_v61, %v5685_v21  ;;  %v3040_v61 = vadd.f32 %v5719_v9, %v5688_v1 }
 0x2d8   :  { %v3170_v44 = vpop.f32.mrf.mxu1 }
 0x2d9   :  { %vm3210_vm7 = vcmp.ge.f32.partialorder %v3169_v18, 0.0 }
 0x2da   :  { %v3172_v20 = vpop.f32.mrf.mxu1 }
 0x2db   :  { %v3173_v55 = vadd.f32 %v3172_v20, %v3060_v24 }
 0x2dc   :  { %v3176_v28 = vpop.f32.mrf.mxu1 }
 0x2dd   :  { %v3177_v15 = vadd.f32 %v3176_v28, %v3064_v36  ;;  %v3054_v28 = vadd.f32 %v3053_v45, %v5685_v21  ;;  %vm3212_vm5 = vcmp.ge.f32.partialorder %v3173_v55, 0.0  ;;  %v3161_v45 = vadd.f32 %v3160_v54, %v3048_v33 }
 0x2de   :  { %v3178_v7 = vpop.f32.mrf.mxu1  ;;  %v3044_v36 = vadd.f32 %v5727_v10, %v5685_v21  ;;  %v3036_v10 = vadd.f32 %v5703_v22, %v5688_v1  ;;  %v3223_v33 = vmul.f32 0.2, %v5725_v41 }
 0x2df   :  { %v3179_v13 = vadd.f32 %v3178_v7, %v3066_v43  ;;  %v3171_v7 = vadd.f32 %v3170_v44, %v3058_v38  ;;  %v3245_v43 = vmul.f32 0.2, %v3177_v15  ;;  %vm3213_vm4 = vcmp.ge.f32.partialorder %v3177_v15, 0.0 }
 0x2e0   :  { %v3180_v37 = vpop.f32.mrf.mxu1  ;;  %v3167_v8 = vadd.f32 %v3166_v34, %v3054_v28  ;;  %vm3207_vm10 = vcmp.ge.f32.partialorder %v3161_v45, 0.0  ;;  %v3149_v38 = vadd.f32 %v5760_v58, %v3036_v10 }
 0x2e1   :  { %v3181_v30 = vadd.f32 %v3180_v37, %v3068_v5  ;;  %v3246_v3 = vmul.f32 0.2, %v3179_v13  ;;  %vm3214_vm3 = vcmp.ge.f32.partialorder %v3179_v13, 0.0  ;;  %v3244_v5 = vmul.f32 0.2, %v3173_v55 }
 0x2e2   :  { %v3182_v23 = vpop.f32.mrf.mxu1  ;;  %v3050_v37 = vadd.f32 %v3049_v26, %v5688_v1  ;;  %v3277_v24 = vsel %vm3213_vm4, %v3177_v15, %v3245_v43  ;;  %vm3211_vm6 = vcmp.ge.f32.partialorder %v3171_v7, 0.0  ;;  %vm3209_vm8 = vcmp.ge.f32.partialorder %v3167_v8, 0.0 }
 0x2e3   :  { %v3183_v29 = vadd.f32 %v3182_v23, %v3070_v49  ;;  %v3247_v0 = vmul.f32 0.2, %v3181_v30  ;;  %vm3215_vm1 = vcmp.ge.f32.partialorder %v3181_v30, 0.0  ;;  %v3278_v20 = vsel %vm3214_vm3, %v3179_v13, %v3246_v3 }
 0x2e4   :  { %v3243_v49 = vmul.f32 0.2, %v3171_v7  ;;  %v3163_v51 = vadd.f32 %v3162_v25, %v3050_v37  ;;  %v3276_v44 = vsel %vm3212_vm5, %v3173_v55, %v3244_v5  ;;  %v3046_v3 = vadd.f32 %v5735_v52, %v5688_v1 }
 0x2e5   :  { %v3248_v6 = vmul.f32 0.2, %v3183_v29  ;;  %vm3216_vm2 = vcmp.ge.f32.partialorder %v3183_v29, 0.0  ;;  %v3279_v17 = vsel %vm3215_vm1, %v3181_v30, %v3247_v0  ;;  %v3241_v13 = vmul.f32 0.2, %v3167_v8 }
 0x2e6   :  { %v3275_v30 = vsel %vm3211_vm6, %v3171_v7, %v3243_v49  ;;  %v3159_v26 = vadd.f32 %v5768_v19, %v3046_v3  ;;  %v3240_v34 = vmul.f32 0.2, %v3163_v51  ;;  %vm3208_vm9 = vcmp.ge.f32.partialorder %v3163_v51, 0.0 }
 0x2e7   :  { %v3280_v53 = vsel %vm3216_vm2, %v3183_v29, %v3248_v6  ;;  %v3242_v6 = vmul.f32 0.2, %v3169_v18  ;;  %v3157_v23 = vadd.f32 %v5766_v57, %v3044_v36  ;;  %v3239_v52 = vmul.f32 0.2, %v3161_v45  ;;  %v5887_v36 = vld [vmem:[#allocation15_spill] sm:$0xff] }
 0x2e8   :  { %3303 = vmatprep.subr.mxu0 %v3280_v53  ;;  %v3273_v54 = vsel %vm3209_vm8, %v3167_v8, %v3241_v13  ;;  %v3153_v29 = vadd.f32 %v5764_v12, %v3040_v61  ;;  %v3238_v55 = vmul.f32 0.2, %v3159_v26  ;;  %v3272_v19 = vsel %vm3208_vm9, %v3163_v51, %v3240_v34  ;;  %v5888_v61 = vld [vmem:[#allocation9_spill] sm:$0xff] }
 0x2e9   :  { %3304 = vmatpush1.xpose.msra.mxu0 %v3279_v17  ;;  %v3274_v25 = vsel %vm3210_vm7, %v3169_v18, %v3242_v6  ;;  %v3038_v15 = vadd.f32 %v5711_v48, %v5685_v21  ;;  %vm3206_vm11 = vcmp.ge.f32.partialorder %v3159_v26, 0.0  ;;  %v3237_v0 = vmul.f32 0.2, %v3157_v23 }
 0x2ea   :  { %3305 = vmatprep.subr.mxu0 %v3278_v20  ;;  %v3271_v57 = vsel %vm3207_vm10, %v3161_v45, %v3239_v52  ;;  %v3236_v35 = vmul.f32 0.2, %v3153_v29  ;;  %vm3205_vm12 = vcmp.ge.f32.partialorder %v3157_v23, 0.0  ;;  %v3270_v12 = vsel %vm3206_vm11, %v3159_v26, %v3238_v55 }
 0x2eb   :  { %v3151_v9 = vadd.f32 %v5762_v14, %v3038_v15  ;;  %v3034_v53 = vadd.f32 %v5690_v42, %v5685_v21  ;;  %vm3204_vm13 = vcmp.ge.f32.partialorder %v3153_v29, 0.0  ;;  %v3030_v48 = vadd.f32 %v5682_v31, %v5688_v1 }
 0x2ec   :  { %v3269_v14 = vsel %vm3205_vm12, %v3157_v23, %v3237_v0  ;;  %v3234_v17 = vmul.f32 0.2, %v3149_v38  ;;  %v3268_v58 = vsel %vm3204_vm13, %v3153_v29, %v3236_v35  ;;  %vm3202_vm15 = vcmp.ge.f32.partialorder %v3149_v38, 0.0 }
 0x2ed   :  { %3306 = vmatpush1.xpose.msra.mxu0 %v3277_v24  ;;  %v3147_v22 = vadd.f32 %v5758_v39, %v3034_v53  ;;  %v3235_v7 = vmul.f32 0.2, %v3151_v9  ;;  %v3143_v43 = vadd.f32 %v5756_v47, %v3030_v48  ;;  %vm3203_vm14 = vcmp.ge.f32.partialorder %v3151_v9, 0.0 }
 0x2ee   :  { %3307 = vmatprep.subr.mxu0 %v3276_v44  ;;  %v3266_v42 = vsel %vm3202_vm15, %v3149_v38, %v3234_v17  ;;  %v3231_v31 = vmul.f32 0.2, %v5754_v11  ;;  %v3230_v39 = vmul.f32 0.2, %v5752_v4  ;;  %vm3199_vm2 = vcmp.ge.f32.partialorder %v5754_v11, 0.0 }
 0x2ef   :  { %v3233_v18 = vmul.f32 0.2, %v3147_v22  ;;  %v3267_v5 = vsel %vm3203_vm14, %v3151_v9, %v3235_v7  ;;  %v3232_v21 = vmul.f32 0.2, %v3143_v43  ;;  %vm3201_vm0 = vcmp.ge.f32.partialorder %v3147_v22, 0.0 }
 0x2f0   :  { %vm3200_vm1 = vcmp.ge.f32.partialorder %v3143_v43, 0.0  ;;  %vm3198_vm3 = vcmp.ge.f32.partialorder %v5752_v4, 0.0  ;;  %v3229_v20 = vmul.f32 0.2, %v5749_v2  ;;  %v3263_v28 = vsel %vm3199_vm2, %v5754_v11, %v3231_v31 }
 0x2f1   :  { %3308 = vmatpush1.xpose.msra.mxu0 %v3275_v30  ;;  %v3265_v1 = vsel %vm3201_vm0, %v3147_v22, %v3233_v18  ;;  %v3264_v47 = vsel %vm3200_vm1, %v3143_v43, %v3232_v21  ;;  %v3228_v37 = vmul.f32 0.2, %v5746_v16  ;;  %vm3197_vm4 = vcmp.ge.f32.partialorder %v5749_v2, 0.0 }
 0x2f2   :  { %3309 = vmatprep.subr.mxu0 %v3274_v25  ;;  %v3262_v8 = vsel %vm3198_vm3, %v5752_v4, %v3230_v39  ;;  %vm3196_vm5 = vcmp.ge.f32.partialorder %v5746_v16, 0.0  ;;  %v3227_v49 = vmul.f32 0.2, %v5741_v46  ;;  %v3261_v24 = vsel %vm3197_vm4, %v5749_v2, %v3229_v20 }
 0x2f3   :  { %v3226_v51 = vmul.f32 0.2, %v5738_v60  ;;  %vm3195_vm6 = vcmp.ge.f32.partialorder %v5741_v46, 0.0  ;;  %v3260_v11 = vsel %vm3196_vm5, %v5746_v16, %v3228_v37  ;;  %vm3194_vm7 = vcmp.ge.f32.partialorder %v5738_v60, 0.0 }
 0x2f4   :  { %v3225_v6 = vmul.f32 0.2, %v5733_v50  ;;  %v3259_v4 = vsel %vm3195_vm6, %v5741_v46, %v3227_v49  ;;  %v3224_v44 = vmul.f32 0.2, %v5730_v56  ;;  %vm3193_vm8 = vcmp.ge.f32.partialorder %v5733_v50, 0.0 }
 0x2f5   :  { %3310 = vmatpush1.xpose.msra.mxu0 %v3273_v54  ;;  %v3258_v2 = vsel %vm3194_vm7, %v5738_v60, %v3226_v51  ;;  %vm3192_vm9 = vcmp.ge.f32.partialorder %v5730_v56, 0.0  ;;  %v3222_v3 = vmul.f32 0.2, %v5722_v62  ;;  %vm3191_vm10 = vcmp.ge.f32.partialorder %v5725_v41, 0.0 }
 0x2f6   :  { %3311 = vmatprep.subr.mxu0 %v3272_v19  ;;  %v3257_v16 = vsel %vm3193_vm8, %v5733_v50, %v3225_v6  ;;  %v3256_v46 = vsel %vm3192_vm9, %v5730_v56, %v3224_v44  ;;  %vm3190_vm11 = vcmp.ge.f32.partialorder %v5722_v62, 0.0  ;;  %v3221_v45 = vmul.f32 0.2, %v5717_v32 }
 0x2f7   :  { %v3255_v60 = vsel %vm3191_vm10, %v5725_v41, %v3223_v33  ;;  %v3220_v13 = vmul.f32 0.2, %v5714_v27  ;;  %vm3189_vm12 = vcmp.ge.f32.partialorder %v5717_v32, 0.0  ;;  %v3254_v50 = vsel %vm3190_vm11, %v5722_v62, %v3222_v3 }
 0x2f8   :  { %vm3188_vm13 = vcmp.ge.f32.partialorder %v5714_v27, 0.0  ;;  %v3219_v30 = vmul.f32 0.2, %v5709_v59  ;;  %v3253_v56 = vsel %vm3189_vm12, %v5717_v32, %v3221_v45  ;;  %v3218_v26 = vmul.f32 0.2, %v5706_v63 }
 0x2f9   :  { %3312 = vmatpush1.xpose.msra.mxu0 %v3271_v57  ;;  %vm3187_vm14 = vcmp.ge.f32.partialorder %v5709_v59, 0.0  ;;  %v3252_v41 = vsel %vm3188_vm13, %v5714_v27, %v3220_v13  ;;  %vm3186_vm15 = vcmp.ge.f32.partialorder %v5706_v63, 0.0  ;;  %v3217_v34 = vmul.f32 0.2, %v5699_v40  ;;  %v3286_v27 = vpop.permute.xlu0 %3285 }
 0x2fa   :  { %3313 = vmatprep.subr.mxu0 %v3270_v12  ;;  %v3251_v62 = vsel %vm3187_vm14, %v5709_v59, %v3219_v30  ;;  %vm3185_vm0 = vcmp.ge.f32.partialorder %v5699_v40, 0.0  ;;  %v3250_v25 = vsel %vm3186_vm15, %v5706_v63, %v3218_v26  ;;  %v3296_v23 = vrot.slane %v5888_v61, %v5887_v36 }
 0x2fb   :  { %v3249_v32 = vsel %vm3185_vm0, %v5699_v40, %v3217_v34  ;;  %v3291_v52 = vrot.slane %v3286_v27, %v5887_v36 }
 0x2fd   :  { %3314 = vmatpush1.xpose.msra.mxu0 %v3269_v14 }
 0x2fe   :  { %3315 = vmatprep.subr.mxu0 %v3268_v58 }
 0x301   :  { %3316 = vmatpush1.xpose.msra.mxu0 %v3267_v5 }
 0x302   :  { %3317 = vmatprep.subr.mxu0 %v3266_v42 }
 0x305   :  { %3318 = vmatpush1.xpose.msra.mxu0 %v3265_v1 }
 0x306   :  { %3319 = vmatprep.subr.mxu0 %v3264_v47 }
 0x309   :  { %3320 = vmatpush1.xpose.msra.mxu0 %v3263_v28 }
 0x30a   :  { %3321 = vmatprep.subr.mxu0 %v3262_v8 }
 0x30d   :  { %3322 = vmatpush1.xpose.msra.mxu0 %v3261_v24 }
 0x30e   :  { %3323 = vmatprep.subr.mxu0 %v3260_v11 }
 0x311   :  { %3324 = vmatpush1.xpose.msra.mxu0 %v3259_v4 }
 0x312   :  { %3325 = vmatprep.subr.mxu0 %v3258_v2 }
 0x315   :  { %3326 = vmatpush1.xpose.msra.mxu0 %v3257_v16 }
 0x316   :  { %3327 = vmatprep.subr.mxu0 %v3256_v46 }
 0x319   :  { %3328 = vmatpush1.xpose.msra.mxu0 %v3255_v60 }
 0x31a   :  { %3329 = vmatprep.subr.mxu0 %v3254_v50 }
 0x31d   :  { %3330 = vmatpush1.xpose.msra.mxu0 %v3253_v56 }
 0x31e   :  { %3331 = vmatprep.subr.mxu0 %v3252_v41 }
 0x321   :  { %3332 = vmatpush1.xpose.msra.mxu0 %v3251_v62 }
 0x322   :  { %3333 = vmatprep.subr.mxu0 %v3250_v25 }
 0x325   :  { %3334 = vmatpush1.xpose.msra.mxu0 %v3249_v32 }
 0x328   :  { %3368 = vmatmul.mubr.f32.vlgmr.msra.gmra.mxu0 %v3296_v23 }
 0x3e8   :  { %v3369_v54 = vpop.f32.mrf.mxu0 }
 0x3e9   :  { %v3370_v29 = vadd.f32 %v3369_v54, %v3291_v52 }
 0x3ea   :  { %v3371_v55 = vpop.f32.mrf.mxu0 }
 0x3eb   :  { %v3373_v59 = vsub.f32 0.0, %v3370_v29 }
 0x3ed   :  { %v3374_v19 = vmul.f32 1.442695, %v3373_v59 }
 0x3ef   :  { %4066 = vpow2.f32 %v3374_v19 }
 0x3fc   :  { %v4067_v15 = vpop.eup %4066 }
 0x3fd   :  { %v3376_v10 = vadd.f32 1.0, %v4067_v15 }
 0x3ff   :  { %4068 = vrcp.f32 %v3376_v10 }
 0x40c   :  { %v4069_v40 = vpop.eup %4068 }
 0x40d   :  { %3378 = vst [vmem:[#allocation6] sm:$0x1] %v4069_v40 }
 0x40e   :  { %4102 = shalt.err (!%p4099_p9)
}
 0x40f   :  { %3388 = dma.vmem_to_hbm [thread:$0]  %s3386_s5, 16, %s5860_s7, [#allocation5]  }
 0x410   :  { %4113 = dma.done.wait [#allocation5], 16  }
 0x411   :  { %4114 = vsyncadd [#allocation5], 4294967280 }
 0x412   :  { %3392 = vsyncpa [#allocation4], 1 }
 0x413   :  { %3393 = vsyncpa [#allocation5], 1 }

</bundles_post_ra>
